<compile_context>
chip_gen: v7x
topology: tpu7x:2x2x1
jax: 0.10.0
libtpu: 0.0.40
codegen_flags: <defaults>
</compile_context>

<pallas_src>
import math
import functools

import jax
import jax.numpy as jnp
from jax.experimental import pallas as pl
from jax.experimental.pallas import tpu as pltpu

VMEM_SPEC = pl.BlockSpec(memory_space=pltpu.MemorySpace.VMEM)


# ----------------------------------------------------------------------------
# Fused forward kernel
# ----------------------------------------------------------------------------
def _fused_forward_kernel(tok_ref, pos_ref, seg_ref,
                          wq_ref, wk_ref, wv_ref, bq_ref, bk_ref, bv_ref,
                          wo_ref, bo_ref, g1_ref, be1_ref,
                          w1_ref, b1_ref, w2_ref, b2_ref, g2_ref, be2_ref,
                          wp_ref, bp_ref, o_ref, *, n_layers, n_heads):
    B, S, D = tok_ref.shape
    dh = D // n_heads
    inv_sqrt_dh = 1.0 / math.sqrt(dh)

    # ---- embeddings (sqrt(D) already folded into the token table) ----------
    x = (tok_ref[...] + pos_ref[...] + seg_ref[...]).astype(jnp.float32)
    xf = x.reshape(B * S, D)                                   # (B*S, D) f32

    # ---- post-norm encoder layers, statically unrolled ----------------------
    for li in range(n_layers):
        xb = xf.astype(jnp.bfloat16)                            # MXU operand

        # -- multi-head self attention (head-major weights, no lane slicing) --
        attn = jnp.zeros((B * S, D), jnp.float32)
        for h in range(n_heads):                                # static unroll
            q = (jnp.dot(xb, wq_ref[li, h], preferred_element_type=jnp.float32)
                 + bq_ref[li, h]).reshape(B, S, dh)
            k = (jnp.dot(xb, wk_ref[li, h], preferred_element_type=jnp.float32)
                 + bk_ref[li, h]).reshape(B, S, dh)
            v = (jnp.dot(xb, wv_ref[li, h], preferred_element_type=jnp.float32)
                 + bv_ref[li, h]).reshape(B, S, dh)

            s = jnp.einsum('bqd,bkd->bqk',
                           q.astype(jnp.bfloat16), k.astype(jnp.bfloat16),
                           preferred_element_type=jnp.float32) * inv_sqrt_dh
            s = s - jnp.max(s, axis=-1, keepdims=True)          # f32 softmax
            p = jnp.exp(s)
            p = p * pl.reciprocal(jnp.sum(p, axis=-1, keepdims=True),
                                  approx=True)

            ctx = jnp.einsum('bqk,bkd->bqd',
                             p.astype(jnp.bfloat16), v.astype(jnp.bfloat16),
                             preferred_element_type=jnp.float32)
            # per-head output projection accumulation (replaces concat + big dot)
            attn = attn + jnp.dot(ctx.reshape(B * S, dh).astype(jnp.bfloat16),
                                  wo_ref[li, h],
                                  preferred_element_type=jnp.float32)
        attn = attn + bo_ref[li]

        # -- residual + LayerNorm 1 (eps=1e-5), f32 math ----------------------
        x1 = xf + attn
        mu = jnp.mean(x1, axis=-1, keepdims=True)
        var = jnp.mean((x1 - mu) ** 2, axis=-1, keepdims=True)
        x1 = (x1 - mu) * jax.lax.rsqrt(var + 1e-5) * g1_ref[li] + be1_ref[li]

        # -- feed forward (ReLU) ----------------------------------------------
        h1 = jnp.dot(x1.astype(jnp.bfloat16), w1_ref[li],
                     preferred_element_type=jnp.float32) + b1_ref[li]
        h1 = jnp.maximum(h1, 0.0)
        ff = jnp.dot(h1.astype(jnp.bfloat16), w2_ref[li],
                     preferred_element_type=jnp.float32) + b2_ref[li]

        # -- residual + LayerNorm 2 --------------------------------------------
        x2 = x1 + ff
        mu = jnp.mean(x2, axis=-1, keepdims=True)
        var = jnp.mean((x2 - mu) ** 2, axis=-1, keepdims=True)
        xf = (x2 - mu) * jax.lax.rsqrt(var + 1e-5) * g2_ref[li] + be2_ref[li]

    # ---- mean-pool over sequence + Linear(D -> 1) head -----------------------
    m = jnp.mean(xf.reshape(B, S, D), axis=1)                   # (B, D)
    y = jnp.dot(m, wp_ref[...], preferred_element_type=jnp.float32) + bp_ref[...]
    o_ref[...] = y.astype(o_ref.dtype)


# ----------------------------------------------------------------------------
# Parameter init (deterministic, xavier-uniform like the PyTorch init_weights)
# ----------------------------------------------------------------------------
def _xavier(key, shape):
    limit = math.sqrt(6.0 / (shape[0] + shape[1]))
    return jax.random.uniform(key, shape, jnp.float32, -limit, limit)


def init_params(key, vocab_size, lang_len, world_len,
                d_embedding, d_hidden, n_layers, n_heads):
    S = lang_len + 2 * world_len
    D, Hf, Hn, L = d_embedding, d_hidden, n_heads, n_layers
    dh = D // Hn
    keys = jax.random.split(key, n_layers + 3)

    token_emb = _xavier(keys[0], (vocab_size, D))
    seg_emb = _xavier(keys[1], (3, D))

    # sinusoidal position encoding (positions 1..S, as in PositionEncoder)
    position = jnp.arange(1, S + 1, dtype=jnp.float32)[:, None]
    div_term = jnp.exp(jnp.arange(0, D, 2, dtype=jnp.float32)
                       * (-math.log(10000.0) / D))
    pe = jnp.zeros((S, D), jnp.float32)
    pe = pe.at[:, 0::2].set(jnp.sin(position * div_term))
    pe = pe.at[:, 1::2].set(jnp.cos(position * div_term))      # D is even here

    wq_l, wk_l, wv_l, wo_l, w1_l, w2_l = [], [], [], [], [], []
    for li in range(n_layers):
        lk = jax.random.split(keys[2 + li], 4)
        wqkv = _xavier(lk[0], (3 * D, D))                       # in_proj_weight
        Wq, Wk, Wv = wqkv[:D], wqkv[D:2 * D], wqkv[2 * D:]
        # head-major (H, D, dh): column-block h of W.T
        wq_l.append(Wq.T.reshape(D, Hn, dh).transpose(1, 0, 2))
        wk_l.append(Wk.T.reshape(D, Hn, dh).transpose(1, 0, 2))
        wv_l.append(Wv.T.reshape(D, Hn, dh).transpose(1, 0, 2))
        Wo = _xavier(lk[1], (D, D))                             # out_proj.weight
        wo_l.append(Wo.T.reshape(Hn, dh, D))                    # (H, dh, D)
        w1_l.append(_xavier(lk[2], (Hf, D)).T)                  # (D, Hf)
        w2_l.append(_xavier(lk[3], (D, Hf)).T)                  # (Hf, D)

    return dict(
        cfg=dict(d_embedding=D, n_heads=Hn, n_layers=L),
        token_emb_scaled=token_emb * math.sqrt(D),              # sqrt(D) folded
        seg_emb=seg_emb,
        pos_enc=pe,
        wq=jnp.stack(wq_l).astype(jnp.bfloat16),                # (L, H, D, dh)
        wk=jnp.stack(wk_l).astype(jnp.bfloat16),
        wv=jnp.stack(wv_l).astype(jnp.bfloat16),
        bq=jnp.zeros((L, Hn, 1, dh), jnp.float32),
        bk=jnp.zeros((L, Hn, 1, dh), jnp.float32),
        bv=jnp.zeros((L, Hn, 1, dh), jnp.float32),
        wo=jnp.stack(wo_l).astype(jnp.bfloat16),                # (L, H, dh, D)
        bo=jnp.zeros((L, 1, D), jnp.float32),
        g1=jnp.ones((L, 1, D), jnp.float32),
        be1=jnp.zeros((L, 1, D), jnp.float32),
        w1=jnp.stack(w1_l).astype(jnp.bfloat16),                # (L, D, Hf)
        b1=jnp.zeros((L, 1, Hf), jnp.float32),
        w2=jnp.stack(w2_l).astype(jnp.bfloat16),                # (L, Hf, D)
        b2=jnp.zeros((L, 1, D), jnp.float32),
        g2=jnp.ones((L, 1, D), jnp.float32),
        be2=jnp.zeros((L, 1, D), jnp.float32),
        wp=_xavier(keys[n_layers + 2], (1, D)).T,               # (D, 1)
        bp=jnp.zeros((1, 1), jnp.float32),
    )


# ----------------------------------------------------------------------------
# Forward (JAX glue: concat + embedding gathers, then ONE fused pallas_call)
# ----------------------------------------------------------------------------
def learner_forward(params, t_lang, t_mind, t_world):
    cfg = params['cfg']
    B = t_lang.shape[0]

    t_cat = jnp.concatenate([t_lang, t_mind, t_world], axis=1)           # (B, S)
    seg_cat = jnp.concatenate([jnp.zeros_like(t_lang),
                               jnp.zeros_like(t_mind) + 1,
                               jnp.zeros_like(t_world) + 2], axis=1)

    tok = params['token_emb_scaled'][t_cat]     # (B, S, D), sqrt(D) pre-folded
    seg = params['seg_emb'][seg_cat]            # (B, S, D)
    pos = params['pos_enc']                     # (S, D), broadcast over batch

    kernel = functools.partial(_fused_forward_kernel,
                               n_layers=cfg['n_layers'],
                               n_heads=cfg['n_heads'])
    y = pl.pallas_call(
        kernel,
        out_shape=jax.ShapeDtypeStruct((B, 1), jnp.float32),
        in_specs=[VMEM_SPEC] * 21,
        out_specs=VMEM_SPEC,
    )(tok, pos, seg,
      params['wq'], params['wk'], params['wv'],
      params['bq'], params['bk'], params['bv'],
      params['wo'], params['bo'], params['g1'], params['be1'],
      params['w1'], params['b1'], params['w2'], params['b2'],
      params['g2'], params['be2'], params['wp'], params['bp'])
    return y


# ----------------------------------------------------------------------------
if __name__ == "__main__":
    vocab_size, lang_len, world_len = 16, 4, 2          # sent_len = 8
    d_embedding, d_hidden, n_layers, n_heads = 32, 64, 2, 4
    batch = 2

    key = jax.random.PRNGKey(0)
    pkey, dkey = jax.random.split(key)
    params = init_params(pkey, vocab_size, lang_len, world_len,
                         d_embedding, d_hidden, n_layers, n_heads)

    k1, k2, k3 = jax.random.split(dkey, 3)
    t_lang = jax.random.randint(k1, (batch, lang_len), 0, vocab_size, dtype=jnp.int32)
    t_mind = jax.random.randint(k2, (batch, world_len), 0, vocab_size, dtype=jnp.int32)
    t_world = jax.random.randint(k3, (batch, world_len), 0, vocab_size, dtype=jnp.int32)

    out = learner_forward(params, t_lang, t_mind, t_world)
    jax.block_until_ready(out)
    assert out.shape == (batch, 1), out.shape
    assert bool(jnp.all(jnp.isfinite(out)))
    print("KERNEL_OK")
</pallas_src>

<mosaic_0001>
module attributes {stable_mosaic.version = 11 : i64} {
  func.func @_fused_forward_kernel(%arg0: memref<2x8x32xf32, #tpu.memory_space<vmem>>, %arg1: memref<8x32xf32, #tpu.memory_space<vmem>>, %arg2: memref<2x8x32xf32, #tpu.memory_space<vmem>>, %arg3: memref<2x4x32x8xbf16, #tpu.memory_space<vmem>>, %arg4: memref<2x4x32x8xbf16, #tpu.memory_space<vmem>>, %arg5: memref<2x4x32x8xbf16, #tpu.memory_space<vmem>>, %arg6: memref<2x4x1x8xf32, #tpu.memory_space<vmem>>, %arg7: memref<2x4x1x8xf32, #tpu.memory_space<vmem>>, %arg8: memref<2x4x1x8xf32, #tpu.memory_space<vmem>>, %arg9: memref<2x4x8x32xbf16, #tpu.memory_space<vmem>>, %arg10: memref<2x1x32xf32, #tpu.memory_space<vmem>>, %arg11: memref<2x1x32xf32, #tpu.memory_space<vmem>>, %arg12: memref<2x1x32xf32, #tpu.memory_space<vmem>>, %arg13: memref<2x32x64xbf16, #tpu.memory_space<vmem>>, %arg14: memref<2x1x64xf32, #tpu.memory_space<vmem>>, %arg15: memref<2x64x32xbf16, #tpu.memory_space<vmem>>, %arg16: memref<2x1x32xf32, #tpu.memory_space<vmem>>, %arg17: memref<2x1x32xf32, #tpu.memory_space<vmem>>, %arg18: memref<2x1x32xf32, #tpu.memory_space<vmem>>, %arg19: memref<32x1xf32, #tpu.memory_space<vmem>>, %arg20: memref<1x1xf32, #tpu.memory_space<vmem>>, %arg21: memref<2x1xf32, #tpu.memory_space<vmem>>) attributes {dimension_semantics = [], scalar_prefetch = 0 : i64, scratch_operands = 0 : i64, tpu.core_type = #tpu.core_type<tc>} {
    %c0 = arith.constant 0 : index
    %c0_0 = arith.constant 0 : index
    %c0_1 = arith.constant 0 : index
    %0 = vector.load %arg0[%c0, %c0_0, %c0_1] : memref<2x8x32xf32, #tpu.memory_space<vmem>>, vector<2x8x32xf32>
    %c0_2 = arith.constant 0 : index
    %c0_3 = arith.constant 0 : index
    %1 = vector.load %arg1[%c0_2, %c0_3] : memref<8x32xf32, #tpu.memory_space<vmem>>, vector<8x32xf32>
    %2 = vector.shape_cast %1 : vector<8x32xf32> to vector<1x8x32xf32>
    %3 = vector.broadcast %2 : vector<1x8x32xf32> to vector<2x8x32xf32>
    %4 = arith.addf %0, %3 : vector<2x8x32xf32>
    %c0_4 = arith.constant 0 : index
    %c0_5 = arith.constant 0 : index
    %c0_6 = arith.constant 0 : index
    %5 = vector.load %arg2[%c0_4, %c0_5, %c0_6] : memref<2x8x32xf32, #tpu.memory_space<vmem>>, vector<2x8x32xf32>
    %6 = arith.addf %4, %5 : vector<2x8x32xf32>
    %7 = vector.shape_cast %6 : vector<2x8x32xf32> to vector<16x32xf32>
    %8 = arith.truncf %7 : vector<16x32xf32> to vector<16x32xbf16>
    %cst = arith.constant 0.000000e+00 : f32
    %9 = vector.broadcast %cst : f32 to vector<16x32xf32>
    %c0_7 = arith.constant 0 : index
    %c0_8 = arith.constant 0 : index
    %c0_9 = arith.constant 0 : index
    %c0_10 = arith.constant 0 : index
    %10 = vector.load %arg3[%c0_7, %c0_8, %c0_9, %c0_10] : memref<2x4x32x8xbf16, #tpu.memory_space<vmem>>, vector<1x1x32x8xbf16>
    %11 = vector.shape_cast %10 : vector<1x1x32x8xbf16> to vector<32x8xbf16>
    %cst_11 = arith.constant dense<0.000000e+00> : vector<16x8xf32>
    %12 = tpu.matmul %8, %11, %cst_11 {dimension_numbers = #tpu.dot_dimension_numbers<[1], [0], [0], [1], [0, 0, 1, 1], [], []>} : vector<16x32xbf16>, vector<32x8xbf16>, vector<16x8xf32> -> vector<16x8xf32>
    %c0_12 = arith.constant 0 : index
    %c0_13 = arith.constant 0 : index
    %c0_14 = arith.constant 0 : index
    %c0_15 = arith.constant 0 : index
    %13 = vector.load %arg6[%c0_12, %c0_13, %c0_14, %c0_15] : memref<2x4x1x8xf32, #tpu.memory_space<vmem>>, vector<1x1x1x8xf32>
    %14 = vector.shape_cast %13 : vector<1x1x1x8xf32> to vector<1x8xf32>
    %15 = vector.broadcast %14 : vector<1x8xf32> to vector<16x8xf32>
    %16 = arith.addf %12, %15 : vector<16x8xf32>
    %17 = vector.shape_cast %16 : vector<16x8xf32> to vector<2x8x8xf32>
    %c0_16 = arith.constant 0 : index
    %c0_17 = arith.constant 0 : index
    %c0_18 = arith.constant 0 : index
    %c0_19 = arith.constant 0 : index
    %18 = vector.load %arg4[%c0_16, %c0_17, %c0_18, %c0_19] : memref<2x4x32x8xbf16, #tpu.memory_space<vmem>>, vector<1x1x32x8xbf16>
    %19 = vector.shape_cast %18 : vector<1x1x32x8xbf16> to vector<32x8xbf16>
    %cst_20 = arith.constant dense<0.000000e+00> : vector<16x8xf32>
    %20 = tpu.matmul %8, %19, %cst_20 {dimension_numbers = #tpu.dot_dimension_numbers<[1], [0], [0], [1], [0, 0, 1, 1], [], []>} : vector<16x32xbf16>, vector<32x8xbf16>, vector<16x8xf32> -> vector<16x8xf32>
    %c0_21 = arith.constant 0 : index
    %c0_22 = arith.constant 0 : index
    %c0_23 = arith.constant 0 : index
    %c0_24 = arith.constant 0 : index
    %21 = vector.load %arg7[%c0_21, %c0_22, %c0_23, %c0_24] : memref<2x4x1x8xf32, #tpu.memory_space<vmem>>, vector<1x1x1x8xf32>
    %22 = vector.shape_cast %21 : vector<1x1x1x8xf32> to vector<1x8xf32>
    %23 = vector.broadcast %22 : vector<1x8xf32> to vector<16x8xf32>
    %24 = arith.addf %20, %23 : vector<16x8xf32>
    %25 = vector.shape_cast %24 : vector<16x8xf32> to vector<2x8x8xf32>
    %c0_25 = arith.constant 0 : index
    %c0_26 = arith.constant 0 : index
    %c0_27 = arith.constant 0 : index
    %c0_28 = arith.constant 0 : index
    %26 = vector.load %arg5[%c0_25, %c0_26, %c0_27, %c0_28] : memref<2x4x32x8xbf16, #tpu.memory_space<vmem>>, vector<1x1x32x8xbf16>
    %27 = vector.shape_cast %26 : vector<1x1x32x8xbf16> to vector<32x8xbf16>
    %cst_29 = arith.constant dense<0.000000e+00> : vector<16x8xf32>
    %28 = tpu.matmul %8, %27, %cst_29 {dimension_numbers = #tpu.dot_dimension_numbers<[1], [0], [0], [1], [0, 0, 1, 1], [], []>} : vector<16x32xbf16>, vector<32x8xbf16>, vector<16x8xf32> -> vector<16x8xf32>
    %c0_30 = arith.constant 0 : index
    %c0_31 = arith.constant 0 : index
    %c0_32 = arith.constant 0 : index
    %c0_33 = arith.constant 0 : index
    %29 = vector.load %arg8[%c0_30, %c0_31, %c0_32, %c0_33] : memref<2x4x1x8xf32, #tpu.memory_space<vmem>>, vector<1x1x1x8xf32>
    %30 = vector.shape_cast %29 : vector<1x1x1x8xf32> to vector<1x8xf32>
    %31 = vector.broadcast %30 : vector<1x8xf32> to vector<16x8xf32>
    %32 = arith.addf %28, %31 : vector<16x8xf32>
    %33 = vector.shape_cast %32 : vector<16x8xf32> to vector<2x8x8xf32>
    %34 = arith.truncf %17 : vector<2x8x8xf32> to vector<2x8x8xbf16>
    %35 = arith.truncf %25 : vector<2x8x8xf32> to vector<2x8x8xbf16>
    "tpu.trace_start"() <{level = 10 : i32, message = "bqd,bkd->bqk"}> : () -> ()
    %cst_34 = arith.constant dense<0.000000e+00> : vector<2x8x8xf32>
    %36 = tpu.matmul %34, %35, %cst_34 {dimension_numbers = #tpu.dot_dimension_numbers<[2], [2], [1], [1], [0, 0, 0, 1, 1, 1], [0], [0]>} : vector<2x8x8xbf16>, vector<2x8x8xbf16>, vector<2x8x8xf32> -> vector<2x8x8xf32>
    "tpu.trace_stop"() : () -> ()
    %cst_35 = arith.constant 0.353553385 : f32
    %37 = vector.broadcast %cst_35 : f32 to vector<2x8x8xf32>
    %38 = arith.mulf %36, %37 : vector<2x8x8xf32>
    %cst_36 = arith.constant dense<0xFF800000> : vector<2x8xf32>
    %39 = vector.multi_reduction <maximumf>, %38, %cst_36 [2] : vector<2x8x8xf32> to vector<2x8xf32>
    %40 = vector.shape_cast %39 : vector<2x8xf32> to vector<2x8x1xf32>
    %41 = vector.broadcast %40 : vector<2x8x1xf32> to vector<2x8x8xf32>
    %42 = arith.subf %38, %41 : vector<2x8x8xf32>
    %43 = math.exp %42 : vector<2x8x8xf32>
    %cst_37 = arith.constant dense<0.000000e+00> : vector<2x8xf32>
    %44 = vector.multi_reduction <add>, %43, %cst_37 [2] : vector<2x8x8xf32> to vector<2x8xf32>
    %45 = vector.shape_cast %44 : vector<2x8xf32> to vector<2x8x1xf32>
    %46 = tpu.reciprocal %45 {approx = true} : vector<2x8x1xf32> -> vector<2x8x1xf32>
    %47 = vector.broadcast %46 : vector<2x8x1xf32> to vector<2x8x8xf32>
    %48 = arith.mulf %43, %47 : vector<2x8x8xf32>
    %49 = arith.truncf %48 : vector<2x8x8xf32> to vector<2x8x8xbf16>
    %50 = arith.truncf %33 : vector<2x8x8xf32> to vector<2x8x8xbf16>
    "tpu.trace_start"() <{level = 10 : i32, message = "bqk,bkd->bqd"}> : () -> ()
    %cst_38 = arith.constant dense<0.000000e+00> : vector<2x8x8xf32>
    %51 = tpu.matmul %49, %50, %cst_38 {dimension_numbers = #tpu.dot_dimension_numbers<[2], [1], [1], [2], [0, 0, 0, 1, 1, 2], [0], [0]>} : vector<2x8x8xbf16>, vector<2x8x8xbf16>, vector<2x8x8xf32> -> vector<2x8x8xf32>
    "tpu.trace_stop"() : () -> ()
    %52 = vector.shape_cast %51 : vector<2x8x8xf32> to vector<16x8xf32>
    %53 = arith.truncf %52 : vector<16x8xf32> to vector<16x8xbf16>
    %c0_39 = arith.constant 0 : index
    %c0_40 = arith.constant 0 : index
    %c0_41 = arith.constant 0 : index
    %c0_42 = arith.constant 0 : index
    %54 = vector.load %arg9[%c0_39, %c0_40, %c0_41, %c0_42] : memref<2x4x8x32xbf16, #tpu.memory_space<vmem>>, vector<1x1x8x32xbf16>
    %55 = vector.shape_cast %54 : vector<1x1x8x32xbf16> to vector<8x32xbf16>
    %cst_43 = arith.constant dense<0.000000e+00> : vector<16x32xf32>
    %56 = tpu.matmul %53, %55, %cst_43 {dimension_numbers = #tpu.dot_dimension_numbers<[1], [0], [0], [1], [0, 0, 1, 1], [], []>} : vector<16x8xbf16>, vector<8x32xbf16>, vector<16x32xf32> -> vector<16x32xf32>
    %57 = arith.addf %9, %56 : vector<16x32xf32>
    %c0_44 = arith.constant 0 : index
    %c1 = arith.constant 1 : index
    %c0_45 = arith.constant 0 : index
    %c0_46 = arith.constant 0 : index
    %58 = vector.load %arg3[%c0_44, %c1, %c0_45, %c0_46] : memref<2x4x32x8xbf16, #tpu.memory_space<vmem>>, vector<1x1x32x8xbf16>
    %59 = vector.shape_cast %58 : vector<1x1x32x8xbf16> to vector<32x8xbf16>
    %cst_47 = arith.constant dense<0.000000e+00> : vector<16x8xf32>
    %60 = tpu.matmul %8, %59, %cst_47 {dimension_numbers = #tpu.dot_dimension_numbers<[1], [0], [0], [1], [0, 0, 1, 1], [], []>} : vector<16x32xbf16>, vector<32x8xbf16>, vector<16x8xf32> -> vector<16x8xf32>
    %c0_48 = arith.constant 0 : index
    %c1_49 = arith.constant 1 : index
    %c0_50 = arith.constant 0 : index
    %c0_51 = arith.constant 0 : index
    %61 = vector.load %arg6[%c0_48, %c1_49, %c0_50, %c0_51] : memref<2x4x1x8xf32, #tpu.memory_space<vmem>>, vector<1x1x1x8xf32>
    %62 = vector.shape_cast %61 : vector<1x1x1x8xf32> to vector<1x8xf32>
    %63 = vector.broadcast %62 : vector<1x8xf32> to vector<16x8xf32>
    %64 = arith.addf %60, %63 : vector<16x8xf32>
    %65 = vector.shape_cast %64 : vector<16x8xf32> to vector<2x8x8xf32>
    %c0_52 = arith.constant 0 : index
    %c1_53 = arith.constant 1 : index
    %c0_54 = arith.constant 0 : index
    %c0_55 = arith.constant 0 : index
    %66 = vector.load %arg4[%c0_52, %c1_53, %c0_54, %c0_55] : memref<2x4x32x8xbf16, #tpu.memory_space<vmem>>, vector<1x1x32x8xbf16>
    %67 = vector.shape_cast %66 : vector<1x1x32x8xbf16> to vector<32x8xbf16>
    %cst_56 = arith.constant dense<0.000000e+00> : vector<16x8xf32>
    %68 = tpu.matmul %8, %67, %cst_56 {dimension_numbers = #tpu.dot_dimension_numbers<[1], [0], [0], [1], [0, 0, 1, 1], [], []>} : vector<16x32xbf16>, vector<32x8xbf16>, vector<16x8xf32> -> vector<16x8xf32>
    %c0_57 = arith.constant 0 : index
    %c1_58 = arith.constant 1 : index
    %c0_59 = arith.constant 0 : index
    %c0_60 = arith.constant 0 : index
    %69 = vector.load %arg7[%c0_57, %c1_58, %c0_59, %c0_60] : memref<2x4x1x8xf32, #tpu.memory_space<vmem>>, vector<1x1x1x8xf32>
    %70 = vector.shape_cast %69 : vector<1x1x1x8xf32> to vector<1x8xf32>
    %71 = vector.broadcast %70 : vector<1x8xf32> to vector<16x8xf32>
    %72 = arith.addf %68, %71 : vector<16x8xf32>
    %73 = vector.shape_cast %72 : vector<16x8xf32> to vector<2x8x8xf32>
    %c0_61 = arith.constant 0 : index
    %c1_62 = arith.constant 1 : index
    %c0_63 = arith.constant 0 : index
    %c0_64 = arith.constant 0 : index
    %74 = vector.load %arg5[%c0_61, %c1_62, %c0_63, %c0_64] : memref<2x4x32x8xbf16, #tpu.memory_space<vmem>>, vector<1x1x32x8xbf16>
    %75 = vector.shape_cast %74 : vector<1x1x32x8xbf16> to vector<32x8xbf16>
    %cst_65 = arith.constant dense<0.000000e+00> : vector<16x8xf32>
    %76 = tpu.matmul %8, %75, %cst_65 {dimension_numbers = #tpu.dot_dimension_numbers<[1], [0], [0], [1], [0, 0, 1, 1], [], []>} : vector<16x32xbf16>, vector<32x8xbf16>, vector<16x8xf32> -> vector<16x8xf32>
    %c0_66 = arith.constant 0 : index
    %c1_67 = arith.constant 1 : index
    %c0_68 = arith.constant 0 : index
    %c0_69 = arith.constant 0 : index
    %77 = vector.load %arg8[%c0_66, %c1_67, %c0_68, %c0_69] : memref<2x4x1x8xf32, #tpu.memory_space<vmem>>, vector<1x1x1x8xf32>
    %78 = vector.shape_cast %77 : vector<1x1x1x8xf32> to vector<1x8xf32>
    %79 = vector.broadcast %78 : vector<1x8xf32> to vector<16x8xf32>
    %80 = arith.addf %76, %79 : vector<16x8xf32>
    %81 = vector.shape_cast %80 : vector<16x8xf32> to vector<2x8x8xf32>
    %82 = arith.truncf %65 : vector<2x8x8xf32> to vector<2x8x8xbf16>
    %83 = arith.truncf %73 : vector<2x8x8xf32> to vector<2x8x8xbf16>
    "tpu.trace_start"() <{level = 10 : i32, message = "bqd,bkd->bqk"}> : () -> ()
    %cst_70 = arith.constant dense<0.000000e+00> : vector<2x8x8xf32>
    %84 = tpu.matmul %82, %83, %cst_70 {dimension_numbers = #tpu.dot_dimension_numbers<[2], [2], [1], [1], [0, 0, 0, 1, 1, 1], [0], [0]>} : vector<2x8x8xbf16>, vector<2x8x8xbf16>, vector<2x8x8xf32> -> vector<2x8x8xf32>
    "tpu.trace_stop"() : () -> ()
    %cst_71 = arith.constant 0.353553385 : f32
    %85 = vector.broadcast %cst_71 : f32 to vector<2x8x8xf32>
    %86 = arith.mulf %84, %85 : vector<2x8x8xf32>
    %cst_72 = arith.constant dense<0xFF800000> : vector<2x8xf32>
    %87 = vector.multi_reduction <maximumf>, %86, %cst_72 [2] : vector<2x8x8xf32> to vector<2x8xf32>
    %88 = vector.shape_cast %87 : vector<2x8xf32> to vector<2x8x1xf32>
    %89 = vector.broadcast %88 : vector<2x8x1xf32> to vector<2x8x8xf32>
    %90 = arith.subf %86, %89 : vector<2x8x8xf32>
    %91 = math.exp %90 : vector<2x8x8xf32>
    %cst_73 = arith.constant dense<0.000000e+00> : vector<2x8xf32>
    %92 = vector.multi_reduction <add>, %91, %cst_73 [2] : vector<2x8x8xf32> to vector<2x8xf32>
    %93 = vector.shape_cast %92 : vector<2x8xf32> to vector<2x8x1xf32>
    %94 = tpu.reciprocal %93 {approx = true} : vector<2x8x1xf32> -> vector<2x8x1xf32>
    %95 = vector.broadcast %94 : vector<2x8x1xf32> to vector<2x8x8xf32>
    %96 = arith.mulf %91, %95 : vector<2x8x8xf32>
    %97 = arith.truncf %96 : vector<2x8x8xf32> to vector<2x8x8xbf16>
    %98 = arith.truncf %81 : vector<2x8x8xf32> to vector<2x8x8xbf16>
    "tpu.trace_start"() <{level = 10 : i32, message = "bqk,bkd->bqd"}> : () -> ()
    %cst_74 = arith.constant dense<0.000000e+00> : vector<2x8x8xf32>
    %99 = tpu.matmul %97, %98, %cst_74 {dimension_numbers = #tpu.dot_dimension_numbers<[2], [1], [1], [2], [0, 0, 0, 1, 1, 2], [0], [0]>} : vector<2x8x8xbf16>, vector<2x8x8xbf16>, vector<2x8x8xf32> -> vector<2x8x8xf32>
    "tpu.trace_stop"() : () -> ()
    %100 = vector.shape_cast %99 : vector<2x8x8xf32> to vector<16x8xf32>
    %101 = arith.truncf %100 : vector<16x8xf32> to vector<16x8xbf16>
    %c0_75 = arith.constant 0 : index
    %c1_76 = arith.constant 1 : index
    %c0_77 = arith.constant 0 : index
    %c0_78 = arith.constant 0 : index
    %102 = vector.load %arg9[%c0_75, %c1_76, %c0_77, %c0_78] : memref<2x4x8x32xbf16, #tpu.memory_space<vmem>>, vector<1x1x8x32xbf16>
    %103 = vector.shape_cast %102 : vector<1x1x8x32xbf16> to vector<8x32xbf16>
    %cst_79 = arith.constant dense<0.000000e+00> : vector<16x32xf32>
    %104 = tpu.matmul %101, %103, %cst_79 {dimension_numbers = #tpu.dot_dimension_numbers<[1], [0], [0], [1], [0, 0, 1, 1], [], []>} : vector<16x8xbf16>, vector<8x32xbf16>, vector<16x32xf32> -> vector<16x32xf32>
    %105 = arith.addf %57, %104 : vector<16x32xf32>
    %c0_80 = arith.constant 0 : index
    %c2 = arith.constant 2 : index
    %c0_81 = arith.constant 0 : index
    %c0_82 = arith.constant 0 : index
    %106 = vector.load %arg3[%c0_80, %c2, %c0_81, %c0_82] : memref<2x4x32x8xbf16, #tpu.memory_space<vmem>>, vector<1x1x32x8xbf16>
    %107 = vector.shape_cast %106 : vector<1x1x32x8xbf16> to vector<32x8xbf16>
    %cst_83 = arith.constant dense<0.000000e+00> : vector<16x8xf32>
    %108 = tpu.matmul %8, %107, %cst_83 {dimension_numbers = #tpu.dot_dimension_numbers<[1], [0], [0], [1], [0, 0, 1, 1], [], []>} : vector<16x32xbf16>, vector<32x8xbf16>, vector<16x8xf32> -> vector<16x8xf32>
    %c0_84 = arith.constant 0 : index
    %c2_85 = arith.constant 2 : index
    %c0_86 = arith.constant 0 : index
    %c0_87 = arith.constant 0 : index
    %109 = vector.load %arg6[%c0_84, %c2_85, %c0_86, %c0_87] : memref<2x4x1x8xf32, #tpu.memory_space<vmem>>, vector<1x1x1x8xf32>
    %110 = vector.shape_cast %109 : vector<1x1x1x8xf32> to vector<1x8xf32>
    %111 = vector.broadcast %110 : vector<1x8xf32> to vector<16x8xf32>
    %112 = arith.addf %108, %111 : vector<16x8xf32>
    %113 = vector.shape_cast %112 : vector<16x8xf32> to vector<2x8x8xf32>
    %c0_88 = arith.constant 0 : index
    %c2_89 = arith.constant 2 : index
    %c0_90 = arith.constant 0 : index
    %c0_91 = arith.constant 0 : index
    %114 = vector.load %arg4[%c0_88, %c2_89, %c0_90, %c0_91] : memref<2x4x32x8xbf16, #tpu.memory_space<vmem>>, vector<1x1x32x8xbf16>
    %115 = vector.shape_cast %114 : vector<1x1x32x8xbf16> to vector<32x8xbf16>
    %cst_92 = arith.constant dense<0.000000e+00> : vector<16x8xf32>
    %116 = tpu.matmul %8, %115, %cst_92 {dimension_numbers = #tpu.dot_dimension_numbers<[1], [0], [0], [1], [0, 0, 1, 1], [], []>} : vector<16x32xbf16>, vector<32x8xbf16>, vector<16x8xf32> -> vector<16x8xf32>
    %c0_93 = arith.constant 0 : index
    %c2_94 = arith.constant 2 : index
    %c0_95 = arith.constant 0 : index
    %c0_96 = arith.constant 0 : index
    %117 = vector.load %arg7[%c0_93, %c2_94, %c0_95, %c0_96] : memref<2x4x1x8xf32, #tpu.memory_space<vmem>>, vector<1x1x1x8xf32>
    %118 = vector.shape_cast %117 : vector<1x1x1x8xf32> to vector<1x8xf32>
    %119 = vector.broadcast %118 : vector<1x8xf32> to vector<16x8xf32>
    %120 = arith.addf %116, %119 : vector<16x8xf32>
    %121 = vector.shape_cast %120 : vector<16x8xf32> to vector<2x8x8xf32>
    %c0_97 = arith.constant 0 : index
    %c2_98 = arith.constant 2 : index
    %c0_99 = arith.constant 0 : index
    %c0_100 = arith.constant 0 : index
    %122 = vector.load %arg5[%c0_97, %c2_98, %c0_99, %c0_100] : memref<2x4x32x8xbf16, #tpu.memory_space<vmem>>, vector<1x1x32x8xbf16>
    %123 = vector.shape_cast %122 : vector<1x1x32x8xbf16> to vector<32x8xbf16>
    %cst_101 = arith.constant dense<0.000000e+00> : vector<16x8xf32>
    %124 = tpu.matmul %8, %123, %cst_101 {dimension_numbers = #tpu.dot_dimension_numbers<[1], [0], [0], [1], [0, 0, 1, 1], [], []>} : vector<16x32xbf16>, vector<32x8xbf16>, vector<16x8xf32> -> vector<16x8xf32>
    %c0_102 = arith.constant 0 : index
    %c2_103 = arith.constant 2 : index
    %c0_104 = arith.constant 0 : index
    %c0_105 = arith.constant 0 : index
    %125 = vector.load %arg8[%c0_102, %c2_103, %c0_104, %c0_105] : memref<2x4x1x8xf32, #tpu.memory_space<vmem>>, vector<1x1x1x8xf32>
    %126 = vector.shape_cast %125 : vector<1x1x1x8xf32> to vector<1x8xf32>
    %127 = vector.broadcast %126 : vector<1x8xf32> to vector<16x8xf32>
    %128 = arith.addf %124, %127 : vector<16x8xf32>
    %129 = vector.shape_cast %128 : vector<16x8xf32> to vector<2x8x8xf32>
    %130 = arith.truncf %113 : vector<2x8x8xf32> to vector<2x8x8xbf16>
    %131 = arith.truncf %121 : vector<2x8x8xf32> to vector<2x8x8xbf16>
    "tpu.trace_start"() <{level = 10 : i32, message = "bqd,bkd->bqk"}> : () -> ()
    %cst_106 = arith.constant dense<0.000000e+00> : vector<2x8x8xf32>
    %132 = tpu.matmul %130, %131, %cst_106 {dimension_numbers = #tpu.dot_dimension_numbers<[2], [2], [1], [1], [0, 0, 0, 1, 1, 1], [0], [0]>} : vector<2x8x8xbf16>, vector<2x8x8xbf16>, vector<2x8x8xf32> -> vector<2x8x8xf32>
    "tpu.trace_stop"() : () -> ()
    %cst_107 = arith.constant 0.353553385 : f32
    %133 = vector.broadcast %cst_107 : f32 to vector<2x8x8xf32>
    %134 = arith.mulf %132, %133 : vector<2x8x8xf32>
    %cst_108 = arith.constant dense<0xFF800000> : vector<2x8xf32>
    %135 = vector.multi_reduction <maximumf>, %134, %cst_108 [2] : vector<2x8x8xf32> to vector<2x8xf32>
    %136 = vector.shape_cast %135 : vector<2x8xf32> to vector<2x8x1xf32>
    %137 = vector.broadcast %136 : vector<2x8x1xf32> to vector<2x8x8xf32>
    %138 = arith.subf %134, %137 : vector<2x8x8xf32>
    %139 = math.exp %138 : vector<2x8x8xf32>
    %cst_109 = arith.constant dense<0.000000e+00> : vector<2x8xf32>
    %140 = vector.multi_reduction <add>, %139, %cst_109 [2] : vector<2x8x8xf32> to vector<2x8xf32>
    %141 = vector.shape_cast %140 : vector<2x8xf32> to vector<2x8x1xf32>
    %142 = tpu.reciprocal %141 {approx = true} : vector<2x8x1xf32> -> vector<2x8x1xf32>
    %143 = vector.broadcast %142 : vector<2x8x1xf32> to vector<2x8x8xf32>
    %144 = arith.mulf %139, %143 : vector<2x8x8xf32>
    %145 = arith.truncf %144 : vector<2x8x8xf32> to vector<2x8x8xbf16>
    %146 = arith.truncf %129 : vector<2x8x8xf32> to vector<2x8x8xbf16>
    "tpu.trace_start"() <{level = 10 : i32, message = "bqk,bkd->bqd"}> : () -> ()
    %cst_110 = arith.constant dense<0.000000e+00> : vector<2x8x8xf32>
    %147 = tpu.matmul %145, %146, %cst_110 {dimension_numbers = #tpu.dot_dimension_numbers<[2], [1], [1], [2], [0, 0, 0, 1, 1, 2], [0], [0]>} : vector<2x8x8xbf16>, vector<2x8x8xbf16>, vector<2x8x8xf32> -> vector<2x8x8xf32>
    "tpu.trace_stop"() : () -> ()
    %148 = vector.shape_cast %147 : vector<2x8x8xf32> to vector<16x8xf32>
    %149 = arith.truncf %148 : vector<16x8xf32> to vector<16x8xbf16>
    %c0_111 = arith.constant 0 : index
    %c2_112 = arith.constant 2 : index
    %c0_113 = arith.constant 0 : index
    %c0_114 = arith.constant 0 : index
    %150 = vector.load %arg9[%c0_111, %c2_112, %c0_113, %c0_114] : memref<2x4x8x32xbf16, #tpu.memory_space<vmem>>, vector<1x1x8x32xbf16>
    %151 = vector.shape_cast %150 : vector<1x1x8x32xbf16> to vector<8x32xbf16>
    %cst_115 = arith.constant dense<0.000000e+00> : vector<16x32xf32>
    %152 = tpu.matmul %149, %151, %cst_115 {dimension_numbers = #tpu.dot_dimension_numbers<[1], [0], [0], [1], [0, 0, 1, 1], [], []>} : vector<16x8xbf16>, vector<8x32xbf16>, vector<16x32xf32> -> vector<16x32xf32>
    %153 = arith.addf %105, %152 : vector<16x32xf32>
    %c0_116 = arith.constant 0 : index
    %c3 = arith.constant 3 : index
    %c0_117 = arith.constant 0 : index
    %c0_118 = arith.constant 0 : index
    %154 = vector.load %arg3[%c0_116, %c3, %c0_117, %c0_118] : memref<2x4x32x8xbf16, #tpu.memory_space<vmem>>, vector<1x1x32x8xbf16>
    %155 = vector.shape_cast %154 : vector<1x1x32x8xbf16> to vector<32x8xbf16>
    %cst_119 = arith.constant dense<0.000000e+00> : vector<16x8xf32>
    %156 = tpu.matmul %8, %155, %cst_119 {dimension_numbers = #tpu.dot_dimension_numbers<[1], [0], [0], [1], [0, 0, 1, 1], [], []>} : vector<16x32xbf16>, vector<32x8xbf16>, vector<16x8xf32> -> vector<16x8xf32>
    %c0_120 = arith.constant 0 : index
    %c3_121 = arith.constant 3 : index
    %c0_122 = arith.constant 0 : index
    %c0_123 = arith.constant 0 : index
    %157 = vector.load %arg6[%c0_120, %c3_121, %c0_122, %c0_123] : memref<2x4x1x8xf32, #tpu.memory_space<vmem>>, vector<1x1x1x8xf32>
    %158 = vector.shape_cast %157 : vector<1x1x1x8xf32> to vector<1x8xf32>
    %159 = vector.broadcast %158 : vector<1x8xf32> to vector<16x8xf32>
    %160 = arith.addf %156, %159 : vector<16x8xf32>
    %161 = vector.shape_cast %160 : vector<16x8xf32> to vector<2x8x8xf32>
    %c0_124 = arith.constant 0 : index
    %c3_125 = arith.constant 3 : index
    %c0_126 = arith.constant 0 : index
    %c0_127 = arith.constant 0 : index
    %162 = vector.load %arg4[%c0_124, %c3_125, %c0_126, %c0_127] : memref<2x4x32x8xbf16, #tpu.memory_space<vmem>>, vector<1x1x32x8xbf16>
    %163 = vector.shape_cast %162 : vector<1x1x32x8xbf16> to vector<32x8xbf16>
    %cst_128 = arith.constant dense<0.000000e+00> : vector<16x8xf32>
    %164 = tpu.matmul %8, %163, %cst_128 {dimension_numbers = #tpu.dot_dimension_numbers<[1], [0], [0], [1], [0, 0, 1, 1], [], []>} : vector<16x32xbf16>, vector<32x8xbf16>, vector<16x8xf32> -> vector<16x8xf32>
    %c0_129 = arith.constant 0 : index
    %c3_130 = arith.constant 3 : index
    %c0_131 = arith.constant 0 : index
    %c0_132 = arith.constant 0 : index
    %165 = vector.load %arg7[%c0_129, %c3_130, %c0_131, %c0_132] : memref<2x4x1x8xf32, #tpu.memory_space<vmem>>, vector<1x1x1x8xf32>
    %166 = vector.shape_cast %165 : vector<1x1x1x8xf32> to vector<1x8xf32>
    %167 = vector.broadcast %166 : vector<1x8xf32> to vector<16x8xf32>
    %168 = arith.addf %164, %167 : vector<16x8xf32>
    %169 = vector.shape_cast %168 : vector<16x8xf32> to vector<2x8x8xf32>
    %c0_133 = arith.constant 0 : index
    %c3_134 = arith.constant 3 : index
    %c0_135 = arith.constant 0 : index
    %c0_136 = arith.constant 0 : index
    %170 = vector.load %arg5[%c0_133, %c3_134, %c0_135, %c0_136] : memref<2x4x32x8xbf16, #tpu.memory_space<vmem>>, vector<1x1x32x8xbf16>
    %171 = vector.shape_cast %170 : vector<1x1x32x8xbf16> to vector<32x8xbf16>
    %cst_137 = arith.constant dense<0.000000e+00> : vector<16x8xf32>
    %172 = tpu.matmul %8, %171, %cst_137 {dimension_numbers = #tpu.dot_dimension_numbers<[1], [0], [0], [1], [0, 0, 1, 1], [], []>} : vector<16x32xbf16>, vector<32x8xbf16>, vector<16x8xf32> -> vector<16x8xf32>
    %c0_138 = arith.constant 0 : index
    %c3_139 = arith.constant 3 : index
    %c0_140 = arith.constant 0 : index
    %c0_141 = arith.constant 0 : index
    %173 = vector.load %arg8[%c0_138, %c3_139, %c0_140, %c0_141] : memref<2x4x1x8xf32, #tpu.memory_space<vmem>>, vector<1x1x1x8xf32>
    %174 = vector.shape_cast %173 : vector<1x1x1x8xf32> to vector<1x8xf32>
    %175 = vector.broadcast %174 : vector<1x8xf32> to vector<16x8xf32>
    %176 = arith.addf %172, %175 : vector<16x8xf32>
    %177 = vector.shape_cast %176 : vector<16x8xf32> to vector<2x8x8xf32>
    %178 = arith.truncf %161 : vector<2x8x8xf32> to vector<2x8x8xbf16>
    %179 = arith.truncf %169 : vector<2x8x8xf32> to vector<2x8x8xbf16>
    "tpu.trace_start"() <{level = 10 : i32, message = "bqd,bkd->bqk"}> : () -> ()
    %cst_142 = arith.constant dense<0.000000e+00> : vector<2x8x8xf32>
    %180 = tpu.matmul %178, %179, %cst_142 {dimension_numbers = #tpu.dot_dimension_numbers<[2], [2], [1], [1], [0, 0, 0, 1, 1, 1], [0], [0]>} : vector<2x8x8xbf16>, vector<2x8x8xbf16>, vector<2x8x8xf32> -> vector<2x8x8xf32>
    "tpu.trace_stop"() : () -> ()
    %cst_143 = arith.constant 0.353553385 : f32
    %181 = vector.broadcast %cst_143 : f32 to vector<2x8x8xf32>
    %182 = arith.mulf %180, %181 : vector<2x8x8xf32>
    %cst_144 = arith.constant dense<0xFF800000> : vector<2x8xf32>
    %183 = vector.multi_reduction <maximumf>, %182, %cst_144 [2] : vector<2x8x8xf32> to vector<2x8xf32>
    %184 = vector.shape_cast %183 : vector<2x8xf32> to vector<2x8x1xf32>
    %185 = vector.broadcast %184 : vector<2x8x1xf32> to vector<2x8x8xf32>
    %186 = arith.subf %182, %185 : vector<2x8x8xf32>
    %187 = math.exp %186 : vector<2x8x8xf32>
    %cst_145 = arith.constant dense<0.000000e+00> : vector<2x8xf32>
    %188 = vector.multi_reduction <add>, %187, %cst_145 [2] : vector<2x8x8xf32> to vector<2x8xf32>
    %189 = vector.shape_cast %188 : vector<2x8xf32> to vector<2x8x1xf32>
    %190 = tpu.reciprocal %189 {approx = true} : vector<2x8x1xf32> -> vector<2x8x1xf32>
    %191 = vector.broadcast %190 : vector<2x8x1xf32> to vector<2x8x8xf32>
    %192 = arith.mulf %187, %191 : vector<2x8x8xf32>
    %193 = arith.truncf %192 : vector<2x8x8xf32> to vector<2x8x8xbf16>
    %194 = arith.truncf %177 : vector<2x8x8xf32> to vector<2x8x8xbf16>
    "tpu.trace_start"() <{level = 10 : i32, message = "bqk,bkd->bqd"}> : () -> ()
    %cst_146 = arith.constant dense<0.000000e+00> : vector<2x8x8xf32>
    %195 = tpu.matmul %193, %194, %cst_146 {dimension_numbers = #tpu.dot_dimension_numbers<[2], [1], [1], [2], [0, 0, 0, 1, 1, 2], [0], [0]>} : vector<2x8x8xbf16>, vector<2x8x8xbf16>, vector<2x8x8xf32> -> vector<2x8x8xf32>
    "tpu.trace_stop"() : () -> ()
    %196 = vector.shape_cast %195 : vector<2x8x8xf32> to vector<16x8xf32>
    %197 = arith.truncf %196 : vector<16x8xf32> to vector<16x8xbf16>
    %c0_147 = arith.constant 0 : index
    %c3_148 = arith.constant 3 : index
    %c0_149 = arith.constant 0 : index
    %c0_150 = arith.constant 0 : index
    %198 = vector.load %arg9[%c0_147, %c3_148, %c0_149, %c0_150] : memref<2x4x8x32xbf16, #tpu.memory_space<vmem>>, vector<1x1x8x32xbf16>
    %199 = vector.shape_cast %198 : vector<1x1x8x32xbf16> to vector<8x32xbf16>
    %cst_151 = arith.constant dense<0.000000e+00> : vector<16x32xf32>
    %200 = tpu.matmul %197, %199, %cst_151 {dimension_numbers = #tpu.dot_dimension_numbers<[1], [0], [0], [1], [0, 0, 1, 1], [], []>} : vector<16x8xbf16>, vector<8x32xbf16>, vector<16x32xf32> -> vector<16x32xf32>
    %201 = arith.addf %153, %200 : vector<16x32xf32>
    %c0_152 = arith.constant 0 : index
    %c0_153 = arith.constant 0 : index
    %c0_154 = arith.constant 0 : index
    %202 = vector.load %arg10[%c0_152, %c0_153, %c0_154] : memref<2x1x32xf32, #tpu.memory_space<vmem>>, vector<1x1x32xf32>
    %203 = vector.shape_cast %202 : vector<1x1x32xf32> to vector<1x32xf32>
    %204 = vector.broadcast %203 : vector<1x32xf32> to vector<16x32xf32>
    %205 = arith.addf %201, %204 : vector<16x32xf32>
    %206 = arith.addf %7, %205 : vector<16x32xf32>
    %cst_155 = arith.constant dense<0.000000e+00> : vector<16xf32>
    %207 = vector.multi_reduction <add>, %206, %cst_155 [1] : vector<16x32xf32> to vector<16xf32>
    %208 = vector.shape_cast %207 : vector<16xf32> to vector<16x1xf32>
    %cst_156 = arith.constant 3.200000e+01 : f32
    %209 = vector.broadcast %cst_156 : f32 to vector<16x1xf32>
    %210 = arith.divf %208, %209 : vector<16x1xf32>
    %211 = vector.broadcast %210 : vector<16x1xf32> to vector<16x32xf32>
    %212 = arith.subf %206, %211 : vector<16x32xf32>
    %213 = arith.mulf %212, %212 : vector<16x32xf32>
    %cst_157 = arith.constant dense<0.000000e+00> : vector<16xf32>
    %214 = vector.multi_reduction <add>, %213, %cst_157 [1] : vector<16x32xf32> to vector<16xf32>
    %215 = vector.shape_cast %214 : vector<16xf32> to vector<16x1xf32>
    %cst_158 = arith.constant 3.200000e+01 : f32
    %216 = vector.broadcast %cst_158 : f32 to vector<16x1xf32>
    %217 = arith.divf %215, %216 : vector<16x1xf32>
    %218 = vector.broadcast %210 : vector<16x1xf32> to vector<16x32xf32>
    %219 = arith.subf %206, %218 : vector<16x32xf32>
    %cst_159 = arith.constant 9.99999974E-6 : f32
    %220 = vector.broadcast %cst_159 : f32 to vector<16x1xf32>
    %221 = arith.addf %217, %220 : vector<16x1xf32>
    %222 = math.rsqrt %221 : vector<16x1xf32>
    %223 = vector.broadcast %222 : vector<16x1xf32> to vector<16x32xf32>
    %224 = arith.mulf %219, %223 : vector<16x32xf32>
    %c0_160 = arith.constant 0 : index
    %c0_161 = arith.constant 0 : index
    %c0_162 = arith.constant 0 : index
    %225 = vector.load %arg11[%c0_160, %c0_161, %c0_162] : memref<2x1x32xf32, #tpu.memory_space<vmem>>, vector<1x1x32xf32>
    %226 = vector.shape_cast %225 : vector<1x1x32xf32> to vector<1x32xf32>
    %227 = vector.broadcast %226 : vector<1x32xf32> to vector<16x32xf32>
    %228 = arith.mulf %224, %227 : vector<16x32xf32>
    %c0_163 = arith.constant 0 : index
    %c0_164 = arith.constant 0 : index
    %c0_165 = arith.constant 0 : index
    %229 = vector.load %arg12[%c0_163, %c0_164, %c0_165] : memref<2x1x32xf32, #tpu.memory_space<vmem>>, vector<1x1x32xf32>
    %230 = vector.shape_cast %229 : vector<1x1x32xf32> to vector<1x32xf32>
    %231 = vector.broadcast %230 : vector<1x32xf32> to vector<16x32xf32>
    %232 = arith.addf %228, %231 : vector<16x32xf32>
    %233 = arith.truncf %232 : vector<16x32xf32> to vector<16x32xbf16>
    %c0_166 = arith.constant 0 : index
    %c0_167 = arith.constant 0 : index
    %c0_168 = arith.constant 0 : index
    %234 = vector.load %arg13[%c0_166, %c0_167, %c0_168] : memref<2x32x64xbf16, #tpu.memory_space<vmem>>, vector<1x32x64xbf16>
    %235 = vector.shape_cast %234 : vector<1x32x64xbf16> to vector<32x64xbf16>
    %cst_169 = arith.constant dense<0.000000e+00> : vector<16x64xf32>
    %236 = tpu.matmul %233, %235, %cst_169 {dimension_numbers = #tpu.dot_dimension_numbers<[1], [0], [0], [1], [0, 0, 1, 1], [], []>} : vector<16x32xbf16>, vector<32x64xbf16>, vector<16x64xf32> -> vector<16x64xf32>
    %c0_170 = arith.constant 0 : index
    %c0_171 = arith.constant 0 : index
    %c0_172 = arith.constant 0 : index
    %237 = vector.load %arg14[%c0_170, %c0_171, %c0_172] : memref<2x1x64xf32, #tpu.memory_space<vmem>>, vector<1x1x64xf32>
    %238 = vector.shape_cast %237 : vector<1x1x64xf32> to vector<1x64xf32>
    %239 = vector.broadcast %238 : vector<1x64xf32> to vector<16x64xf32>
    %240 = arith.addf %236, %239 : vector<16x64xf32>
    %cst_173 = arith.constant 0.000000e+00 : f32
    %241 = vector.broadcast %cst_173 : f32 to vector<16x64xf32>
    %242 = arith.maximumf %240, %241 : vector<16x64xf32>
    %243 = arith.truncf %242 : vector<16x64xf32> to vector<16x64xbf16>
    %c0_174 = arith.constant 0 : index
    %c0_175 = arith.constant 0 : index
    %c0_176 = arith.constant 0 : index
    %244 = vector.load %arg15[%c0_174, %c0_175, %c0_176] : memref<2x64x32xbf16, #tpu.memory_space<vmem>>, vector<1x64x32xbf16>
    %245 = vector.shape_cast %244 : vector<1x64x32xbf16> to vector<64x32xbf16>
    %cst_177 = arith.constant dense<0.000000e+00> : vector<16x32xf32>
    %246 = tpu.matmul %243, %245, %cst_177 {dimension_numbers = #tpu.dot_dimension_numbers<[1], [0], [0], [1], [0, 0, 1, 1], [], []>} : vector<16x64xbf16>, vector<64x32xbf16>, vector<16x32xf32> -> vector<16x32xf32>
    %c0_178 = arith.constant 0 : index
    %c0_179 = arith.constant 0 : index
    %c0_180 = arith.constant 0 : index
    %247 = vector.load %arg16[%c0_178, %c0_179, %c0_180] : memref<2x1x32xf32, #tpu.memory_space<vmem>>, vector<1x1x32xf32>
    %248 = vector.shape_cast %247 : vector<1x1x32xf32> to vector<1x32xf32>
    %249 = vector.broadcast %248 : vector<1x32xf32> to vector<16x32xf32>
    %250 = arith.addf %246, %249 : vector<16x32xf32>
    %251 = arith.addf %232, %250 : vector<16x32xf32>
    %cst_181 = arith.constant dense<0.000000e+00> : vector<16xf32>
    %252 = vector.multi_reduction <add>, %251, %cst_181 [1] : vector<16x32xf32> to vector<16xf32>
    %253 = vector.shape_cast %252 : vector<16xf32> to vector<16x1xf32>
    %cst_182 = arith.constant 3.200000e+01 : f32
    %254 = vector.broadcast %cst_182 : f32 to vector<16x1xf32>
    %255 = arith.divf %253, %254 : vector<16x1xf32>
    %256 = vector.broadcast %255 : vector<16x1xf32> to vector<16x32xf32>
    %257 = arith.subf %251, %256 : vector<16x32xf32>
    %258 = arith.mulf %257, %257 : vector<16x32xf32>
    %cst_183 = arith.constant dense<0.000000e+00> : vector<16xf32>
    %259 = vector.multi_reduction <add>, %258, %cst_183 [1] : vector<16x32xf32> to vector<16xf32>
    %260 = vector.shape_cast %259 : vector<16xf32> to vector<16x1xf32>
    %cst_184 = arith.constant 3.200000e+01 : f32
    %261 = vector.broadcast %cst_184 : f32 to vector<16x1xf32>
    %262 = arith.divf %260, %261 : vector<16x1xf32>
    %263 = vector.broadcast %255 : vector<16x1xf32> to vector<16x32xf32>
    %264 = arith.subf %251, %263 : vector<16x32xf32>
    %cst_185 = arith.constant 9.99999974E-6 : f32
    %265 = vector.broadcast %cst_185 : f32 to vector<16x1xf32>
    %266 = arith.addf %262, %265 : vector<16x1xf32>
    %267 = math.rsqrt %266 : vector<16x1xf32>
    %268 = vector.broadcast %267 : vector<16x1xf32> to vector<16x32xf32>
    %269 = arith.mulf %264, %268 : vector<16x32xf32>
    %c0_186 = arith.constant 0 : index
    %c0_187 = arith.constant 0 : index
    %c0_188 = arith.constant 0 : index
    %270 = vector.load %arg17[%c0_186, %c0_187, %c0_188] : memref<2x1x32xf32, #tpu.memory_space<vmem>>, vector<1x1x32xf32>
    %271 = vector.shape_cast %270 : vector<1x1x32xf32> to vector<1x32xf32>
    %272 = vector.broadcast %271 : vector<1x32xf32> to vector<16x32xf32>
    %273 = arith.mulf %269, %272 : vector<16x32xf32>
    %c0_189 = arith.constant 0 : index
    %c0_190 = arith.constant 0 : index
    %c0_191 = arith.constant 0 : index
    %274 = vector.load %arg18[%c0_189, %c0_190, %c0_191] : memref<2x1x32xf32, #tpu.memory_space<vmem>>, vector<1x1x32xf32>
    %275 = vector.shape_cast %274 : vector<1x1x32xf32> to vector<1x32xf32>
    %276 = vector.broadcast %275 : vector<1x32xf32> to vector<16x32xf32>
    %277 = arith.addf %273, %276 : vector<16x32xf32>
    %278 = arith.truncf %277 : vector<16x32xf32> to vector<16x32xbf16>
    %cst_192 = arith.constant 0.000000e+00 : f32
    %279 = vector.broadcast %cst_192 : f32 to vector<16x32xf32>
    %c1_193 = arith.constant 1 : index
    %c0_194 = arith.constant 0 : index
    %c0_195 = arith.constant 0 : index
    %c0_196 = arith.constant 0 : index
    %280 = vector.load %arg3[%c1_193, %c0_194, %c0_195, %c0_196] : memref<2x4x32x8xbf16, #tpu.memory_space<vmem>>, vector<1x1x32x8xbf16>
    %281 = vector.shape_cast %280 : vector<1x1x32x8xbf16> to vector<32x8xbf16>
    %cst_197 = arith.constant dense<0.000000e+00> : vector<16x8xf32>
    %282 = tpu.matmul %278, %281, %cst_197 {dimension_numbers = #tpu.dot_dimension_numbers<[1], [0], [0], [1], [0, 0, 1, 1], [], []>} : vector<16x32xbf16>, vector<32x8xbf16>, vector<16x8xf32> -> vector<16x8xf32>
    %c1_198 = arith.constant 1 : index
    %c0_199 = arith.constant 0 : index
    %c0_200 = arith.constant 0 : index
    %c0_201 = arith.constant 0 : index
    %283 = vector.load %arg6[%c1_198, %c0_199, %c0_200, %c0_201] : memref<2x4x1x8xf32, #tpu.memory_space<vmem>>, vector<1x1x1x8xf32>
    %284 = vector.shape_cast %283 : vector<1x1x1x8xf32> to vector<1x8xf32>
    %285 = vector.broadcast %284 : vector<1x8xf32> to vector<16x8xf32>
    %286 = arith.addf %282, %285 : vector<16x8xf32>
    %287 = vector.shape_cast %286 : vector<16x8xf32> to vector<2x8x8xf32>
    %c1_202 = arith.constant 1 : index
    %c0_203 = arith.constant 0 : index
    %c0_204 = arith.constant 0 : index
    %c0_205 = arith.constant 0 : index
    %288 = vector.load %arg4[%c1_202, %c0_203, %c0_204, %c0_205] : memref<2x4x32x8xbf16, #tpu.memory_space<vmem>>, vector<1x1x32x8xbf16>
    %289 = vector.shape_cast %288 : vector<1x1x32x8xbf16> to vector<32x8xbf16>
    %cst_206 = arith.constant dense<0.000000e+00> : vector<16x8xf32>
    %290 = tpu.matmul %278, %289, %cst_206 {dimension_numbers = #tpu.dot_dimension_numbers<[1], [0], [0], [1], [0, 0, 1, 1], [], []>} : vector<16x32xbf16>, vector<32x8xbf16>, vector<16x8xf32> -> vector<16x8xf32>
    %c1_207 = arith.constant 1 : index
    %c0_208 = arith.constant 0 : index
    %c0_209 = arith.constant 0 : index
    %c0_210 = arith.constant 0 : index
    %291 = vector.load %arg7[%c1_207, %c0_208, %c0_209, %c0_210] : memref<2x4x1x8xf32, #tpu.memory_space<vmem>>, vector<1x1x1x8xf32>
    %292 = vector.shape_cast %291 : vector<1x1x1x8xf32> to vector<1x8xf32>
    %293 = vector.broadcast %292 : vector<1x8xf32> to vector<16x8xf32>
    %294 = arith.addf %290, %293 : vector<16x8xf32>
    %295 = vector.shape_cast %294 : vector<16x8xf32> to vector<2x8x8xf32>
    %c1_211 = arith.constant 1 : index
    %c0_212 = arith.constant 0 : index
    %c0_213 = arith.constant 0 : index
    %c0_214 = arith.constant 0 : index
    %296 = vector.load %arg5[%c1_211, %c0_212, %c0_213, %c0_214] : memref<2x4x32x8xbf16, #tpu.memory_space<vmem>>, vector<1x1x32x8xbf16>
    %297 = vector.shape_cast %296 : vector<1x1x32x8xbf16> to vector<32x8xbf16>
    %cst_215 = arith.constant dense<0.000000e+00> : vector<16x8xf32>
    %298 = tpu.matmul %278, %297, %cst_215 {dimension_numbers = #tpu.dot_dimension_numbers<[1], [0], [0], [1], [0, 0, 1, 1], [], []>} : vector<16x32xbf16>, vector<32x8xbf16>, vector<16x8xf32> -> vector<16x8xf32>
    %c1_216 = arith.constant 1 : index
    %c0_217 = arith.constant 0 : index
    %c0_218 = arith.constant 0 : index
    %c0_219 = arith.constant 0 : index
    %299 = vector.load %arg8[%c1_216, %c0_217, %c0_218, %c0_219] : memref<2x4x1x8xf32, #tpu.memory_space<vmem>>, vector<1x1x1x8xf32>
    %300 = vector.shape_cast %299 : vector<1x1x1x8xf32> to vector<1x8xf32>
    %301 = vector.broadcast %300 : vector<1x8xf32> to vector<16x8xf32>
    %302 = arith.addf %298, %301 : vector<16x8xf32>
    %303 = vector.shape_cast %302 : vector<16x8xf32> to vector<2x8x8xf32>
    %304 = arith.truncf %287 : vector<2x8x8xf32> to vector<2x8x8xbf16>
    %305 = arith.truncf %295 : vector<2x8x8xf32> to vector<2x8x8xbf16>
    "tpu.trace_start"() <{level = 10 : i32, message = "bqd,bkd->bqk"}> : () -> ()
    %cst_220 = arith.constant dense<0.000000e+00> : vector<2x8x8xf32>
    %306 = tpu.matmul %304, %305, %cst_220 {dimension_numbers = #tpu.dot_dimension_numbers<[2], [2], [1], [1], [0, 0, 0, 1, 1, 1], [0], [0]>} : vector<2x8x8xbf16>, vector<2x8x8xbf16>, vector<2x8x8xf32> -> vector<2x8x8xf32>
    "tpu.trace_stop"() : () -> ()
    %cst_221 = arith.constant 0.353553385 : f32
    %307 = vector.broadcast %cst_221 : f32 to vector<2x8x8xf32>
    %308 = arith.mulf %306, %307 : vector<2x8x8xf32>
    %cst_222 = arith.constant dense<0xFF800000> : vector<2x8xf32>
    %309 = vector.multi_reduction <maximumf>, %308, %cst_222 [2] : vector<2x8x8xf32> to vector<2x8xf32>
    %310 = vector.shape_cast %309 : vector<2x8xf32> to vector<2x8x1xf32>
    %311 = vector.broadcast %310 : vector<2x8x1xf32> to vector<2x8x8xf32>
    %312 = arith.subf %308, %311 : vector<2x8x8xf32>
    %313 = math.exp %312 : vector<2x8x8xf32>
    %cst_223 = arith.constant dense<0.000000e+00> : vector<2x8xf32>
    %314 = vector.multi_reduction <add>, %313, %cst_223 [2] : vector<2x8x8xf32> to vector<2x8xf32>
    %315 = vector.shape_cast %314 : vector<2x8xf32> to vector<2x8x1xf32>
    %316 = tpu.reciprocal %315 {approx = true} : vector<2x8x1xf32> -> vector<2x8x1xf32>
    %317 = vector.broadcast %316 : vector<2x8x1xf32> to vector<2x8x8xf32>
    %318 = arith.mulf %313, %317 : vector<2x8x8xf32>
    %319 = arith.truncf %318 : vector<2x8x8xf32> to vector<2x8x8xbf16>
    %320 = arith.truncf %303 : vector<2x8x8xf32> to vector<2x8x8xbf16>
    "tpu.trace_start"() <{level = 10 : i32, message = "bqk,bkd->bqd"}> : () -> ()
    %cst_224 = arith.constant dense<0.000000e+00> : vector<2x8x8xf32>
    %321 = tpu.matmul %319, %320, %cst_224 {dimension_numbers = #tpu.dot_dimension_numbers<[2], [1], [1], [2], [0, 0, 0, 1, 1, 2], [0], [0]>} : vector<2x8x8xbf16>, vector<2x8x8xbf16>, vector<2x8x8xf32> -> vector<2x8x8xf32>
    "tpu.trace_stop"() : () -> ()
    %322 = vector.shape_cast %321 : vector<2x8x8xf32> to vector<16x8xf32>
    %323 = arith.truncf %322 : vector<16x8xf32> to vector<16x8xbf16>
    %c1_225 = arith.constant 1 : index
    %c0_226 = arith.constant 0 : index
    %c0_227 = arith.constant 0 : index
    %c0_228 = arith.constant 0 : index
    %324 = vector.load %arg9[%c1_225, %c0_226, %c0_227, %c0_228] : memref<2x4x8x32xbf16, #tpu.memory_space<vmem>>, vector<1x1x8x32xbf16>
    %325 = vector.shape_cast %324 : vector<1x1x8x32xbf16> to vector<8x32xbf16>
    %cst_229 = arith.constant dense<0.000000e+00> : vector<16x32xf32>
    %326 = tpu.matmul %323, %325, %cst_229 {dimension_numbers = #tpu.dot_dimension_numbers<[1], [0], [0], [1], [0, 0, 1, 1], [], []>} : vector<16x8xbf16>, vector<8x32xbf16>, vector<16x32xf32> -> vector<16x32xf32>
    %327 = arith.addf %279, %326 : vector<16x32xf32>
    %c1_230 = arith.constant 1 : index
    %c1_231 = arith.constant 1 : index
    %c0_232 = arith.constant 0 : index
    %c0_233 = arith.constant 0 : index
    %328 = vector.load %arg3[%c1_230, %c1_231, %c0_232, %c0_233] : memref<2x4x32x8xbf16, #tpu.memory_space<vmem>>, vector<1x1x32x8xbf16>
    %329 = vector.shape_cast %328 : vector<1x1x32x8xbf16> to vector<32x8xbf16>
    %cst_234 = arith.constant dense<0.000000e+00> : vector<16x8xf32>
    %330 = tpu.matmul %278, %329, %cst_234 {dimension_numbers = #tpu.dot_dimension_numbers<[1], [0], [0], [1], [0, 0, 1, 1], [], []>} : vector<16x32xbf16>, vector<32x8xbf16>, vector<16x8xf32> -> vector<16x8xf32>
    %c1_235 = arith.constant 1 : index
    %c1_236 = arith.constant 1 : index
    %c0_237 = arith.constant 0 : index
    %c0_238 = arith.constant 0 : index
    %331 = vector.load %arg6[%c1_235, %c1_236, %c0_237, %c0_238] : memref<2x4x1x8xf32, #tpu.memory_space<vmem>>, vector<1x1x1x8xf32>
    %332 = vector.shape_cast %331 : vector<1x1x1x8xf32> to vector<1x8xf32>
    %333 = vector.broadcast %332 : vector<1x8xf32> to vector<16x8xf32>
    %334 = arith.addf %330, %333 : vector<16x8xf32>
    %335 = vector.shape_cast %334 : vector<16x8xf32> to vector<2x8x8xf32>
    %c1_239 = arith.constant 1 : index
    %c1_240 = arith.constant 1 : index
    %c0_241 = arith.constant 0 : index
    %c0_242 = arith.constant 0 : index
    %336 = vector.load %arg4[%c1_239, %c1_240, %c0_241, %c0_242] : memref<2x4x32x8xbf16, #tpu.memory_space<vmem>>, vector<1x1x32x8xbf16>
    %337 = vector.shape_cast %336 : vector<1x1x32x8xbf16> to vector<32x8xbf16>
    %cst_243 = arith.constant dense<0.000000e+00> : vector<16x8xf32>
    %338 = tpu.matmul %278, %337, %cst_243 {dimension_numbers = #tpu.dot_dimension_numbers<[1], [0], [0], [1], [0, 0, 1, 1], [], []>} : vector<16x32xbf16>, vector<32x8xbf16>, vector<16x8xf32> -> vector<16x8xf32>
    %c1_244 = arith.constant 1 : index
    %c1_245 = arith.constant 1 : index
    %c0_246 = arith.constant 0 : index
    %c0_247 = arith.constant 0 : index
    %339 = vector.load %arg7[%c1_244, %c1_245, %c0_246, %c0_247] : memref<2x4x1x8xf32, #tpu.memory_space<vmem>>, vector<1x1x1x8xf32>
    %340 = vector.shape_cast %339 : vector<1x1x1x8xf32> to vector<1x8xf32>
    %341 = vector.broadcast %340 : vector<1x8xf32> to vector<16x8xf32>
    %342 = arith.addf %338, %341 : vector<16x8xf32>
    %343 = vector.shape_cast %342 : vector<16x8xf32> to vector<2x8x8xf32>
    %c1_248 = arith.constant 1 : index
    %c1_249 = arith.constant 1 : index
    %c0_250 = arith.constant 0 : index
    %c0_251 = arith.constant 0 : index
    %344 = vector.load %arg5[%c1_248, %c1_249, %c0_250, %c0_251] : memref<2x4x32x8xbf16, #tpu.memory_space<vmem>>, vector<1x1x32x8xbf16>
    %345 = vector.shape_cast %344 : vector<1x1x32x8xbf16> to vector<32x8xbf16>
    %cst_252 = arith.constant dense<0.000000e+00> : vector<16x8xf32>
    %346 = tpu.matmul %278, %345, %cst_252 {dimension_numbers = #tpu.dot_dimension_numbers<[1], [0], [0], [1], [0, 0, 1, 1], [], []>} : vector<16x32xbf16>, vector<32x8xbf16>, vector<16x8xf32> -> vector<16x8xf32>
    %c1_253 = arith.constant 1 : index
    %c1_254 = arith.constant 1 : index
    %c0_255 = arith.constant 0 : index
    %c0_256 = arith.constant 0 : index
    %347 = vector.load %arg8[%c1_253, %c1_254, %c0_255, %c0_256] : memref<2x4x1x8xf32, #tpu.memory_space<vmem>>, vector<1x1x1x8xf32>
    %348 = vector.shape_cast %347 : vector<1x1x1x8xf32> to vector<1x8xf32>
    %349 = vector.broadcast %348 : vector<1x8xf32> to vector<16x8xf32>
    %350 = arith.addf %346, %349 : vector<16x8xf32>
    %351 = vector.shape_cast %350 : vector<16x8xf32> to vector<2x8x8xf32>
    %352 = arith.truncf %335 : vector<2x8x8xf32> to vector<2x8x8xbf16>
    %353 = arith.truncf %343 : vector<2x8x8xf32> to vector<2x8x8xbf16>
    "tpu.trace_start"() <{level = 10 : i32, message = "bqd,bkd->bqk"}> : () -> ()
    %cst_257 = arith.constant dense<0.000000e+00> : vector<2x8x8xf32>
    %354 = tpu.matmul %352, %353, %cst_257 {dimension_numbers = #tpu.dot_dimension_numbers<[2], [2], [1], [1], [0, 0, 0, 1, 1, 1], [0], [0]>} : vector<2x8x8xbf16>, vector<2x8x8xbf16>, vector<2x8x8xf32> -> vector<2x8x8xf32>
    "tpu.trace_stop"() : () -> ()
    %cst_258 = arith.constant 0.353553385 : f32
    %355 = vector.broadcast %cst_258 : f32 to vector<2x8x8xf32>
    %356 = arith.mulf %354, %355 : vector<2x8x8xf32>
    %cst_259 = arith.constant dense<0xFF800000> : vector<2x8xf32>
    %357 = vector.multi_reduction <maximumf>, %356, %cst_259 [2] : vector<2x8x8xf32> to vector<2x8xf32>
    %358 = vector.shape_cast %357 : vector<2x8xf32> to vector<2x8x1xf32>
    %359 = vector.broadcast %358 : vector<2x8x1xf32> to vector<2x8x8xf32>
    %360 = arith.subf %356, %359 : vector<2x8x8xf32>
    %361 = math.exp %360 : vector<2x8x8xf32>
    %cst_260 = arith.constant dense<0.000000e+00> : vector<2x8xf32>
    %362 = vector.multi_reduction <add>, %361, %cst_260 [2] : vector<2x8x8xf32> to vector<2x8xf32>
    %363 = vector.shape_cast %362 : vector<2x8xf32> to vector<2x8x1xf32>
    %364 = tpu.reciprocal %363 {approx = true} : vector<2x8x1xf32> -> vector<2x8x1xf32>
    %365 = vector.broadcast %364 : vector<2x8x1xf32> to vector<2x8x8xf32>
    %366 = arith.mulf %361, %365 : vector<2x8x8xf32>
    %367 = arith.truncf %366 : vector<2x8x8xf32> to vector<2x8x8xbf16>
    %368 = arith.truncf %351 : vector<2x8x8xf32> to vector<2x8x8xbf16>
    "tpu.trace_start"() <{level = 10 : i32, message = "bqk,bkd->bqd"}> : () -> ()
    %cst_261 = arith.constant dense<0.000000e+00> : vector<2x8x8xf32>
    %369 = tpu.matmul %367, %368, %cst_261 {dimension_numbers = #tpu.dot_dimension_numbers<[2], [1], [1], [2], [0, 0, 0, 1, 1, 2], [0], [0]>} : vector<2x8x8xbf16>, vector<2x8x8xbf16>, vector<2x8x8xf32> -> vector<2x8x8xf32>
    "tpu.trace_stop"() : () -> ()
    %370 = vector.shape_cast %369 : vector<2x8x8xf32> to vector<16x8xf32>
    %371 = arith.truncf %370 : vector<16x8xf32> to vector<16x8xbf16>
    %c1_262 = arith.constant 1 : index
    %c1_263 = arith.constant 1 : index
    %c0_264 = arith.constant 0 : index
    %c0_265 = arith.constant 0 : index
    %372 = vector.load %arg9[%c1_262, %c1_263, %c0_264, %c0_265] : memref<2x4x8x32xbf16, #tpu.memory_space<vmem>>, vector<1x1x8x32xbf16>
    %373 = vector.shape_cast %372 : vector<1x1x8x32xbf16> to vector<8x32xbf16>
    %cst_266 = arith.constant dense<0.000000e+00> : vector<16x32xf32>
    %374 = tpu.matmul %371, %373, %cst_266 {dimension_numbers = #tpu.dot_dimension_numbers<[1], [0], [0], [1], [0, 0, 1, 1], [], []>} : vector<16x8xbf16>, vector<8x32xbf16>, vector<16x32xf32> -> vector<16x32xf32>
    %375 = arith.addf %327, %374 : vector<16x32xf32>
    %c1_267 = arith.constant 1 : index
    %c2_268 = arith.constant 2 : index
    %c0_269 = arith.constant 0 : index
    %c0_270 = arith.constant 0 : index
    %376 = vector.load %arg3[%c1_267, %c2_268, %c0_269, %c0_270] : memref<2x4x32x8xbf16, #tpu.memory_space<vmem>>, vector<1x1x32x8xbf16>
    %377 = vector.shape_cast %376 : vector<1x1x32x8xbf16> to vector<32x8xbf16>
    %cst_271 = arith.constant dense<0.000000e+00> : vector<16x8xf32>
    %378 = tpu.matmul %278, %377, %cst_271 {dimension_numbers = #tpu.dot_dimension_numbers<[1], [0], [0], [1], [0, 0, 1, 1], [], []>} : vector<16x32xbf16>, vector<32x8xbf16>, vector<16x8xf32> -> vector<16x8xf32>
    %c1_272 = arith.constant 1 : index
    %c2_273 = arith.constant 2 : index
    %c0_274 = arith.constant 0 : index
    %c0_275 = arith.constant 0 : index
    %379 = vector.load %arg6[%c1_272, %c2_273, %c0_274, %c0_275] : memref<2x4x1x8xf32, #tpu.memory_space<vmem>>, vector<1x1x1x8xf32>
    %380 = vector.shape_cast %379 : vector<1x1x1x8xf32> to vector<1x8xf32>
    %381 = vector.broadcast %380 : vector<1x8xf32> to vector<16x8xf32>
    %382 = arith.addf %378, %381 : vector<16x8xf32>
    %383 = vector.shape_cast %382 : vector<16x8xf32> to vector<2x8x8xf32>
    %c1_276 = arith.constant 1 : index
    %c2_277 = arith.constant 2 : index
    %c0_278 = arith.constant 0 : index
    %c0_279 = arith.constant 0 : index
    %384 = vector.load %arg4[%c1_276, %c2_277, %c0_278, %c0_279] : memref<2x4x32x8xbf16, #tpu.memory_space<vmem>>, vector<1x1x32x8xbf16>
    %385 = vector.shape_cast %384 : vector<1x1x32x8xbf16> to vector<32x8xbf16>
    %cst_280 = arith.constant dense<0.000000e+00> : vector<16x8xf32>
    %386 = tpu.matmul %278, %385, %cst_280 {dimension_numbers = #tpu.dot_dimension_numbers<[1], [0], [0], [1], [0, 0, 1, 1], [], []>} : vector<16x32xbf16>, vector<32x8xbf16>, vector<16x8xf32> -> vector<16x8xf32>
    %c1_281 = arith.constant 1 : index
    %c2_282 = arith.constant 2 : index
    %c0_283 = arith.constant 0 : index
    %c0_284 = arith.constant 0 : index
    %387 = vector.load %arg7[%c1_281, %c2_282, %c0_283, %c0_284] : memref<2x4x1x8xf32, #tpu.memory_space<vmem>>, vector<1x1x1x8xf32>
    %388 = vector.shape_cast %387 : vector<1x1x1x8xf32> to vector<1x8xf32>
    %389 = vector.broadcast %388 : vector<1x8xf32> to vector<16x8xf32>
    %390 = arith.addf %386, %389 : vector<16x8xf32>
    %391 = vector.shape_cast %390 : vector<16x8xf32> to vector<2x8x8xf32>
    %c1_285 = arith.constant 1 : index
    %c2_286 = arith.constant 2 : index
    %c0_287 = arith.constant 0 : index
    %c0_288 = arith.constant 0 : index
    %392 = vector.load %arg5[%c1_285, %c2_286, %c0_287, %c0_288] : memref<2x4x32x8xbf16, #tpu.memory_space<vmem>>, vector<1x1x32x8xbf16>
    %393 = vector.shape_cast %392 : vector<1x1x32x8xbf16> to vector<32x8xbf16>
    %cst_289 = arith.constant dense<0.000000e+00> : vector<16x8xf32>
    %394 = tpu.matmul %278, %393, %cst_289 {dimension_numbers = #tpu.dot_dimension_numbers<[1], [0], [0], [1], [0, 0, 1, 1], [], []>} : vector<16x32xbf16>, vector<32x8xbf16>, vector<16x8xf32> -> vector<16x8xf32>
    %c1_290 = arith.constant 1 : index
    %c2_291 = arith.constant 2 : index
    %c0_292 = arith.constant 0 : index
    %c0_293 = arith.constant 0 : index
    %395 = vector.load %arg8[%c1_290, %c2_291, %c0_292, %c0_293] : memref<2x4x1x8xf32, #tpu.memory_space<vmem>>, vector<1x1x1x8xf32>
    %396 = vector.shape_cast %395 : vector<1x1x1x8xf32> to vector<1x8xf32>
    %397 = vector.broadcast %396 : vector<1x8xf32> to vector<16x8xf32>
    %398 = arith.addf %394, %397 : vector<16x8xf32>
    %399 = vector.shape_cast %398 : vector<16x8xf32> to vector<2x8x8xf32>
    %400 = arith.truncf %383 : vector<2x8x8xf32> to vector<2x8x8xbf16>
    %401 = arith.truncf %391 : vector<2x8x8xf32> to vector<2x8x8xbf16>
    "tpu.trace_start"() <{level = 10 : i32, message = "bqd,bkd->bqk"}> : () -> ()
    %cst_294 = arith.constant dense<0.000000e+00> : vector<2x8x8xf32>
    %402 = tpu.matmul %400, %401, %cst_294 {dimension_numbers = #tpu.dot_dimension_numbers<[2], [2], [1], [1], [0, 0, 0, 1, 1, 1], [0], [0]>} : vector<2x8x8xbf16>, vector<2x8x8xbf16>, vector<2x8x8xf32> -> vector<2x8x8xf32>
    "tpu.trace_stop"() : () -> ()
    %cst_295 = arith.constant 0.353553385 : f32
    %403 = vector.broadcast %cst_295 : f32 to vector<2x8x8xf32>
    %404 = arith.mulf %402, %403 : vector<2x8x8xf32>
    %cst_296 = arith.constant dense<0xFF800000> : vector<2x8xf32>
    %405 = vector.multi_reduction <maximumf>, %404, %cst_296 [2] : vector<2x8x8xf32> to vector<2x8xf32>
    %406 = vector.shape_cast %405 : vector<2x8xf32> to vector<2x8x1xf32>
    %407 = vector.broadcast %406 : vector<2x8x1xf32> to vector<2x8x8xf32>
    %408 = arith.subf %404, %407 : vector<2x8x8xf32>
    %409 = math.exp %408 : vector<2x8x8xf32>
    %cst_297 = arith.constant dense<0.000000e+00> : vector<2x8xf32>
    %410 = vector.multi_reduction <add>, %409, %cst_297 [2] : vector<2x8x8xf32> to vector<2x8xf32>
    %411 = vector.shape_cast %410 : vector<2x8xf32> to vector<2x8x1xf32>
    %412 = tpu.reciprocal %411 {approx = true} : vector<2x8x1xf32> -> vector<2x8x1xf32>
    %413 = vector.broadcast %412 : vector<2x8x1xf32> to vector<2x8x8xf32>
    %414 = arith.mulf %409, %413 : vector<2x8x8xf32>
    %415 = arith.truncf %414 : vector<2x8x8xf32> to vector<2x8x8xbf16>
    %416 = arith.truncf %399 : vector<2x8x8xf32> to vector<2x8x8xbf16>
    "tpu.trace_start"() <{level = 10 : i32, message = "bqk,bkd->bqd"}> : () -> ()
    %cst_298 = arith.constant dense<0.000000e+00> : vector<2x8x8xf32>
    %417 = tpu.matmul %415, %416, %cst_298 {dimension_numbers = #tpu.dot_dimension_numbers<[2], [1], [1], [2], [0, 0, 0, 1, 1, 2], [0], [0]>} : vector<2x8x8xbf16>, vector<2x8x8xbf16>, vector<2x8x8xf32> -> vector<2x8x8xf32>
    "tpu.trace_stop"() : () -> ()
    %418 = vector.shape_cast %417 : vector<2x8x8xf32> to vector<16x8xf32>
    %419 = arith.truncf %418 : vector<16x8xf32> to vector<16x8xbf16>
    %c1_299 = arith.constant 1 : index
    %c2_300 = arith.constant 2 : index
    %c0_301 = arith.constant 0 : index
    %c0_302 = arith.constant 0 : index
    %420 = vector.load %arg9[%c1_299, %c2_300, %c0_301, %c0_302] : memref<2x4x8x32xbf16, #tpu.memory_space<vmem>>, vector<1x1x8x32xbf16>
    %421 = vector.shape_cast %420 : vector<1x1x8x32xbf16> to vector<8x32xbf16>
    %cst_303 = arith.constant dense<0.000000e+00> : vector<16x32xf32>
    %422 = tpu.matmul %419, %421, %cst_303 {dimension_numbers = #tpu.dot_dimension_numbers<[1], [0], [0], [1], [0, 0, 1, 1], [], []>} : vector<16x8xbf16>, vector<8x32xbf16>, vector<16x32xf32> -> vector<16x32xf32>
    %423 = arith.addf %375, %422 : vector<16x32xf32>
    %c1_304 = arith.constant 1 : index
    %c3_305 = arith.constant 3 : index
    %c0_306 = arith.constant 0 : index
    %c0_307 = arith.constant 0 : index
    %424 = vector.load %arg3[%c1_304, %c3_305, %c0_306, %c0_307] : memref<2x4x32x8xbf16, #tpu.memory_space<vmem>>, vector<1x1x32x8xbf16>
    %425 = vector.shape_cast %424 : vector<1x1x32x8xbf16> to vector<32x8xbf16>
    %cst_308 = arith.constant dense<0.000000e+00> : vector<16x8xf32>
    %426 = tpu.matmul %278, %425, %cst_308 {dimension_numbers = #tpu.dot_dimension_numbers<[1], [0], [0], [1], [0, 0, 1, 1], [], []>} : vector<16x32xbf16>, vector<32x8xbf16>, vector<16x8xf32> -> vector<16x8xf32>
    %c1_309 = arith.constant 1 : index
    %c3_310 = arith.constant 3 : index
    %c0_311 = arith.constant 0 : index
    %c0_312 = arith.constant 0 : index
    %427 = vector.load %arg6[%c1_309, %c3_310, %c0_311, %c0_312] : memref<2x4x1x8xf32, #tpu.memory_space<vmem>>, vector<1x1x1x8xf32>
    %428 = vector.shape_cast %427 : vector<1x1x1x8xf32> to vector<1x8xf32>
    %429 = vector.broadcast %428 : vector<1x8xf32> to vector<16x8xf32>
    %430 = arith.addf %426, %429 : vector<16x8xf32>
    %431 = vector.shape_cast %430 : vector<16x8xf32> to vector<2x8x8xf32>
    %c1_313 = arith.constant 1 : index
    %c3_314 = arith.constant 3 : index
    %c0_315 = arith.constant 0 : index
    %c0_316 = arith.constant 0 : index
    %432 = vector.load %arg4[%c1_313, %c3_314, %c0_315, %c0_316] : memref<2x4x32x8xbf16, #tpu.memory_space<vmem>>, vector<1x1x32x8xbf16>
    %433 = vector.shape_cast %432 : vector<1x1x32x8xbf16> to vector<32x8xbf16>
    %cst_317 = arith.constant dense<0.000000e+00> : vector<16x8xf32>
    %434 = tpu.matmul %278, %433, %cst_317 {dimension_numbers = #tpu.dot_dimension_numbers<[1], [0], [0], [1], [0, 0, 1, 1], [], []>} : vector<16x32xbf16>, vector<32x8xbf16>, vector<16x8xf32> -> vector<16x8xf32>
    %c1_318 = arith.constant 1 : index
    %c3_319 = arith.constant 3 : index
    %c0_320 = arith.constant 0 : index
    %c0_321 = arith.constant 0 : index
    %435 = vector.load %arg7[%c1_318, %c3_319, %c0_320, %c0_321] : memref<2x4x1x8xf32, #tpu.memory_space<vmem>>, vector<1x1x1x8xf32>
    %436 = vector.shape_cast %435 : vector<1x1x1x8xf32> to vector<1x8xf32>
    %437 = vector.broadcast %436 : vector<1x8xf32> to vector<16x8xf32>
    %438 = arith.addf %434, %437 : vector<16x8xf32>
    %439 = vector.shape_cast %438 : vector<16x8xf32> to vector<2x8x8xf32>
    %c1_322 = arith.constant 1 : index
    %c3_323 = arith.constant 3 : index
    %c0_324 = arith.constant 0 : index
    %c0_325 = arith.constant 0 : index
    %440 = vector.load %arg5[%c1_322, %c3_323, %c0_324, %c0_325] : memref<2x4x32x8xbf16, #tpu.memory_space<vmem>>, vector<1x1x32x8xbf16>
    %441 = vector.shape_cast %440 : vector<1x1x32x8xbf16> to vector<32x8xbf16>
    %cst_326 = arith.constant dense<0.000000e+00> : vector<16x8xf32>
    %442 = tpu.matmul %278, %441, %cst_326 {dimension_numbers = #tpu.dot_dimension_numbers<[1], [0], [0], [1], [0, 0, 1, 1], [], []>} : vector<16x32xbf16>, vector<32x8xbf16>, vector<16x8xf32> -> vector<16x8xf32>
    %c1_327 = arith.constant 1 : index
    %c3_328 = arith.constant 3 : index
    %c0_329 = arith.constant 0 : index
    %c0_330 = arith.constant 0 : index
    %443 = vector.load %arg8[%c1_327, %c3_328, %c0_329, %c0_330] : memref<2x4x1x8xf32, #tpu.memory_space<vmem>>, vector<1x1x1x8xf32>
    %444 = vector.shape_cast %443 : vector<1x1x1x8xf32> to vector<1x8xf32>
    %445 = vector.broadcast %444 : vector<1x8xf32> to vector<16x8xf32>
    %446 = arith.addf %442, %445 : vector<16x8xf32>
    %447 = vector.shape_cast %446 : vector<16x8xf32> to vector<2x8x8xf32>
    %448 = arith.truncf %431 : vector<2x8x8xf32> to vector<2x8x8xbf16>
    %449 = arith.truncf %439 : vector<2x8x8xf32> to vector<2x8x8xbf16>
    "tpu.trace_start"() <{level = 10 : i32, message = "bqd,bkd->bqk"}> : () -> ()
    %cst_331 = arith.constant dense<0.000000e+00> : vector<2x8x8xf32>
    %450 = tpu.matmul %448, %449, %cst_331 {dimension_numbers = #tpu.dot_dimension_numbers<[2], [2], [1], [1], [0, 0, 0, 1, 1, 1], [0], [0]>} : vector<2x8x8xbf16>, vector<2x8x8xbf16>, vector<2x8x8xf32> -> vector<2x8x8xf32>
    "tpu.trace_stop"() : () -> ()
    %cst_332 = arith.constant 0.353553385 : f32
    %451 = vector.broadcast %cst_332 : f32 to vector<2x8x8xf32>
    %452 = arith.mulf %450, %451 : vector<2x8x8xf32>
    %cst_333 = arith.constant dense<0xFF800000> : vector<2x8xf32>
    %453 = vector.multi_reduction <maximumf>, %452, %cst_333 [2] : vector<2x8x8xf32> to vector<2x8xf32>
    %454 = vector.shape_cast %453 : vector<2x8xf32> to vector<2x8x1xf32>
    %455 = vector.broadcast %454 : vector<2x8x1xf32> to vector<2x8x8xf32>
    %456 = arith.subf %452, %455 : vector<2x8x8xf32>
    %457 = math.exp %456 : vector<2x8x8xf32>
    %cst_334 = arith.constant dense<0.000000e+00> : vector<2x8xf32>
    %458 = vector.multi_reduction <add>, %457, %cst_334 [2] : vector<2x8x8xf32> to vector<2x8xf32>
    %459 = vector.shape_cast %458 : vector<2x8xf32> to vector<2x8x1xf32>
    %460 = tpu.reciprocal %459 {approx = true} : vector<2x8x1xf32> -> vector<2x8x1xf32>
    %461 = vector.broadcast %460 : vector<2x8x1xf32> to vector<2x8x8xf32>
    %462 = arith.mulf %457, %461 : vector<2x8x8xf32>
    %463 = arith.truncf %462 : vector<2x8x8xf32> to vector<2x8x8xbf16>
    %464 = arith.truncf %447 : vector<2x8x8xf32> to vector<2x8x8xbf16>
    "tpu.trace_start"() <{level = 10 : i32, message = "bqk,bkd->bqd"}> : () -> ()
    %cst_335 = arith.constant dense<0.000000e+00> : vector<2x8x8xf32>
    %465 = tpu.matmul %463, %464, %cst_335 {dimension_numbers = #tpu.dot_dimension_numbers<[2], [1], [1], [2], [0, 0, 0, 1, 1, 2], [0], [0]>} : vector<2x8x8xbf16>, vector<2x8x8xbf16>, vector<2x8x8xf32> -> vector<2x8x8xf32>
    "tpu.trace_stop"() : () -> ()
    %466 = vector.shape_cast %465 : vector<2x8x8xf32> to vector<16x8xf32>
    %467 = arith.truncf %466 : vector<16x8xf32> to vector<16x8xbf16>
    %c1_336 = arith.constant 1 : index
    %c3_337 = arith.constant 3 : index
    %c0_338 = arith.constant 0 : index
    %c0_339 = arith.constant 0 : index
    %468 = vector.load %arg9[%c1_336, %c3_337, %c0_338, %c0_339] : memref<2x4x8x32xbf16, #tpu.memory_space<vmem>>, vector<1x1x8x32xbf16>
    %469 = vector.shape_cast %468 : vector<1x1x8x32xbf16> to vector<8x32xbf16>
    %cst_340 = arith.constant dense<0.000000e+00> : vector<16x32xf32>
    %470 = tpu.matmul %467, %469, %cst_340 {dimension_numbers = #tpu.dot_dimension_numbers<[1], [0], [0], [1], [0, 0, 1, 1], [], []>} : vector<16x8xbf16>, vector<8x32xbf16>, vector<16x32xf32> -> vector<16x32xf32>
    %471 = arith.addf %423, %470 : vector<16x32xf32>
    %c1_341 = arith.constant 1 : index
    %c0_342 = arith.constant 0 : index
    %c0_343 = arith.constant 0 : index
    %472 = vector.load %arg10[%c1_341, %c0_342, %c0_343] : memref<2x1x32xf32, #tpu.memory_space<vmem>>, vector<1x1x32xf32>
    %473 = vector.shape_cast %472 : vector<1x1x32xf32> to vector<1x32xf32>
    %474 = vector.broadcast %473 : vector<1x32xf32> to vector<16x32xf32>
    %475 = arith.addf %471, %474 : vector<16x32xf32>
    %476 = arith.addf %277, %475 : vector<16x32xf32>
    %cst_344 = arith.constant dense<0.000000e+00> : vector<16xf32>
    %477 = vector.multi_reduction <add>, %476, %cst_344 [1] : vector<16x32xf32> to vector<16xf32>
    %478 = vector.shape_cast %477 : vector<16xf32> to vector<16x1xf32>
    %cst_345 = arith.constant 3.200000e+01 : f32
    %479 = vector.broadcast %cst_345 : f32 to vector<16x1xf32>
    %480 = arith.divf %478, %479 : vector<16x1xf32>
    %481 = vector.broadcast %480 : vector<16x1xf32> to vector<16x32xf32>
    %482 = arith.subf %476, %481 : vector<16x32xf32>
    %483 = arith.mulf %482, %482 : vector<16x32xf32>
    %cst_346 = arith.constant dense<0.000000e+00> : vector<16xf32>
    %484 = vector.multi_reduction <add>, %483, %cst_346 [1] : vector<16x32xf32> to vector<16xf32>
    %485 = vector.shape_cast %484 : vector<16xf32> to vector<16x1xf32>
    %cst_347 = arith.constant 3.200000e+01 : f32
    %486 = vector.broadcast %cst_347 : f32 to vector<16x1xf32>
    %487 = arith.divf %485, %486 : vector<16x1xf32>
    %488 = vector.broadcast %480 : vector<16x1xf32> to vector<16x32xf32>
    %489 = arith.subf %476, %488 : vector<16x32xf32>
    %cst_348 = arith.constant 9.99999974E-6 : f32
    %490 = vector.broadcast %cst_348 : f32 to vector<16x1xf32>
    %491 = arith.addf %487, %490 : vector<16x1xf32>
    %492 = math.rsqrt %491 : vector<16x1xf32>
    %493 = vector.broadcast %492 : vector<16x1xf32> to vector<16x32xf32>
    %494 = arith.mulf %489, %493 : vector<16x32xf32>
    %c1_349 = arith.constant 1 : index
    %c0_350 = arith.constant 0 : index
    %c0_351 = arith.constant 0 : index
    %495 = vector.load %arg11[%c1_349, %c0_350, %c0_351] : memref<2x1x32xf32, #tpu.memory_space<vmem>>, vector<1x1x32xf32>
    %496 = vector.shape_cast %495 : vector<1x1x32xf32> to vector<1x32xf32>
    %497 = vector.broadcast %496 : vector<1x32xf32> to vector<16x32xf32>
    %498 = arith.mulf %494, %497 : vector<16x32xf32>
    %c1_352 = arith.constant 1 : index
    %c0_353 = arith.constant 0 : index
    %c0_354 = arith.constant 0 : index
    %499 = vector.load %arg12[%c1_352, %c0_353, %c0_354] : memref<2x1x32xf32, #tpu.memory_space<vmem>>, vector<1x1x32xf32>
    %500 = vector.shape_cast %499 : vector<1x1x32xf32> to vector<1x32xf32>
    %501 = vector.broadcast %500 : vector<1x32xf32> to vector<16x32xf32>
    %502 = arith.addf %498, %501 : vector<16x32xf32>
    %503 = arith.truncf %502 : vector<16x32xf32> to vector<16x32xbf16>
    %c1_355 = arith.constant 1 : index
    %c0_356 = arith.constant 0 : index
    %c0_357 = arith.constant 0 : index
    %504 = vector.load %arg13[%c1_355, %c0_356, %c0_357] : memref<2x32x64xbf16, #tpu.memory_space<vmem>>, vector<1x32x64xbf16>
    %505 = vector.shape_cast %504 : vector<1x32x64xbf16> to vector<32x64xbf16>
    %cst_358 = arith.constant dense<0.000000e+00> : vector<16x64xf32>
    %506 = tpu.matmul %503, %505, %cst_358 {dimension_numbers = #tpu.dot_dimension_numbers<[1], [0], [0], [1], [0, 0, 1, 1], [], []>} : vector<16x32xbf16>, vector<32x64xbf16>, vector<16x64xf32> -> vector<16x64xf32>
    %c1_359 = arith.constant 1 : index
    %c0_360 = arith.constant 0 : index
    %c0_361 = arith.constant 0 : index
    %507 = vector.load %arg14[%c1_359, %c0_360, %c0_361] : memref<2x1x64xf32, #tpu.memory_space<vmem>>, vector<1x1x64xf32>
    %508 = vector.shape_cast %507 : vector<1x1x64xf32> to vector<1x64xf32>
    %509 = vector.broadcast %508 : vector<1x64xf32> to vector<16x64xf32>
    %510 = arith.addf %506, %509 : vector<16x64xf32>
    %cst_362 = arith.constant 0.000000e+00 : f32
    %511 = vector.broadcast %cst_362 : f32 to vector<16x64xf32>
    %512 = arith.maximumf %510, %511 : vector<16x64xf32>
    %513 = arith.truncf %512 : vector<16x64xf32> to vector<16x64xbf16>
    %c1_363 = arith.constant 1 : index
    %c0_364 = arith.constant 0 : index
    %c0_365 = arith.constant 0 : index
    %514 = vector.load %arg15[%c1_363, %c0_364, %c0_365] : memref<2x64x32xbf16, #tpu.memory_space<vmem>>, vector<1x64x32xbf16>
    %515 = vector.shape_cast %514 : vector<1x64x32xbf16> to vector<64x32xbf16>
    %cst_366 = arith.constant dense<0.000000e+00> : vector<16x32xf32>
    %516 = tpu.matmul %513, %515, %cst_366 {dimension_numbers = #tpu.dot_dimension_numbers<[1], [0], [0], [1], [0, 0, 1, 1], [], []>} : vector<16x64xbf16>, vector<64x32xbf16>, vector<16x32xf32> -> vector<16x32xf32>
    %c1_367 = arith.constant 1 : index
    %c0_368 = arith.constant 0 : index
    %c0_369 = arith.constant 0 : index
    %517 = vector.load %arg16[%c1_367, %c0_368, %c0_369] : memref<2x1x32xf32, #tpu.memory_space<vmem>>, vector<1x1x32xf32>
    %518 = vector.shape_cast %517 : vector<1x1x32xf32> to vector<1x32xf32>
    %519 = vector.broadcast %518 : vector<1x32xf32> to vector<16x32xf32>
    %520 = arith.addf %516, %519 : vector<16x32xf32>
    %521 = arith.addf %502, %520 : vector<16x32xf32>
    %cst_370 = arith.constant dense<0.000000e+00> : vector<16xf32>
    %522 = vector.multi_reduction <add>, %521, %cst_370 [1] : vector<16x32xf32> to vector<16xf32>
    %523 = vector.shape_cast %522 : vector<16xf32> to vector<16x1xf32>
    %cst_371 = arith.constant 3.200000e+01 : f32
    %524 = vector.broadcast %cst_371 : f32 to vector<16x1xf32>
    %525 = arith.divf %523, %524 : vector<16x1xf32>
    %526 = vector.broadcast %525 : vector<16x1xf32> to vector<16x32xf32>
    %527 = arith.subf %521, %526 : vector<16x32xf32>
    %528 = arith.mulf %527, %527 : vector<16x32xf32>
    %cst_372 = arith.constant dense<0.000000e+00> : vector<16xf32>
    %529 = vector.multi_reduction <add>, %528, %cst_372 [1] : vector<16x32xf32> to vector<16xf32>
    %530 = vector.shape_cast %529 : vector<16xf32> to vector<16x1xf32>
    %cst_373 = arith.constant 3.200000e+01 : f32
    %531 = vector.broadcast %cst_373 : f32 to vector<16x1xf32>
    %532 = arith.divf %530, %531 : vector<16x1xf32>
    %533 = vector.broadcast %525 : vector<16x1xf32> to vector<16x32xf32>
    %534 = arith.subf %521, %533 : vector<16x32xf32>
    %cst_374 = arith.constant 9.99999974E-6 : f32
    %535 = vector.broadcast %cst_374 : f32 to vector<16x1xf32>
    %536 = arith.addf %532, %535 : vector<16x1xf32>
    %537 = math.rsqrt %536 : vector<16x1xf32>
    %538 = vector.broadcast %537 : vector<16x1xf32> to vector<16x32xf32>
    %539 = arith.mulf %534, %538 : vector<16x32xf32>
    %c1_375 = arith.constant 1 : index
    %c0_376 = arith.constant 0 : index
    %c0_377 = arith.constant 0 : index
    %540 = vector.load %arg17[%c1_375, %c0_376, %c0_377] : memref<2x1x32xf32, #tpu.memory_space<vmem>>, vector<1x1x32xf32>
    %541 = vector.shape_cast %540 : vector<1x1x32xf32> to vector<1x32xf32>
    %542 = vector.broadcast %541 : vector<1x32xf32> to vector<16x32xf32>
    %543 = arith.mulf %539, %542 : vector<16x32xf32>
    %c1_378 = arith.constant 1 : index
    %c0_379 = arith.constant 0 : index
    %c0_380 = arith.constant 0 : index
    %544 = vector.load %arg18[%c1_378, %c0_379, %c0_380] : memref<2x1x32xf32, #tpu.memory_space<vmem>>, vector<1x1x32xf32>
    %545 = vector.shape_cast %544 : vector<1x1x32xf32> to vector<1x32xf32>
    %546 = vector.broadcast %545 : vector<1x32xf32> to vector<16x32xf32>
    %547 = arith.addf %543, %546 : vector<16x32xf32>
    %548 = vector.shape_cast %547 : vector<16x32xf32> to vector<2x8x32xf32>
    %cst_381 = arith.constant dense<0.000000e+00> : vector<2x32xf32>
    %549 = vector.multi_reduction <add>, %548, %cst_381 [1] : vector<2x8x32xf32> to vector<2x32xf32>
    %cst_382 = arith.constant 8.000000e+00 : f32
    %550 = vector.broadcast %cst_382 : f32 to vector<2x32xf32>
    %551 = arith.divf %549, %550 : vector<2x32xf32>
    %c0_383 = arith.constant 0 : index
    %c0_384 = arith.constant 0 : index
    %552 = vector.load %arg19[%c0_383, %c0_384] : memref<32x1xf32, #tpu.memory_space<vmem>>, vector<32x1xf32>
    %cst_385 = arith.constant dense<0.000000e+00> : vector<2x1xf32>
    %553 = tpu.matmul %551, %552, %cst_385 {dimension_numbers = #tpu.dot_dimension_numbers<[1], [0], [0], [1], [0, 0, 1, 1], [], []>} : vector<2x32xf32>, vector<32x1xf32>, vector<2x1xf32> -> vector<2x1xf32>
    %c0_386 = arith.constant 0 : index
    %c0_387 = arith.constant 0 : index
    %554 = vector.load %arg20[%c0_386, %c0_387] : memref<1x1xf32, #tpu.memory_space<vmem>>, vector<1x1xf32>
    %555 = vector.broadcast %554 : vector<1x1xf32> to vector<2x1xf32>
    %556 = arith.addf %553, %555 : vector<2x1xf32>
    %c0_388 = arith.constant 0 : index
    %c0_389 = arith.constant 0 : index
    %557 = vector.load %arg21[%c0_388, %c0_389] : memref<2x1xf32, #tpu.memory_space<vmem>>, vector<2x1xf32>
    tpu.vector_store %arg21[%c0_388, %c0_389], %556 {strides = array<i32>} : memref<2x1xf32, #tpu.memory_space<vmem>>, vector<2x1xf32>,
    return
  }
}

</mosaic_0001>

<bundles_post_ra>
// kernel: tpu_custom_call.1
= control target key start
LH: loop header
LB: loop body
LE: loop exit
PB: predicated region body
PF: predicated region fallthrough
CT: control target
= control target key end

     0   :  { %v5539_v0 = vmov 0.0   ;;  %vm5540_vm0 = vmmov 0   ;;  %vm104_vm1 = vcmask 261120   ;;  %vm281_vm2 = vcmask 64512   ;;  %s6486_s3 = inlined_call_operand.vmem [shape: bf16[2,4,32,8], index: 3, kind: input, shape index: {}]   ;;  %s6487_s0 = inlined_call_operand.vmem [shape: f32[2,8,32], index: 0, kind: input, shape index: {}]   ;;  %s6488_s1 = inlined_call_operand.vmem [shape: f32[8,32], index: 1, kind: input, shape index: {}]   ;;  %s6489_s2 = inlined_call_operand.vmem [shape: f32[2,8,32], index: 2, kind: input, shape index: {}]   ;;  %s6490_s4 = inlined_call_operand.vmem [shape: bf16[2,4,32,8], index: 4, kind: input, shape index: {}]   ;;  %s6491_s5 = inlined_call_operand.vmem [shape: bf16[2,4,32,8], index: 5, kind: input, shape index: {}]   ;;  %s6492_s7 = inlined_call_operand.vmem [shape: f32[2,4,1,8], index: 7, kind: input, shape index: {}]   ;;  %s6493_s6 = inlined_call_operand.vmem [shape: f32[2,4,1,8], index: 6, kind: input, shape index: {}]   ;;  %s6494_s8 = inlined_call_operand.vmem [shape: f32[2,4,1,8], index: 8, kind: input, shape index: {}]   ;;  %s6495_s9 = inlined_call_operand.vmem [shape: bf16[2,4,8,32], index: 9, kind: input, shape index: {}]   ;;  %s6496_s10 = inlined_call_operand.vmem [shape: f32[2,1,32], index: 10, kind: input, shape index: {}]   ;;  %s6497_s13 = inlined_call_operand.vmem [shape: bf16[2,32,64], index: 13, kind: input, shape index: {}]   ;;  %s6498_s15 = inlined_call_operand.vmem [shape: bf16[2,64,32], index: 15, kind: input, shape index: {}]   ;;  %s6499_s11 = inlined_call_operand.vmem [shape: f32[2,1,32], index: 11, kind: input, shape index: {}]   ;;  %s6500_s12 = inlined_call_operand.vmem [shape: f32[2,1,32], index: 12, kind: input, shape index: {}]   ;;  %s6501_s14 = inlined_call_operand.vmem [shape: f32[2,1,64], index: 14, kind: input, shape index: {}]   ;;  %s6502_s16 = inlined_call_operand.vmem [shape: f32[2,1,32], index: 16, kind: input, shape index: {}]   ;;  %s6503_s17 = inlined_call_operand.vmem [shape: f32[2,1,32], index: 17, kind: input, shape index: {}]   ;;  %s6504_s18 = inlined_call_operand.vmem [shape: f32[2,1,32], index: 18, kind: input, shape index: {}]   ;;  %s6505_s19 = inlined_call_operand.vmem [shape: f32[32,1], index: 19, kind: input, shape index: {}]   ;;  %s6506_s20 = inlined_call_operand.<no memory space> [shape: f32[1,1], index: 20, kind: input, shape index: {}]   ;;  %s6507_s21 = inlined_call_operand.vmem [shape: f32[2,1], index: 21, kind: output, shape index: {}]  }
   0x1   :  { %6513 = sst [smem:[#allocation3_spill]] %s6486_s3  ;;  %4907 = vmatprep.subr.bf16.mxu1 %v5539_v0  ;;  %4911 = vmatprep.mubr.msk.bf16.mxu1 %vm5540_vm0, %v5539_v0  ;;  %v4439_v21 = vld [vmem:[%s6492_s7] ss:$0 sm:$0xff]  ;;  %vm405_vm3 = vcmask 1043456   ;;  %vm2106_vm4 = vcmask 523264   ;;  %vm4355_vm5 = vcmask 1041409  }
   0x2   :  { %6514 = sst [smem:[#allocation4_spill]] %s6487_s0  ;;  %s6519_s26 = sld [smem:[#allocation3_spill]]  ;;  %4923 = vmatprep.subr.bf16.mxu0 %v5539_v0  ;;  %4927 = vmatprep.mubr.msk.bf16.mxu0 %vm5540_vm0, %v5539_v0  ;;  %v4435_v29 = vld [vmem:[%s6493_s6] ss:$0 sm:$0xff]  ;;  %vm4429_vm6 = vcmask 1024  }
   0x3   :  { %6515 = sst [smem:[#allocation5_spill]] %s6488_s1  ;;  %s6520_s3 = sld [smem:[#allocation4_spill]]  ;;  %v4443_v37 = vld [vmem:[%s6494_s8] ss:$0 sm:$0xff] }
   0x4   :  { %6516 = sst [smem:[#allocation6_spill]] %s6489_s2  ;;  %s6521_s23 = sld [smem:[#allocation5_spill]] }
   0x5   :  { %6517 = sst [smem:[#allocation7_spill]] %s6490_s4  ;;  %s6522_s1 = sld [smem:[#allocation6_spill]] }
   0x6   :  { %6518 = sst [smem:[#allocation8_spill]] %s6491_s5  ;;  %s6523_s29 = sld [smem:[#allocation7_spill]] }
   0x7   :  { %s6524_s22 = sld [smem:[#allocation8_spill]] }
   0x8   :  { %v5399_v1 = vld [vmem:[%s6519_s26] sm:$0xff]   ;;  %v5400_v2 = vld [vmem:[%s6519_s26 + $0x8] sm:$0xff]  }
   0x9   :  { %4908 = vmatpush3.bf16.msra.mxu1 %v5399_v1  ;;  %v71_v3 = vld [vmem:[%s6520_s3] sm:$0xff]  ;;  %v72_v4 = vld [vmem:[%s6520_s3 + $0x8] sm:$0xff] }
   0xa   :  { %v73_v5 = vld [vmem:[%s6521_s23] sm:$0xff]  ;;  %4909 = vmatprep.subr.bf16.mxu1 %v5539_v0 }
   0xb   :  { %v74_v6 = vadd.f32 %v73_v5, %v71_v3  ;;  %v75_v7 = vadd.f32 %v73_v5, %v72_v4  ;;  %v76_v8 = vld [vmem:[%s6522_s1] sm:$0xff]  ;;  %v77_v9 = vld [vmem:[%s6522_s1 + $0x8] sm:$0xff] }
   0xc   :  { %v5401_v12 = vld [vmem:[%s6523_s29] sm:$0xff]   ;;  %v5402_v14 = vld [vmem:[%s6523_s29 + $0x8] sm:$0xff]  }
   0xd   :  { %v5680_v10 = vadd.f32 %v76_v8, %v74_v6  ;;  %v5682_v11 = vadd.f32 %v77_v9, %v75_v7  ;;  %4910 = vmatpush3.bf16.msra.mxu1 %v5400_v2  ;;  %v5403_v15 = vld [vmem:[%s6524_s22] sm:$0xff]   ;;  %v5404_v16 = vld [vmem:[%s6524_s22 + $0x8] sm:$0xff]  }
   0xe   :  { %4915 = vmatprep.subr.bf16.mxu1 %v5539_v0  ;;  %4924 = vmatpush3.bf16.msra.mxu0 %v5403_v15 }
   0xf   :  { %v5689_v13 = vpack.c.bf16 %v5682_v11, %v5680_v10  ;;  %4925 = vmatprep.subr.bf16.mxu0 %v5539_v0 }
  0x11   :  { %4912 = vmatmul.mubr.msk.bf16.vlgmr.msra.gmra.mrb[0].mxu1 %vm104_vm1, %v5689_v13 }
  0x12   :  { %4916 = vmatpush3.bf16.msra.mxu1 %v5401_v12  ;;  %4919 = vmatprep.mubr.msk.bf16.mxu1 %vm5540_vm0, %v5539_v0 }
  0x13   :  { %4917 = vmatprep.subr.bf16.mxu1 %v5539_v0  ;;  %4926 = vmatpush3.bf16.msra.mxu0 %v5404_v16 }
  0x14   :  { %4937 = vmatprep.subr.bf16.mxu0 %v5539_v0 }
  0x16   :  { %4918 = vmatpush3.bf16.msra.mxu1 %v5402_v14  ;;  %4928 = vmatmul.mubr.msk.bf16.vlgmr.msra.gmra.mrb[0].mxu0 %vm104_vm1, %v5689_v13  ;;  %v5405_v14 = vld [vmem:[%s6523_s29 + $0x10] sm:$0xff]  }
  0x17   :  { %4931 = vmatprep.subr.bf16.mxu1 %v5539_v0  ;;  %4939 = vmatprep.mubr.msk.bf16.mxu0 %vm5540_vm0, %v5539_v0 }
  0x19   :  { %4920 = vmatmul.mubr.msk.bf16.vlgmr.msra.gmra.mrb[4].mxu1 %vm104_vm1, %v5689_v13 }
  0x1a   :  { %4933 = vmatprep.mubr.msk.bf16.mxu1 %vm5540_vm0, %v5539_v0 }
  0xe4   :  { %v142_v17 = vpop.f32.mrb[0].mxu1 }
  0xe5   :  { %v4913_v18 = vpop.f32.mrb[1].mxu1  ;;  %v143_v32 = vadd.f32 %v4435_v29, %v142_v17 }
  0xe6   :  { %v145_v19 = vpop.f32.mrb[2].mxu1  ;;  %v5406_v18 = vld [vmem:[%s6523_s29 + $0x18] sm:$0xff]  }
  0xe7   :  { %v4914_v20 = vpop.f32.mrb[3].mxu1  ;;  %v146_v34 = vadd.f32 %v4435_v29, %v145_v19  ;;  %v277_v35 = vpack.c.bf16 %v143_v32, %v143_v32  ;;  %v5407_v19 = vld [vmem:[%s6519_s26 + $0x10] sm:$0xff]   ;;  %v4465_v32 = vld [vmem:[%s6492_s7 + $0x1] ss:$0 sm:$0xff] }
  0xe9   :  { %v278_v36 = vpack.c.bf16 %v146_v34, %v146_v34  ;;  %v270_v38 = vpop.f32.mrb[0].mxu0 }
  0xea   :  { %v271_v39 = vadd.f32 %v4443_v37, %v270_v38  ;;  %v4929_v40 = vpop.f32.mrb[1].mxu0  ;;  %v4456_v38 = vld [vmem:[%s6493_s6 + $0x1] ss:$0 sm:$0xff] }
  0xeb   :  { %v273_v41 = vpop.f32.mrb[2].mxu0 }
  0xec   :  { %v206_v22 = vpop.f32.mrb[4].mxu1  ;;  %v400_v42 = vpack.c.bf16 %v271_v39, %v271_v39  ;;  %v274_v43 = vadd.f32 %v4443_v37, %v273_v41  ;;  %v4930_v44 = vpop.f32.mrb[3].mxu0 }
  0xed   :  { %v207_v23 = vadd.f32 %v4439_v21, %v206_v22  ;;  %v4921_v24 = vpop.f32.mrb[5].mxu1  ;;  %v5409_v22 = vld [vmem:[%s6524_s22 + $0x10] sm:$0xff]  }
  0xee   :  { %v209_v25 = vpop.f32.mrb[6].mxu1  ;;  %v407_v45 = vsel %vm405_vm3, %v400_v42, 0  ;;  %v401_v46 = vpack.c.bf16 %v274_v43, %v274_v43 }
  0xef   :  { %v279_v26 = vpack.c.bf16 %v207_v23, %v207_v23  ;;  %v210_v27 = vadd.f32 %v4439_v21, %v209_v25  ;;  %v4922_v28 = vpop.f32.mrb[7].mxu1  ;;  %v5408_v21 = vld [vmem:[%s6519_s26 + $0x18] sm:$0xff]  }
  0xf0   :  { %v453_v47 = vsel %vm405_vm3, %v401_v46, 0  ;;  %v5410_v23 = vld [vmem:[%s6524_s22 + $0x18] sm:$0xff]  }
  0xf1   :  { %v286_v30 = vsel %vm281_vm2, %v279_v26, 0  ;;  %v280_v31 = vpack.c.bf16 %v210_v27, %v210_v27 }
  0xf2   :  { %4932 = vmatpush3.bf16.xpose.msra.mxu1 %v286_v30 }
  0xf3   :  { %v332_v33 = vsel %vm281_vm2, %v280_v31, 0  ;;  %4943 = vmatprep.subr.bf16.mxu1 %v5539_v0 }
  0xf4   :  { %4938 = vmatpush3.bf16.xpose.msra.mxu0 %v332_v33 }
  0xf5   :  { %4949 = vmatprep.subr.bf16.mxu0 %v5539_v0 }
  0xf9   :  { %4934 = vmatmul.mubr.msk.bf16.vlgmr.msra.gmra.mrb[8].mxu1 %vm281_vm2, %v277_v35 }
  0xfa   :  { %4945 = vmatprep.mubr.msk.bf16.mxu1 %vm5540_vm0, %v5539_v0  ;;  %4944 = vmatpush3.bf16.msra.mxu1 %v407_v45 }
  0xfb   :  { %4940 = vmatmul.mubr.msk.bf16.vlgmr.msra.gmra.mrb[4].mxu0 %vm281_vm2, %v278_v36  ;;  %4955 = vmatprep.subr.bf16.mxu1 %v5539_v0 }
  0xfc   :  { %4951 = vmatprep.mubr.msk.bf16.mxu0 %vm5540_vm0, %v5539_v0  ;;  %4950 = vmatpush3.bf16.msra.mxu0 %v453_v47 }
  0xfd   :  { %4963 = vmatprep.subr.bf16.mxu0 %v5539_v0 }
 0x1cc   :  { %v322_v48 = vpop.f32.mrb[8].mxu1 }
 0x1cd   :  { %v4935_v49 = vpop.f32.mrb[9].mxu1  ;;  %v374_v56 = vmul.f32 0.35355338, %v322_v48 }
 0x1ce   :  { %v325_v50 = vpop.f32.mrb[10].mxu1  ;;  %v368_v51 = vpop.f32.mrb[4].mxu0 }
 0x1cf   :  { %v375_v52 = vmul.f32 0.35355338, %v368_v51  ;;  %v4936_v53 = vpop.f32.mrb[11].mxu1  ;;  %v4941_v54 = vpop.f32.mrb[5].mxu0  ;;  %v376_v59 = vsel %vm281_vm2, %v374_v56, -inf }
 0x1d0   :  { %v371_v55 = vpop.f32.mrb[6].mxu0  ;;  %v4474_v53 = vld [vmem:[%s6494_s8 + $0x1] ss:$0 sm:$0xff] }
 0x1d1   :  { %v4942_v57 = vpop.f32.mrb[7].mxu0  ;;  %v379_v58 = vsel %vm281_vm2, %v375_v52, -inf }
 0x1d2   :  { %380 = vmax.xlane.f32.xlu0 %v379_v58 }
 0x1d6   :  { %377 = vmax.xlane.f32.xlu0 %v376_v59 }
 0x25f   :  { %v381_v60 = vpop.xlane.xlu0 %380 }
 0x260   :  { %v383_v61 = vsub.f32 %v375_v52, %v381_v60 }
 0x262   :  { %v386_v62 = vmul.f32 1.442695, %v383_v61 }
 0x263   :  { %v378_v63 = vpop.xlane.xlu0 %377 }
 0x264   :  { %5459 = vpow2.f32 %v386_v62  ;;  %v382_v1 = vsub.f32 %v374_v56, %v378_v63 }
 0x266   :  { %v384_v2 = vmul.f32 1.442695, %v382_v1 }
 0x268   :  { %5461 = vpow2.f32 %v384_v2 }
 0x26e   :  { %v5460_v3 = vpop.eup %5459 }
 0x26f   :  { %v391_v4 = vsel %vm281_vm2, %v5460_v3, 0.0 }
 0x270   :  { %392 = vadd.xlane.f32.xlu1 %v391_v4 }
 0x272   :  { %v5462_v5 = vpop.eup %5461 }
 0x273   :  { %v388_v6 = vsel %vm281_vm2, %v5462_v5, 0.0 }
 0x274   :  { %389 = vadd.xlane.f32.xlu1 %v388_v6 }
 0x2fd   :  { %v393_v7 = vpop.xlane.xlu1 %392 }
 0x2fe   :  { %5463 = vrcp.f32 %v393_v7 }
 0x301   :  { %v390_v8 = vpop.xlane.xlu1 %389 }
 0x302   :  { %5465 = vrcp.f32 %v390_v8 }
 0x308   :  { %v5464_v9 = vpop.eup %5463 }
 0x309   :  { %v397_v12 = vmul.f32 %v5464_v9, %v5460_v3 }
 0x30b   :  { %v399_v15 = vpack.c.bf16 %v397_v12, %v397_v12 }
 0x30c   :  { %v5466_v16 = vpop.eup %5465 }
 0x30d   :  { %v396_v17 = vmul.f32 %v5466_v16, %v5462_v5  ;;  %4952 = vmatmul.mubr.msk.bf16.vlgmr.msra.gmra.mrb[8].mxu0 %vm281_vm2, %v399_v15 }
 0x30e   :  { %4964 = vmatpush3.bf16.msra.mxu0 %v5405_v14  ;;  %4967 = vmatprep.mubr.msk.bf16.mxu0 %vm5540_vm0, %v5539_v0 }
 0x30f   :  { %v398_v20 = vpack.c.bf16 %v396_v17, %v396_v17  ;;  %4965 = vmatprep.subr.bf16.mxu0 %v5539_v0 }
 0x311   :  { %4946 = vmatmul.mubr.msk.bf16.vlgmr.msra.gmra.mrb[12].mxu1 %vm281_vm2, %v398_v20 }
 0x312   :  { %4966 = vmatpush3.bf16.msra.mxu0 %v5406_v18  ;;  %4956 = vmatpush3.bf16.msra.mxu1 %v5407_v19 }
 0x313   :  { %4957 = vmatprep.subr.bf16.mxu1 %v5539_v0  ;;  %4959 = vmatprep.mubr.msk.bf16.mxu1 %vm5540_vm0, %v5539_v0 }
 0x314   :  { %4979 = vmatprep.subr.bf16.mxu0 %v5539_v0 }
 0x315   :  { %4968 = vmatmul.mubr.msk.bf16.vlgmr.msra.gmra.mrb[12].mxu0 %vm104_vm1, %v5689_v13 }
 0x316   :  { %4958 = vmatpush3.bf16.msra.mxu1 %v5408_v21  ;;  %4981 = vmatprep.mubr.msk.bf16.mxu0 %vm5540_vm0, %v5539_v0 }
 0x317   :  { %4971 = vmatprep.subr.bf16.mxu1 %v5539_v0 }
 0x319   :  { %4960 = vmatmul.mubr.msk.bf16.vlgmr.msra.gmra.mrb[16].mxu1 %vm104_vm1, %v5689_v13 }
 0x31a   :  { %4975 = vmatprep.mubr.msk.bf16.mxu1 %vm5540_vm0, %v5539_v0  ;;  %4972 = vmatpush3.bf16.msra.mxu1 %v5409_v22 }
 0x31b   :  { %4973 = vmatprep.subr.bf16.mxu1 %v5539_v0 }
 0x31e   :  { %4974 = vmatpush3.bf16.msra.mxu1 %v5410_v23 }
 0x31f   :  { %4985 = vmatprep.subr.bf16.mxu1 %v5539_v0 }
 0x321   :  { %4976 = vmatmul.mubr.msk.bf16.vlgmr.msra.gmra.mrb[20].mxu1 %vm104_vm1, %v5689_v13 }
 0x322   :  { %4987 = vmatprep.mubr.msk.bf16.mxu1 %vm5540_vm0, %v5539_v0 }
 0x3e0   :  { %v5786_v24 = vpop.f32.mrb[8].mxu0 }
 0x3e1   :  { %v4953_v25 = vpop.f32.mrb[9].mxu0 }
 0x3e2   :  { %v492_v26 = vpop.f32.mrb[10].mxu0 }
 0x3e3   :  { %v4954_v27 = vpop.f32.mrb[11].mxu0 }
 0x3e4   :  { %v5788_v28 = vpop.f32.mrb[12].mxu1 }
 0x3e5   :  { %v495_v29 = vpack.c.bf16 %v5786_v24, %v5788_v28  ;;  %v4947_v30 = vpop.f32.mrb[13].mxu1 }
 0x3e6   :  { %v446_v31 = vpop.f32.mrb[14].mxu1 }
 0x3e7   :  { %v4948_v33 = vpop.f32.mrb[15].mxu1 }
 0x3e8   :  { %v622_v34 = vpop.f32.mrb[12].mxu0 }
 0x3e9   :  { %v623_v35 = vadd.f32 %v4465_v32, %v622_v34  ;;  %v4969_v36 = vpop.f32.mrb[13].mxu0 }
 0x3ea   :  { %v625_v37 = vpop.f32.mrb[14].mxu0 }
 0x3eb   :  { %v697_v39 = vpack.c.bf16 %v623_v35, %v623_v35  ;;  %v626_v40 = vadd.f32 %v4465_v32, %v625_v37  ;;  %v4970_v41 = vpop.f32.mrb[15].mxu0  ;;  %v4482_v32 = vld [vmem:[%s6495_s9 + $0x4] sm:$0xf]  ;;  %v496_v35 = vld [vmem:[%s6495_s9] sm:$0xf] }
 0x3ec   :  { %v556_v42 = vpop.f32.mrb[16].mxu1  ;;  %v5411_v41 = vld [vmem:[%s6523_s29 + $0x20] sm:$0xff]  }
 0x3ed   :  { %v703_v43 = vsel %vm281_vm2, %v697_v39, 0  ;;  %v698_v44 = vpack.c.bf16 %v626_v40, %v626_v40  ;;  %v557_v45 = vadd.f32 %v4456_v38, %v556_v42  ;;  %v4961_v46 = vpop.f32.mrb[17].mxu1  ;;  %v965_v40 = vsel %vm405_vm3, %v496_v35, 0  ;;  %v5412_v42 = vld [vmem:[%s6523_s29 + $0x28] sm:$0xff]  }
 0x3ee   :  { %4980 = vmatpush3.bf16.xpose.msra.mxu0 %v703_v43  ;;  %v559_v47 = vpop.f32.mrb[18].mxu1 }
 0x3ef   :  { %v749_v48 = vsel %vm281_vm2, %v698_v44, 0  ;;  %v4962_v49 = vpop.f32.mrb[19].mxu1  ;;  %4991 = vmatprep.subr.bf16.mxu0 %v5539_v0  ;;  %v695_v50 = vpack.c.bf16 %v557_v45, %v557_v45  ;;  %v560_v51 = vadd.f32 %v4456_v38, %v559_v47  ;;  %v918_v38 = vsel %vm405_vm3, %v4482_v32, 0  ;;  %v5413_v44 = vld [vmem:[%s6519_s26 + $0x20] sm:$0xff]  }
 0x3f0   :  { %4986 = vmatpush3.bf16.xpose.msra.mxu1 %v749_v48 }
 0x3f1   :  { %4997 = vmatprep.subr.bf16.mxu1 %v5539_v0  ;;  %v696_v52 = vpack.c.bf16 %v560_v51, %v560_v51 }
 0x3f4   :  { %v688_v54 = vpop.f32.mrb[20].mxu1 }
 0x3f5   :  { %4982 = vmatmul.mubr.msk.bf16.vlgmr.msra.gmra.mrb[16].mxu0 %vm281_vm2, %v695_v50  ;;  %v689_v55 = vadd.f32 %v4474_v53, %v688_v54  ;;  %v4977_v56 = vpop.f32.mrb[21].mxu1  ;;  %v5414_v50 = vld [vmem:[%s6519_s26 + $0x28] sm:$0xff]  }
 0x3f6   :  { %4993 = vmatprep.mubr.msk.bf16.mxu0 %vm5540_vm0, %v5539_v0  ;;  %v691_v57 = vpop.f32.mrb[22].mxu1  ;;  %v5416_v56 = vld [vmem:[%s6524_s22 + $0x28] sm:$0xff]  }
 0x3f7   :  { %4988 = vmatmul.mubr.msk.bf16.vlgmr.msra.gmra.mrb[24].mxu1 %vm281_vm2, %v696_v52  ;;  %v817_v58 = vpack.c.bf16 %v689_v55, %v689_v55  ;;  %v692_v59 = vadd.f32 %v4474_v53, %v691_v57  ;;  %v4978_v60 = vpop.f32.mrb[23].mxu1  ;;  %v5415_v52 = vld [vmem:[%s6524_s22 + $0x20] sm:$0xff]  }
 0x3f8   :  { %4999 = vmatprep.mubr.msk.bf16.mxu1 %vm5540_vm0, %v5539_v0  ;;  %v4499_v57 = vld [vmem:[%s6492_s7 + $0x2] ss:$0 sm:$0xff] }
 0x3f9   :  { %v823_v61 = vsel %vm405_vm3, %v817_v58, 0  ;;  %v818_v62 = vpack.c.bf16 %v692_v59, %v692_v59 }
 0x3fa   :  { %4992 = vmatpush3.bf16.msra.mxu0 %v823_v61 }
 0x3fb   :  { %v869_v63 = vsel %vm405_vm3, %v818_v62, 0  ;;  %5003 = vmatprep.subr.bf16.mxu0 %v5539_v0 }
 0x3fc   :  { %4998 = vmatpush3.bf16.msra.mxu1 %v869_v63 }
 0x3fd   :  { %5009 = vmatprep.subr.bf16.mxu1 %v5539_v0 }
 0x4c8   :  { %v739_v1 = vpop.f32.mrb[16].mxu0 }
 0x4c9   :  { %v791_v2 = vmul.f32 0.35355338, %v739_v1  ;;  %v4983_v3 = vpop.f32.mrb[17].mxu0 }
 0x4ca   :  { %v742_v4 = vpop.f32.mrb[18].mxu0  ;;  %v785_v5 = vpop.f32.mrb[24].mxu1 }
 0x4cb   :  { %v792_v6 = vmul.f32 0.35355338, %v785_v5  ;;  %v4984_v7 = vpop.f32.mrb[19].mxu0  ;;  %v4989_v8 = vpop.f32.mrb[25].mxu1  ;;  %v793_v9 = vsel %vm281_vm2, %v791_v2, -inf }
 0x4cc   :  { %794 = vmax.xlane.f32.xlu0 %v793_v9  ;;  %v788_v12 = vpop.f32.mrb[26].mxu1 }
 0x4cd   :  { %v4990_v14 = vpop.f32.mrb[27].mxu1  ;;  %v796_v15 = vsel %vm281_vm2, %v792_v6, -inf }
 0x4ce   :  { %797 = vmax.xlane.f32.xlu1 %v796_v15  ;;  %v4490_v14 = vld [vmem:[%s6493_s6 + $0x2] ss:$0 sm:$0xff] }
 0x559   :  { %v795_v16 = vpop.xlane.xlu0 %794 }
 0x55a   :  { %v799_v17 = vsub.f32 %v791_v2, %v795_v16 }
 0x55b   :  { %v798_v18 = vpop.xlane.xlu1 %797 }
 0x55c   :  { %v801_v19 = vmul.f32 1.442695, %v799_v17  ;;  %v800_v20 = vsub.f32 %v792_v6, %v798_v18 }
 0x55e   :  { %5467 = vpow2.f32 %v801_v19  ;;  %v803_v21 = vmul.f32 1.442695, %v800_v20 }
 0x560   :  { %5469 = vpow2.f32 %v803_v21 }
 0x568   :  { %v5468_v22 = vpop.eup %5467 }
 0x569   :  { %v805_v23 = vsel %vm281_vm2, %v5468_v22, 0.0 }
 0x56a   :  { %v5470_v25 = vpop.eup %5469  ;;  %806 = vadd.xlane.f32.xlu0 %v805_v23  ;;  %v4508_v23 = vld [vmem:[%s6494_s8 + $0x2] ss:$0 sm:$0xff] }
 0x56b   :  { %v808_v26 = vsel %vm281_vm2, %v5470_v25, 0.0 }
 0x56c   :  { %809 = vadd.xlane.f32.xlu1 %v808_v26 }
 0x5f7   :  { %v807_v27 = vpop.xlane.xlu0 %806 }
 0x5f8   :  { %5471 = vrcp.f32 %v807_v27 }
 0x5f9   :  { %v810_v30 = vpop.xlane.xlu1 %809 }
 0x5fa   :  { %5473 = vrcp.f32 %v810_v30 }
 0x602   :  { %v5472_v31 = vpop.eup %5471 }
 0x603   :  { %v813_v33 = vmul.f32 %v5472_v31, %v5468_v22 }
 0x604   :  { %v5474_v34 = vpop.eup %5473 }
 0x605   :  { %v814_v36 = vmul.f32 %v5474_v34, %v5470_v25  ;;  %v815_v37 = vpack.c.bf16 %v813_v33, %v813_v33 }
 0x607   :  { %4994 = vmatmul.mubr.msk.bf16.vlgmr.msra.gmra.mrb[20].mxu0 %vm281_vm2, %v815_v37  ;;  %v816_v39 = vpack.c.bf16 %v814_v36, %v814_v36 }
 0x608   :  { %5004 = vmatpush3.bf16.msra.mxu0 %v918_v38  ;;  %5005 = vmatprep.mubr.msk.bf16.mxu0 %vm5540_vm0, %v5539_v0 }
 0x609   :  { %5000 = vmatmul.mubr.msk.bf16.vlgmr.msra.gmra.mrb[28].mxu1 %vm281_vm2, %v816_v39  ;;  %5015 = vmatprep.subr.bf16.mxu0 %v5539_v0 }
 0x60a   :  { %5010 = vmatpush3.bf16.msra.mxu1 %v965_v40  ;;  %5011 = vmatprep.mubr.msk.bf16.mxu1 %vm5540_vm0, %v5539_v0 }
 0x60b   :  { %5023 = vmatprep.subr.bf16.mxu1 %v5539_v0 }
 0x611   :  { %5012 = vmatmul.mubr.msk.bf16.vlgmr.msra.gmra.mrb[32].mxu1 %vm281_vm2, %v495_v29 }
 0x612   :  { %5024 = vmatpush3.bf16.msra.mxu1 %v5411_v41  ;;  %5027 = vmatprep.mubr.msk.bf16.mxu1 %vm5540_vm0, %v5539_v0 }
 0x613   :  { %5025 = vmatprep.subr.bf16.mxu1 %v5539_v0 }
 0x616   :  { %5026 = vmatpush3.bf16.msra.mxu1 %v5412_v42 }
 0x617   :  { %5039 = vmatprep.subr.bf16.mxu1 %v5539_v0 }
 0x619   :  { %5028 = vmatmul.mubr.msk.bf16.vlgmr.msra.gmra.mrb[36].mxu1 %vm104_vm1, %v5689_v13 }
 0x61a   :  { %5041 = vmatprep.mubr.msk.bf16.mxu1 %vm5540_vm0, %v5539_v0 }
 0x6da   :  { %v859_v24 = vpop.f32.mrb[20].mxu0 }
 0x6db   :  { %v4995_v28 = vpop.f32.mrb[21].mxu0 }
 0x6dc   :  { %v862_v29 = vpop.f32.mrb[22].mxu0  ;;  %v905_v43 = vpop.f32.mrb[28].mxu1 }
 0x6dd   :  { %v911_v45 = vpack.c.bf16 %v905_v43, %v859_v24  ;;  %v4996_v46 = vpop.f32.mrb[23].mxu0  ;;  %v5001_v47 = vpop.f32.mrb[29].mxu1 }
 0x6de   :  { %v908_v48 = vpop.f32.mrb[30].mxu1 }
 0x6df   :  { %v5002_v49 = vpop.f32.mrb[31].mxu1  ;;  %5006 = vmatmul.mubr.msk.bf16.vlgmr.msra.gmra.mrb[24].mxu0 %vm281_vm2, %v911_v45 }
 0x6e0   :  { %5016 = vmatpush3.bf16.msra.mxu0 %v5413_v44  ;;  %5019 = vmatprep.mubr.msk.bf16.mxu0 %vm5540_vm0, %v5539_v0 }
 0x6e1   :  { %5017 = vmatprep.subr.bf16.mxu0 %v5539_v0 }
 0x6e4   :  { %v1001_v51 = vpop.f32.mrb[32].mxu1  ;;  %5018 = vmatpush3.bf16.msra.mxu0 %v5414_v50 }
 0x6e5   :  { %v5013_v53 = vpop.f32.mrb[33].mxu1  ;;  %5031 = vmatprep.subr.bf16.mxu0 %v5539_v0 }
 0x6e6   :  { %v1004_v54 = vpop.f32.mrb[34].mxu1 }
 0x6e7   :  { %v5014_v55 = vpop.f32.mrb[35].mxu1  ;;  %5020 = vmatmul.mubr.msk.bf16.vlgmr.msra.gmra.mrb[28].mxu0 %vm104_vm1, %v5689_v13 }
 0x6e8   :  { %5032 = vmatpush3.bf16.msra.mxu0 %v5415_v52  ;;  %5035 = vmatprep.mubr.msk.bf16.mxu0 %vm5540_vm0, %v5539_v0 }
 0x6e9   :  { %5033 = vmatprep.subr.bf16.mxu0 %v5539_v0 }
 0x6ec   :  { %v1133_v58 = vpop.f32.mrb[36].mxu1  ;;  %5034 = vmatpush3.bf16.msra.mxu0 %v5416_v56 }
 0x6ed   :  { %v1134_v59 = vadd.f32 %v4499_v57, %v1133_v58  ;;  %v5029_v60 = vpop.f32.mrb[37].mxu1  ;;  %5045 = vmatprep.subr.bf16.mxu0 %v5539_v0 }
 0x6ee   :  { %v1136_v61 = vpop.f32.mrb[38].mxu1 }
 0x6ef   :  { %v1208_v62 = vpack.c.bf16 %v1134_v59, %v1134_v59  ;;  %v1137_v63 = vadd.f32 %v4499_v57, %v1136_v61  ;;  %v5030_v1 = vpop.f32.mrb[39].mxu1  ;;  %5036 = vmatmul.mubr.msk.bf16.vlgmr.msra.gmra.mrb[32].mxu0 %vm104_vm1, %v5689_v13  ;;  %v4516_v59 = vld [vmem:[%s6495_s9 + $0x8] sm:$0xf] }
 0x6f0   :  { %5047 = vmatprep.mubr.msk.bf16.mxu0 %vm5540_vm0, %v5539_v0  ;;  %v1429_v1 = vsel %vm405_vm3, %v4516_v59, 0 }
 0x6f1   :  { %v1214_v2 = vsel %vm281_vm2, %v1208_v62, 0  ;;  %v1209_v3 = vpack.c.bf16 %v1137_v63, %v1137_v63 }
 0x6f2   :  { %5040 = vmatpush3.bf16.xpose.msra.mxu1 %v1214_v2 }
 0x6f3   :  { %v1260_v4 = vsel %vm281_vm2, %v1209_v3, 0  ;;  %5051 = vmatprep.subr.bf16.mxu1 %v5539_v0  ;;  %v5419_v3 = vld [vmem:[%s6519_s26 + $0x30] sm:$0xff]  }
 0x6f5   :  { %5046 = vmatpush3.bf16.xpose.msra.mxu0 %v1260_v4  ;;  %v5420_v4 = vld [vmem:[%s6519_s26 + $0x38] sm:$0xff]  }
 0x6f6   :  { %5057 = vmatprep.subr.bf16.mxu0 %v5539_v0 }
 0x7b2   :  { %v954_v5 = vpop.f32.mrb[24].mxu0 }
 0x7b3   :  { %v5887_v6 = vadd.f32 %v1001_v51, %v954_v5  ;;  %v5007_v7 = vpop.f32.mrb[25].mxu0 }
 0x7b4   :  { %v957_v8 = vpop.f32.mrb[26].mxu0 }
 0x7b5   :  { %v5889_v9 = vadd.f32 %v1004_v54, %v957_v8  ;;  %v5008_v12 = vpop.f32.mrb[27].mxu0 }
 0x7ba   :  { %v1067_v15 = vpop.f32.mrb[28].mxu0 }
 0x7bb   :  { %v1068_v16 = vadd.f32 %v4490_v14, %v1067_v15  ;;  %v5021_v17 = vpop.f32.mrb[29].mxu0 }
 0x7bc   :  { %v1070_v18 = vpop.f32.mrb[30].mxu0 }
 0x7bd   :  { %v1206_v19 = vpack.c.bf16 %v1068_v16, %v1068_v16  ;;  %v1071_v20 = vadd.f32 %v4490_v14, %v1070_v18  ;;  %v5022_v21 = vpop.f32.mrb[31].mxu0  ;;  %v5417_v14 = vld [vmem:[%s6523_s29 + $0x30] sm:$0xff]  }
 0x7be   :  { %v5421_v21 = vld [vmem:[%s6524_s22 + $0x30] sm:$0xff]  }
 0x7bf   :  { %v1207_v22 = vpack.c.bf16 %v1071_v20, %v1071_v20  ;;  %5042 = vmatmul.mubr.msk.bf16.vlgmr.msra.gmra.mrb[40].mxu1 %vm281_vm2, %v1206_v19  ;;  %v5418_v20 = vld [vmem:[%s6523_s29 + $0x38] sm:$0xff]  }
 0x7c0   :  { %5053 = vmatprep.mubr.msk.bf16.mxu1 %vm5540_vm0, %v5539_v0 }
 0x7c1   :  { %5048 = vmatmul.mubr.msk.bf16.vlgmr.msra.gmra.mrb[36].mxu0 %vm281_vm2, %v1207_v22  ;;  %v5422_v22 = vld [vmem:[%s6524_s22 + $0x38] sm:$0xff]  }
 0x7c2   :  { %v1199_v25 = vpop.f32.mrb[32].mxu0  ;;  %5059 = vmatprep.mubr.msk.bf16.mxu0 %vm5540_vm0, %v5539_v0 }
 0x7c3   :  { %v1200_v26 = vadd.f32 %v4508_v23, %v1199_v25  ;;  %v5037_v27 = vpop.f32.mrb[33].mxu0 }
 0x7c4   :  { %v1202_v30 = vpop.f32.mrb[34].mxu0 }
 0x7c5   :  { %v1328_v31 = vpack.c.bf16 %v1200_v26, %v1200_v26  ;;  %v1203_v32 = vadd.f32 %v4508_v23, %v1202_v30  ;;  %v5038_v33 = vpop.f32.mrb[35].mxu0 }
 0x7c7   :  { %v1334_v34 = vsel %vm405_vm3, %v1328_v31, 0  ;;  %v1329_v35 = vpack.c.bf16 %v1203_v32, %v1203_v32 }
 0x7c8   :  { %5052 = vmatpush3.bf16.msra.mxu1 %v1334_v34 }
 0x7c9   :  { %v1380_v36 = vsel %vm405_vm3, %v1329_v35, 0  ;;  %5063 = vmatprep.subr.bf16.mxu1 %v5539_v0 }
 0x7ca   :  { %5058 = vmatpush3.bf16.msra.mxu0 %v1380_v36 }
 0x7cb   :  { %5069 = vmatprep.subr.bf16.mxu0 %v5539_v0 }
 0x892   :  { %v1250_v37 = vpop.f32.mrb[40].mxu1 }
 0x893   :  { %v1302_v38 = vmul.f32 0.35355338, %v1250_v37  ;;  %v5043_v39 = vpop.f32.mrb[41].mxu1 }
 0x894   :  { %v1253_v40 = vpop.f32.mrb[42].mxu1  ;;  %v1296_v41 = vpop.f32.mrb[36].mxu0 }
 0x895   :  { %v1303_v42 = vmul.f32 0.35355338, %v1296_v41  ;;  %v5044_v24 = vpop.f32.mrb[43].mxu1  ;;  %v5049_v28 = vpop.f32.mrb[37].mxu0  ;;  %v1304_v29 = vsel %vm281_vm2, %v1302_v38, -inf }
 0x896   :  { %v1299_v43 = vpop.f32.mrb[38].mxu0  ;;  %1305 = vmax.xlane.f32.xlu0 %v1304_v29  ;;  %v4523_v40 = vld [vmem:[%s6493_s6 + $0x3] ss:$0 sm:$0xff] }
 0x897   :  { %v5050_v44 = vpop.f32.mrb[39].mxu0  ;;  %v1307_v45 = vsel %vm281_vm2, %v1303_v42, -inf }
 0x898   :  { %1308 = vmax.xlane.f32.xlu1 %v1307_v45 }
 0x923   :  { %v1306_v46 = vpop.xlane.xlu0 %1305 }
 0x924   :  { %v1310_v47 = vsub.f32 %v1302_v38, %v1306_v46  ;;  %v4541_v46 = vld [vmem:[%s6494_s8 + $0x3] ss:$0 sm:$0xff] }
 0x925   :  { %v1309_v48 = vpop.xlane.xlu1 %1308 }
 0x926   :  { %v1312_v49 = vmul.f32 1.442695, %v1310_v47  ;;  %v1311_v50 = vsub.f32 %v1303_v42, %v1309_v48 }
 0x928   :  { %5475 = vpow2.f32 %v1312_v49  ;;  %v1314_v51 = vmul.f32 1.442695, %v1311_v50 }
 0x92a   :  { %5477 = vpow2.f32 %v1314_v51 }
 0x932   :  { %v5476_v52 = vpop.eup %5475 }
 0x933   :  { %v1316_v53 = vsel %vm281_vm2, %v5476_v52, 0.0 }
 0x934   :  { %v5478_v54 = vpop.eup %5477  ;;  %1317 = vadd.xlane.f32.xlu0 %v1316_v53 }
 0x935   :  { %v1319_v55 = vsel %vm281_vm2, %v5478_v54, 0.0 }
 0x936   :  { %1320 = vadd.xlane.f32.xlu1 %v1319_v55 }
 0x9c1   :  { %v1318_v56 = vpop.xlane.xlu0 %1317 }
 0x9c2   :  { %5479 = vrcp.f32 %v1318_v56 }
 0x9c3   :  { %v1321_v57 = vpop.xlane.xlu1 %1320 }
 0x9c4   :  { %5481 = vrcp.f32 %v1321_v57 }
 0x9cc   :  { %v5480_v58 = vpop.eup %5479 }
 0x9cd   :  { %v1324_v60 = vmul.f32 %v5480_v58, %v5476_v52 }
 0x9ce   :  { %v5482_v61 = vpop.eup %5481 }
 0x9cf   :  { %v1325_v62 = vmul.f32 %v5482_v61, %v5478_v54  ;;  %v1326_v63 = vpack.c.bf16 %v1324_v60, %v1324_v60 }
 0x9d1   :  { %5054 = vmatmul.mubr.msk.bf16.vlgmr.msra.gmra.mrb[44].mxu1 %vm281_vm2, %v1326_v63  ;;  %v1327_v2 = vpack.c.bf16 %v1325_v62, %v1325_v62 }
 0x9d2   :  { %5064 = vmatpush3.bf16.msra.mxu1 %v1429_v1  ;;  %5065 = vmatprep.mubr.msk.bf16.mxu1 %vm5540_vm0, %v5539_v0 }
 0x9d3   :  { %5060 = vmatmul.mubr.msk.bf16.vlgmr.msra.gmra.mrb[40].mxu0 %vm281_vm2, %v1327_v2  ;;  %5077 = vmatprep.subr.bf16.mxu1 %v5539_v0 }
 0x9d4   :  { %5073 = vmatprep.mubr.msk.bf16.mxu0 %vm5540_vm0, %v5539_v0  ;;  %5070 = vmatpush3.bf16.msra.mxu0 %v5419_v3 }
 0x9d5   :  { %5071 = vmatprep.subr.bf16.mxu0 %v5539_v0 }
 0x9d8   :  { %5072 = vmatpush3.bf16.msra.mxu0 %v5420_v4 }
 0x9d9   :  { %5085 = vmatprep.subr.bf16.mxu0 %v5539_v0 }
 0x9db   :  { %5074 = vmatmul.mubr.msk.bf16.vlgmr.msra.gmra.mrb[44].mxu0 %vm104_vm1, %v5689_v13 }
 0x9dc   :  { %5089 = vmatprep.mubr.msk.bf16.mxu0 %vm5540_vm0, %v5539_v0  ;;  %5086 = vmatpush3.bf16.msra.mxu0 %v5421_v21 }
 0x9dd   :  { %5087 = vmatprep.subr.bf16.mxu0 %v5539_v0 }
 0x9e0   :  { %5088 = vmatpush3.bf16.msra.mxu0 %v5422_v22 }
 0x9e1   :  { %5099 = vmatprep.subr.bf16.mxu0 %v5539_v0 }
 0x9e3   :  { %5090 = vmatmul.mubr.msk.bf16.vlgmr.msra.gmra.mrb[48].mxu0 %vm104_vm1, %v5689_v13 }
 0x9e4   :  { %5101 = vmatprep.mubr.msk.bf16.mxu0 %vm5540_vm0, %v5539_v0 }
 0xaa4   :  { %v1370_v5 = vpop.f32.mrb[44].mxu1 }
 0xaa5   :  { %v5055_v7 = vpop.f32.mrb[45].mxu1 }
 0xaa6   :  { %v1373_v8 = vpop.f32.mrb[46].mxu1  ;;  %v1416_v12 = vpop.f32.mrb[40].mxu0 }
 0xaa7   :  { %v1422_v15 = vpack.c.bf16 %v1416_v12, %v1370_v5  ;;  %v5056_v16 = vpop.f32.mrb[47].mxu1  ;;  %v5061_v17 = vpop.f32.mrb[41].mxu0 }
 0xaa8   :  { %v1419_v18 = vpop.f32.mrb[42].mxu0 }
 0xaa9   :  { %v5062_v19 = vpop.f32.mrb[43].mxu0  ;;  %5066 = vmatmul.mubr.msk.bf16.vlgmr.msra.gmra.mrb[48].mxu1 %vm281_vm2, %v1422_v15 }
 0xaaa   :  { %5078 = vmatpush3.bf16.msra.mxu1 %v5417_v14  ;;  %5081 = vmatprep.mubr.msk.bf16.mxu1 %vm5540_vm0, %v5539_v0 }
 0xaab   :  { %5079 = vmatprep.subr.bf16.mxu1 %v5539_v0 }
 0xaae   :  { %5080 = vmatpush3.bf16.msra.mxu1 %v5418_v20  ;;  %v1533_v23 = vpop.f32.mrb[44].mxu0 }
 0xaaf   :  { %5093 = vmatprep.subr.bf16.mxu1 %v5539_v0  ;;  %v5075_v25 = vpop.f32.mrb[45].mxu0  ;;  %v1534_v28 = vadd.f32 %v4523_v40, %v1533_v23 }
 0xab0   :  { %v1536_v26 = vpop.f32.mrb[46].mxu0  ;;  %v4549_v25 = vld [vmem:[%s6495_s9 + $0xc] sm:$0xf] }
 0xab1   :  { %5082 = vmatmul.mubr.msk.bf16.vlgmr.msra.gmra.mrb[52].mxu1 %vm104_vm1, %v5689_v13  ;;  %v5076_v27 = vpop.f32.mrb[47].mxu0  ;;  %v4532_v13 = vld [vmem:[%s6492_s7 + $0x3] ss:$0 sm:$0xff]  ;;  %v1672_v43 = vpack.c.bf16 %v1534_v28, %v1534_v28  ;;  %v1537_v44 = vadd.f32 %v4523_v40, %v1536_v26 }
 0xab2   :  { %5095 = vmatprep.mubr.msk.bf16.mxu1 %vm5540_vm0, %v5539_v0 }
 0xab3   :  { %v1673_v45 = vpack.c.bf16 %v1537_v44, %v1537_v44 }
 0xab6   :  { %v1665_v47 = vpop.f32.mrb[48].mxu0 }
 0xab7   :  { %v1666_v48 = vadd.f32 %v4541_v46, %v1665_v47  ;;  %v5091_v49 = vpop.f32.mrb[49].mxu0 }
 0xab8   :  { %v1668_v50 = vpop.f32.mrb[50].mxu0 }
 0xab9   :  { %v1794_v51 = vpack.c.bf16 %v1666_v48, %v1666_v48  ;;  %v1669_v52 = vadd.f32 %v4541_v46, %v1668_v50  ;;  %v5092_v53 = vpop.f32.mrb[51].mxu0 }
 0xabb   :  { %v1800_v54 = vsel %vm405_vm3, %v1794_v51, 0  ;;  %v1795_v55 = vpack.c.bf16 %v1669_v52, %v1669_v52 }
 0xabd   :  { %v1846_v56 = vsel %vm405_vm3, %v1795_v55, 0 }
 0xb7c   :  { %v1465_v30 = vpop.f32.mrb[48].mxu1 }
 0xb7d   :  { %v5962_v31 = vadd.f32 %v1465_v30, %v5887_v6  ;;  %v5067_v32 = vpop.f32.mrb[49].mxu1 }
 0xb7e   :  { %v1468_v33 = vpop.f32.mrb[50].mxu1 }
 0xb7f   :  { %v5965_v34 = vadd.f32 %v1468_v33, %v5889_v9  ;;  %v5068_v35 = vpop.f32.mrb[51].mxu1  ;;  %v1895_v33 = vsel %vm405_vm3, %v4549_v25, 0 }
 0xb84   :  { %v1599_v36 = vpop.f32.mrb[52].mxu1 }
 0xb85   :  { %v1600_v37 = vadd.f32 %v4532_v13, %v1599_v36  ;;  %v5083_v38 = vpop.f32.mrb[53].mxu1 }
 0xb86   :  { %v1602_v39 = vpop.f32.mrb[54].mxu1 }
 0xb87   :  { %v1674_v6 = vpack.c.bf16 %v1600_v37, %v1600_v37  ;;  %v1603_v41 = vadd.f32 %v4532_v13, %v1602_v39  ;;  %v5084_v42 = vpop.f32.mrb[55].mxu1 }
 0xb89   :  { %v1680_v24 = vsel %vm281_vm2, %v1674_v6, 0  ;;  %v1675_v9 = vpack.c.bf16 %v1603_v41, %v1603_v41 }
 0xb8a   :  { %5094 = vmatpush3.bf16.xpose.msra.mxu1 %v1680_v24 }
 0xb8b   :  { %v1726_v29 = vsel %vm281_vm2, %v1675_v9, 0  ;;  %5105 = vmatprep.subr.bf16.mxu1 %v5539_v0  ;;  %v4551_v9 = vld [vmem:[%s6496_s10] ss:$0 sm:$0xff] }
 0xb8c   :  { %5100 = vmatpush3.bf16.xpose.msra.mxu0 %v1726_v29 }
 0xb8d   :  { %5111 = vmatprep.subr.bf16.mxu0 %v5539_v0 }
 0xb91   :  { %5096 = vmatmul.mubr.msk.bf16.vlgmr.msra.gmra.mrb[56].mxu1 %vm281_vm2, %v1672_v43 }
 0xb92   :  { %5107 = vmatprep.mubr.msk.bf16.mxu1 %vm5540_vm0, %v5539_v0  ;;  %5106 = vmatpush3.bf16.msra.mxu1 %v1800_v54 }
 0xb93   :  { %5102 = vmatmul.mubr.msk.bf16.vlgmr.msra.gmra.mrb[52].mxu0 %vm281_vm2, %v1673_v45  ;;  %5117 = vmatprep.subr.bf16.mxu1 %v5539_v0 }
 0xb94   :  { %5113 = vmatprep.mubr.msk.bf16.mxu0 %vm5540_vm0, %v5539_v0  ;;  %5112 = vmatpush3.bf16.msra.mxu0 %v1846_v56 }
 0xb95   :  { %5123 = vmatprep.subr.bf16.mxu0 %v5539_v0 }
 0xc64   :  { %v1716_v57 = vpop.f32.mrb[56].mxu1 }
 0xc65   :  { %v1768_v58 = vmul.f32 0.35355338, %v1716_v57  ;;  %v5097_v59 = vpop.f32.mrb[57].mxu1 }
 0xc66   :  { %v1719_v60 = vpop.f32.mrb[58].mxu1  ;;  %v1762_v61 = vpop.f32.mrb[52].mxu0  ;;  %v5424_v59 = vld [vmem:[%s6497_s13 + $0x8] sm:$0xff]  }
 0xc67   :  { %v1769_v62 = vmul.f32 0.35355338, %v1762_v61  ;;  %v5098_v63 = vpop.f32.mrb[59].mxu1  ;;  %v5103_v1 = vpop.f32.mrb[53].mxu0  ;;  %v1770_v2 = vsel %vm281_vm2, %v1768_v58, -inf  ;;  %v5425_v60 = vld [vmem:[%s6498_s15] sm:$0xff]  }
 0xc68   :  { %v1765_v3 = vpop.f32.mrb[54].mxu0  ;;  %1771 = vmax.xlane.f32.xlu0 %v1770_v2  ;;  %v5426_v61 = vld [vmem:[%s6498_s15 + $0x8] sm:$0xff]  }
 0xc69   :  { %v5104_v4 = vpop.f32.mrb[55].mxu0  ;;  %v1773_v5 = vsel %vm281_vm2, %v1769_v62, -inf }
 0xc6a   :  { %1774 = vmax.xlane.f32.xlu1 %v1773_v5 }
 0xcf5   :  { %v1772_v7 = vpop.xlane.xlu0 %1771 }
 0xcf6   :  { %v1776_v8 = vsub.f32 %v1768_v58, %v1772_v7  ;;  %v4552_v7 = vld [vmem:[%s6499_s11] ss:$0 sm:$0xff] }
 0xcf7   :  { %v1775_v12 = vpop.xlane.xlu1 %1774 }
 0xcf8   :  { %v1778_v14 = vmul.f32 1.442695, %v1776_v8  ;;  %v1777_v15 = vsub.f32 %v1769_v62, %v1775_v12 }
 0xcfa   :  { %5483 = vpow2.f32 %v1778_v14  ;;  %v1780_v16 = vmul.f32 1.442695, %v1777_v15 }
 0xcfc   :  { %5485 = vpow2.f32 %v1780_v16  ;;  %v4553_v16 = vld [vmem:[%s6500_s12] ss:$0 sm:$0xff] }
 0xd04   :  { %v5484_v17 = vpop.eup %5483 }
 0xd05   :  { %v1782_v18 = vsel %vm281_vm2, %v5484_v17, 0.0 }
 0xd06   :  { %v5486_v19 = vpop.eup %5485  ;;  %1783 = vadd.xlane.f32.xlu0 %v1782_v18 }
 0xd07   :  { %v1785_v20 = vsel %vm281_vm2, %v5486_v19, 0.0 }
 0xd08   :  { %1786 = vadd.xlane.f32.xlu1 %v1785_v20 }
 0xd93   :  { %v1784_v21 = vpop.xlane.xlu0 %1783 }
 0xd94   :  { %5487 = vrcp.f32 %v1784_v21  ;;  %v5427_v21 = vld [vmem:[%s6498_s15 + $0x10] sm:$0xff]  }
 0xd95   :  { %v1787_v22 = vpop.xlane.xlu1 %1786 }
 0xd96   :  { %5489 = vrcp.f32 %v1787_v22  ;;  %v5428_v22 = vld [vmem:[%s6498_s15 + $0x18] sm:$0xff]  }
 0xd9e   :  { %v5488_v23 = vpop.eup %5487 }
 0xd9f   :  { %v1790_v26 = vmul.f32 %v5488_v23, %v5484_v17  ;;  %v4554_v23 = vld [vmem:[%s6501_s14] ss:$0 sm:$0xff] }
 0xda0   :  { %v5490_v27 = vpop.eup %5489 }
 0xda1   :  { %v1791_v30 = vmul.f32 %v5490_v27, %v5486_v19  ;;  %v1792_v32 = vpack.c.bf16 %v1790_v26, %v1790_v26 }
 0xda3   :  { %5108 = vmatmul.mubr.msk.bf16.vlgmr.msra.gmra.mrb[60].mxu1 %vm281_vm2, %v1792_v32  ;;  %v1793_v35 = vpack.c.bf16 %v1791_v30, %v1791_v30 }
 0xda4   :  { %5118 = vmatpush3.bf16.msra.mxu1 %v1895_v33  ;;  %5119 = vmatprep.mubr.msk.bf16.mxu1 %vm5540_vm0, %v5539_v0 }
 0xda5   :  { %5114 = vmatmul.mubr.msk.bf16.vlgmr.msra.gmra.mrb[56].mxu0 %vm281_vm2, %v1793_v35  ;;  %5131 = vmatprep.subr.bf16.mxu1 %v5539_v0 }
 0xda6   :  { %5127 = vmatprep.mubr.msk.bf16.mxu0 %vm5540_vm0, %v5539_v0 }
 0xe76   :  { %v1836_v13 = vpop.f32.mrb[60].mxu1 }
 0xe77   :  { %v5109_v36 = vpop.f32.mrb[61].mxu1 }
 0xe78   :  { %v1839_v37 = vpop.f32.mrb[62].mxu1  ;;  %v1882_v38 = vpop.f32.mrb[56].mxu0 }
 0xe79   :  { %v1888_v39 = vpack.c.bf16 %v1882_v38, %v1836_v13  ;;  %v5110_v40 = vpop.f32.mrb[63].mxu1  ;;  %v5115_v6 = vpop.f32.mrb[57].mxu0  ;;  %v4558_v37 = vld [vmem:[%s6502_s16] ss:$0 sm:$0xff] }
 0xe7a   :  { %v1885_v41 = vpop.f32.mrb[58].mxu0 }
 0xe7b   :  { %v5116_v42 = vpop.f32.mrb[59].mxu0  ;;  %5120 = vmatmul.mubr.msk.bf16.vlgmr.msra.gmra.mrb[64].mxu1 %vm281_vm2, %v1888_v39 }
 0xe7c   :  { %5139 = vmatprep.mubr.msk.bf16.mxu1 %vm5540_vm0, %v5539_v0  ;;  %5132 = vmatpush3.bf16.msra.mxu1 %v5425_v60  ;;  %v4564_v60 = vld [vmem:[%s6503_s17] ss:$0 sm:$0xff] }
 0xe7d   :  { %5133 = vmatprep.subr.bf16.mxu1 %v5539_v0 }
 0xe80   :  { %5134 = vmatpush3.bf16.msra.mxu1 %v5426_v61 }
 0xe81   :  { %5135 = vmatprep.subr.bf16.mxu1 %v5539_v0 }
 0xe84   :  { %5136 = vmatpush3.bf16.msra.mxu1 %v5427_v21 }
 0xe85   :  { %5137 = vmatprep.subr.bf16.mxu1 %v5539_v0 }
 0xe88   :  { %5138 = vmatpush3.bf16.msra.mxu1 %v5428_v22  ;;  %v4580_v22 = vld [vmem:[%s6492_s7 + $0x4] ss:$0 sm:$0xff] }
 0xe89   :  { %5159 = vmatprep.subr.bf16.mxu1 %v5539_v0 }
 0xf4e   :  { %v1931_v24 = vpop.f32.mrb[64].mxu1 }
 0xf4f   :  { %v1938_v28 = vadd.f32 %v1931_v24, %v5962_v31  ;;  %v5121_v29 = vpop.f32.mrb[65].mxu1 }
 0xf50   :  { %v1934_v43 = vpop.f32.mrb[66].mxu1 }
 0xf51   :  { %v1947_v44 = vadd.f32 %v4551_v9, %v1938_v28  ;;  %v1939_v45 = vadd.f32 %v1934_v43, %v5965_v34  ;;  %v5122_v46 = vpop.f32.mrb[67].mxu1 }
 0xf53   :  { %v1948_v47 = vadd.f32 %v4551_v9, %v1939_v45  ;;  %v1949_v48 = vadd.f32 %v1947_v44, %v5680_v10 }
 0xf55   :  { %v1951_v49 = vsel %vm104_vm1, %v1949_v48, 0.0  ;;  %v1950_v50 = vadd.f32 %v1948_v47, %v5682_v11  ;;  %v5423_v11 = vld [vmem:[%s6497_s13] sm:$0xff]  }
 0xf56   :  { %1952 = vadd.xlane.f32.xlu0 %v1951_v49  ;;  %5124 = vmatpush3.bf16.msra.mxu0 %v5423_v11 }
 0xf57   :  { %v1954_v51 = vsel %vm104_vm1, %v1950_v50, 0.0  ;;  %5125 = vmatprep.subr.bf16.mxu0 %v5539_v0 }
 0xf58   :  { %1955 = vadd.xlane.f32.xlu1 %v1954_v51 }
 0xf5a   :  { %5126 = vmatpush3.bf16.msra.mxu0 %v5424_v59 }
 0xf5b   :  { %5143 = vmatprep.subr.bf16.mxu0 %v5539_v0 }
 0xfe3   :  { %v1953_v52 = vpop.xlane.xlu0 %1952 }
 0xfe4   :  { %v1958_v53 = vmul.f32 0.03125, %v1953_v52 }
 0xfe5   :  { %v1956_v31 = vpop.xlane.xlu1 %1955 }
 0xfe6   :  { %v1960_v54 = vsub.f32 %v1949_v48, %v1958_v53  ;;  %v1959_v55 = vmul.f32 0.03125, %v1956_v31  ;;  %v5429_v53 = vld [vmem:[%s6519_s26 + $0x40] sm:$0xff]  }
 0xfe7   :  { %v5430_v31 = vld [vmem:[%s6524_s22 + $0x40] sm:$0xff]  }
 0xfe8   :  { %v1961_v56 = vsub.f32 %v1950_v50, %v1959_v55  ;;  %v1962_v57 = vmul.f32 %v1960_v54, %v1960_v54  ;;  %v5432_v55 = vld [vmem:[%s6524_s22 + $0x48] sm:$0xff]  }
 0xfea   :  { %v1964_v34 = vsel %vm104_vm1, %v1962_v57, 0.0  ;;  %v1963_v58 = vmul.f32 %v1961_v56, %v1961_v56 }
 0xfeb   :  { %1965 = vadd.xlane.f32.xlu0 %v1964_v34 }
 0xfec   :  { %v1967_v10 = vsel %vm104_vm1, %v1963_v58, 0.0 }
 0xfed   :  { %1968 = vadd.xlane.f32.xlu1 %v1967_v10 }
0x1078   :  { %v1966_v62 = vpop.xlane.xlu0 %1965 }
0x1079   :  { %v1970_v63 = vmul.f32 0.03125, %v1966_v62 }
0x107a   :  { %v1969_v1 = vpop.xlane.xlu1 %1968 }
0x107b   :  { %v1972_v2 = vadd.f32 1e-05, %v1970_v63  ;;  %v1971_v3 = vmul.f32 0.03125, %v1969_v1 }
0x107d   :  { %5491 = vrsqrt.f32 %v1972_v2  ;;  %v1973_v4 = vadd.f32 1e-05, %v1971_v3  ;;  %v4565_v2 = vld [vmem:[%s6504_s18] ss:$0 sm:$0xff] }
0x107f   :  { %5493 = vrsqrt.f32 %v1973_v4 }
0x1087   :  { %v5492_v5 = vpop.eup %5491 }
0x1088   :  { %v1976_v8 = vmul.f32 %v5492_v5, %v1960_v54  ;;  %v5431_v54 = vld [vmem:[%s6519_s26 + $0x48] sm:$0xff]  }
0x1089   :  { %v5494_v12 = vpop.eup %5493 }
0x108a   :  { %v1985_v14 = vmul.f32 %v4552_v7, %v1976_v8  ;;  %v1977_v15 = vmul.f32 %v5494_v12, %v1961_v56  ;;  %v5434_v12 = vld [vmem:[%s6523_s29 + $0x48] sm:$0xff]  }
0x108c   :  { %v1986_v17 = vmul.f32 %v4552_v7, %v1977_v15  ;;  %v1994_v18 = vadd.f32 %v4553_v16, %v1985_v14  ;;  %v5433_v7 = vld [vmem:[%s6523_s29 + $0x40] sm:$0xff]  }
0x108e   :  { %v1995_v19 = vadd.f32 %v4553_v16, %v1986_v17 }
0x1090   :  { %v1996_v20 = vpack.c.bf16 %v1995_v19, %v1994_v18 }
0x1092   :  { %5128 = vmatmul.mubr.msk.bf16.vlgmr.msra.gmra.mrb[60].mxu0 %vm104_vm1, %v1996_v20 }
0x1093   :  { %5147 = vmatprep.mubr.msk.bf16.mxu0 %vm5540_vm0, %v5539_v0  ;;  %5144 = vmatpush3.bf16.msra.mxu0 %v5429_v53 }
0x1094   :  { %5145 = vmatprep.subr.bf16.mxu0 %v5539_v0 }
0x1097   :  { %5146 = vmatpush3.bf16.msra.mxu0 %v5431_v54 }
0x1098   :  { %5151 = vmatprep.subr.bf16.mxu0 %v5539_v0 }
0x1165   :  { %v2057_v25 = vpop.f32.mrb[60].mxu0 }
0x1166   :  { %v2058_v26 = vadd.f32 %v4554_v23, %v2057_v25  ;;  %v5129_v27 = vpop.f32.mrb[61].mxu0 }
0x1167   :  { %v2060_v30 = vpop.f32.mrb[62].mxu0  ;;  %v4589_v27 = vld [vmem:[%s6494_s8 + $0x4] ss:$0 sm:$0xff] }
0x1168   :  { %v2061_v32 = vadd.f32 %v4554_v23, %v2060_v30  ;;  %v5130_v33 = vpop.f32.mrb[63].mxu0  ;;  %v2064_v35 = vmax.f32 %v2058_v26, 0.0 }
0x116a   :  { %v2065_v13 = vmax.f32 %v2061_v32, 0.0 }
0x116c   :  { %v2066_v36 = vpack.c.bf16 %v2065_v13, %v2064_v35  ;;  %v4571_v13 = vld [vmem:[%s6493_s6 + $0x4] ss:$0 sm:$0xff] }
0x116e   :  { %5140 = vmatmul.mubr.msk.bf16.vlgmr.msra.gmra.mrb[68].mxu1 %vm2106_vm4, %v2066_v36 }
0x116f   :  { %5163 = vmatprep.mubr.msk.bf16.mxu1 %vm5540_vm0, %v5539_v0  ;;  %5160 = vmatpush3.bf16.msra.mxu1 %v5430_v31 }
0x1170   :  { %5161 = vmatprep.subr.bf16.mxu1 %v5539_v0 }
0x1173   :  { %5162 = vmatpush3.bf16.msra.mxu1 %v5432_v55 }
0x1174   :  { %5173 = vmatprep.subr.bf16.mxu1 %v5539_v0 }
0x1241   :  { %v2144_v38 = vpop.f32.mrb[68].mxu1 }
0x1242   :  { %v2145_v39 = vadd.f32 %v4558_v37, %v2144_v38  ;;  %v5141_v40 = vpop.f32.mrb[69].mxu1 }
0x1243   :  { %v2147_v6 = vpop.f32.mrb[70].mxu1 }
0x1244   :  { %v2148_v41 = vadd.f32 %v4558_v37, %v2147_v6  ;;  %v5142_v42 = vpop.f32.mrb[71].mxu1  ;;  %v2151_v24 = vadd.f32 %v2145_v39, %v1994_v18 }
0x1246   :  { %v2153_v9 = vsel %vm104_vm1, %v2151_v24, 0.0  ;;  %v2152_v28 = vadd.f32 %v2148_v41, %v1995_v19 }
0x1247   :  { %2154 = vadd.xlane.f32.xlu0 %v2153_v9 }
0x1248   :  { %v2156_v29 = vsel %vm104_vm1, %v2152_v28, 0.0 }
0x1249   :  { %2157 = vadd.xlane.f32.xlu1 %v2156_v29 }
0x12d4   :  { %v2155_v43 = vpop.xlane.xlu0 %2154 }
0x12d5   :  { %v2159_v44 = vmul.f32 0.03125, %v2155_v43 }
0x12d6   :  { %v2158_v45 = vpop.xlane.xlu1 %2157 }
0x12d7   :  { %v2161_v46 = vsub.f32 %v2151_v24, %v2159_v44  ;;  %v2160_v47 = vmul.f32 0.03125, %v2158_v45 }
0x12d9   :  { %v2162_v48 = vsub.f32 %v2152_v28, %v2160_v47  ;;  %v2163_v49 = vmul.f32 %v2161_v46, %v2161_v46 }
0x12db   :  { %v2165_v50 = vsel %vm104_vm1, %v2163_v49, 0.0  ;;  %v2164_v51 = vmul.f32 %v2162_v48, %v2162_v48 }
0x12dc   :  { %2166 = vadd.xlane.f32.xlu0 %v2165_v50 }
0x12dd   :  { %v2168_v52 = vsel %vm104_vm1, %v2164_v51, 0.0 }
0x12de   :  { %2169 = vadd.xlane.f32.xlu1 %v2168_v52 }
0x1369   :  { %v2167_v56 = vpop.xlane.xlu0 %2166 }
0x136a   :  { %v2171_v57 = vmul.f32 0.03125, %v2167_v56 }
0x136b   :  { %v2170_v34 = vpop.xlane.xlu1 %2169 }
0x136c   :  { %v2173_v58 = vadd.f32 1e-05, %v2171_v57  ;;  %v2172_v10 = vmul.f32 0.03125, %v2170_v34 }
0x136e   :  { %5495 = vrsqrt.f32 %v2173_v58  ;;  %v2174_v11 = vadd.f32 1e-05, %v2172_v10 }
0x1370   :  { %5497 = vrsqrt.f32 %v2174_v11 }
0x1378   :  { %v5496_v59 = vpop.eup %5495 }
0x1379   :  { %v2177_v61 = vmul.f32 %v5496_v59, %v2161_v46 }
0x137a   :  { %v5498_v62 = vpop.eup %5497 }
0x137b   :  { %v2186_v63 = vmul.f32 %v4564_v60, %v2177_v61  ;;  %v2178_v1 = vmul.f32 %v5498_v62, %v2162_v48 }
0x137d   :  { %v2187_v3 = vmul.f32 %v4564_v60, %v2178_v1  ;;  %v6087_v4 = vadd.f32 %v4565_v2, %v2186_v63 }
0x137f   :  { %v6089_v5 = vadd.f32 %v4565_v2, %v2187_v3 }
0x1381   :  { %v6096_v8 = vpack.c.bf16 %v6089_v5, %v6087_v4 }
0x1383   :  { %5148 = vmatmul.mubr.msk.bf16.vlgmr.msra.gmra.mrb[64].mxu0 %vm104_vm1, %v6096_v8  ;;  %5164 = vmatmul.mubr.msk.bf16.vlgmr.msra.gmra.mrb[72].mxu1 %vm104_vm1, %v6096_v8 }
0x1384   :  { %5152 = vmatpush3.bf16.msra.mxu0 %v5433_v7  ;;  %5155 = vmatprep.mubr.msk.bf16.mxu0 %vm5540_vm0, %v5539_v0  ;;  %v5435_v7 = vld [vmem:[%s6519_s26 + $0x50] sm:$0xff]  }
0x1385   :  { %5153 = vmatprep.subr.bf16.mxu0 %v5539_v0  ;;  %5175 = vmatprep.mubr.msk.bf16.mxu1 %vm5540_vm0, %v5539_v0 }
0x1388   :  { %5154 = vmatpush3.bf16.msra.mxu0 %v5434_v12 }
0x1389   :  { %5167 = vmatprep.subr.bf16.mxu0 %v5539_v0 }
0x138b   :  { %5156 = vmatmul.mubr.msk.bf16.vlgmr.msra.gmra.mrb[68].mxu0 %vm104_vm1, %v6096_v8 }
0x138c   :  { %5169 = vmatprep.mubr.msk.bf16.mxu0 %vm5540_vm0, %v5539_v0 }
0x1456   :  { %v2260_v14 = vpop.f32.mrb[64].mxu0  ;;  %v2392_v15 = vpop.f32.mrb[72].mxu1 }
0x1457   :  { %v5149_v16 = vpop.f32.mrb[65].mxu0  ;;  %v5165_v17 = vpop.f32.mrb[73].mxu1  ;;  %v2393_v36 = vadd.f32 %v4589_v27, %v2392_v15  ;;  %v2261_v39 = vadd.f32 %v4571_v13, %v2260_v14  ;;  %v5436_v15 = vld [vmem:[%s6523_s29 + $0x50] sm:$0xff]  }
0x1458   :  { %v2263_v18 = vpop.f32.mrb[66].mxu0  ;;  %v2395_v19 = vpop.f32.mrb[74].mxu1  ;;  %v5437_v17 = vld [vmem:[%s6519_s26 + $0x58] sm:$0xff]  }
0x1459   :  { %v5150_v20 = vpop.f32.mrb[67].mxu0  ;;  %v5166_v21 = vpop.f32.mrb[75].mxu1  ;;  %v2396_v40 = vadd.f32 %v4589_v27, %v2395_v19  ;;  %v2521_v41 = vpack.c.bf16 %v2393_v36, %v2393_v36  ;;  %v2264_v42 = vadd.f32 %v4571_v13, %v2263_v18  ;;  %v2399_v24 = vpack.c.bf16 %v2261_v39, %v2261_v39  ;;  %v5438_v18 = vld [vmem:[%s6523_s29 + $0x58] sm:$0xff]   ;;  %v5439_v19 = vld [vmem:[%s6524_s22 + $0x50] sm:$0xff]   ;;  %v4612_v13 = vld [vmem:[%s6492_s7 + $0x5] ss:$0 sm:$0xff] }
0x145a   :  { %v5440_v20 = vld [vmem:[%s6524_s22 + $0x58] sm:$0xff]  }
0x145b   :  { %v2522_v9 = vpack.c.bf16 %v2396_v40, %v2396_v40  ;;  %v2527_v28 = vsel %vm405_vm3, %v2521_v41, 0  ;;  %v2400_v29 = vpack.c.bf16 %v2264_v42, %v2264_v42 }
0x145d   :  { %v2573_v43 = vsel %vm405_vm3, %v2522_v9, 0 }
0x145e   :  { %v2326_v23 = vpop.f32.mrb[68].mxu0 }
0x145f   :  { %v2327_v25 = vadd.f32 %v4580_v22, %v2326_v23  ;;  %v5157_v26 = vpop.f32.mrb[69].mxu0 }
0x1460   :  { %v2329_v30 = vpop.f32.mrb[70].mxu0 }
0x1461   :  { %v2401_v32 = vpack.c.bf16 %v2327_v25, %v2327_v25  ;;  %v2330_v33 = vadd.f32 %v4580_v22, %v2329_v30  ;;  %v5158_v35 = vpop.f32.mrb[71].mxu0 }
0x1463   :  { %v2407_v37 = vsel %vm281_vm2, %v2401_v32, 0  ;;  %v2402_v38 = vpack.c.bf16 %v2330_v33, %v2330_v33 }
0x1464   :  { %5168 = vmatpush3.bf16.xpose.msra.mxu0 %v2407_v37 }
0x1465   :  { %v2453_v6 = vsel %vm281_vm2, %v2402_v38, 0  ;;  %5179 = vmatprep.subr.bf16.mxu0 %v5539_v0 }
0x1466   :  { %5174 = vmatpush3.bf16.xpose.msra.mxu1 %v2453_v6 }
0x1467   :  { %5185 = vmatprep.subr.bf16.mxu1 %v5539_v0 }
0x146b   :  { %5170 = vmatmul.mubr.msk.bf16.vlgmr.msra.gmra.mrb[72].mxu0 %vm281_vm2, %v2399_v24 }
0x146c   :  { %5180 = vmatpush3.bf16.msra.mxu0 %v2527_v28  ;;  %5181 = vmatprep.mubr.msk.bf16.mxu0 %vm5540_vm0, %v5539_v0  ;;  %v4603_v28 = vld [vmem:[%s6493_s6 + $0x5] ss:$0 sm:$0xff] }
0x146d   :  { %5176 = vmatmul.mubr.msk.bf16.vlgmr.msra.gmra.mrb[76].mxu1 %vm281_vm2, %v2400_v29  ;;  %5191 = vmatprep.subr.bf16.mxu0 %v5539_v0  ;;  %v4621_v29 = vld [vmem:[%s6494_s8 + $0x5] ss:$0 sm:$0xff] }
0x146e   :  { %5186 = vmatpush3.bf16.msra.mxu1 %v2573_v43  ;;  %5187 = vmatprep.mubr.msk.bf16.mxu1 %vm5540_vm0, %v5539_v0 }
0x146f   :  { %5199 = vmatprep.subr.bf16.mxu1 %v5539_v0 }
0x153e   :  { %v2443_v44 = vpop.f32.mrb[72].mxu0 }
0x153f   :  { %v2495_v45 = vmul.f32 0.35355338, %v2443_v44  ;;  %v5171_v46 = vpop.f32.mrb[73].mxu0 }
0x1540   :  { %v2446_v47 = vpop.f32.mrb[74].mxu0  ;;  %v2489_v48 = vpop.f32.mrb[76].mxu1 }
0x1541   :  { %v2496_v49 = vmul.f32 0.35355338, %v2489_v48  ;;  %v5172_v50 = vpop.f32.mrb[75].mxu0  ;;  %v5177_v51 = vpop.f32.mrb[77].mxu1  ;;  %v2497_v52 = vsel %vm281_vm2, %v2495_v45, -inf }
0x1542   :  { %2498 = vmax.xlane.f32.xlu1 %v2497_v52  ;;  %v2492_v53 = vpop.f32.mrb[78].mxu1 }
0x1543   :  { %v5178_v31 = vpop.f32.mrb[79].mxu1  ;;  %v2500_v54 = vsel %vm281_vm2, %v2496_v49, -inf }
0x1544   :  { %2501 = vmax.xlane.f32.xlu0 %v2500_v54 }
0x15cf   :  { %v2499_v55 = vpop.xlane.xlu1 %2498 }
0x15d0   :  { %v2503_v56 = vsub.f32 %v2495_v45, %v2499_v55 }
0x15d1   :  { %v2502_v57 = vpop.xlane.xlu0 %2501 }
0x15d2   :  { %v2505_v34 = vmul.f32 1.442695, %v2503_v56  ;;  %v2504_v58 = vsub.f32 %v2496_v49, %v2502_v57 }
0x15d4   :  { %5499 = vpow2.f32 %v2505_v34  ;;  %v2507_v10 = vmul.f32 1.442695, %v2504_v58 }
0x15d6   :  { %5501 = vpow2.f32 %v2507_v10 }
0x15de   :  { %v5500_v11 = vpop.eup %5499 }
0x15df   :  { %v2509_v59 = vsel %vm281_vm2, %v5500_v11, 0.0 }
0x15e0   :  { %v5502_v60 = vpop.eup %5501  ;;  %2510 = vadd.xlane.f32.xlu1 %v2509_v59 }
0x15e1   :  { %v2512_v61 = vsel %vm281_vm2, %v5502_v60, 0.0 }
0x15e2   :  { %2513 = vadd.xlane.f32.xlu0 %v2512_v61 }
0x166d   :  { %v2511_v62 = vpop.xlane.xlu1 %2510 }
0x166e   :  { %5503 = vrcp.f32 %v2511_v62 }
0x166f   :  { %v2514_v63 = vpop.xlane.xlu0 %2513 }
0x1670   :  { %5505 = vrcp.f32 %v2514_v63 }
0x1678   :  { %v5504_v1 = vpop.eup %5503 }
0x1679   :  { %v2517_v2 = vmul.f32 %v5504_v1, %v5500_v11 }
0x167a   :  { %v5506_v3 = vpop.eup %5505 }
0x167b   :  { %v2518_v12 = vmul.f32 %v5506_v3, %v5502_v60  ;;  %v2519_v14 = vpack.c.bf16 %v2517_v2, %v2517_v2 }
0x167d   :  { %5182 = vmatmul.mubr.msk.bf16.vlgmr.msra.gmra.mrb[76].mxu0 %vm281_vm2, %v2519_v14  ;;  %v2520_v16 = vpack.c.bf16 %v2518_v12, %v2518_v12 }
0x167e   :  { %5192 = vmatpush3.bf16.msra.mxu0 %v5435_v7  ;;  %5195 = vmatprep.mubr.msk.bf16.mxu0 %vm5540_vm0, %v5539_v0 }
0x167f   :  { %5188 = vmatmul.mubr.msk.bf16.vlgmr.msra.gmra.mrb[80].mxu1 %vm281_vm2, %v2520_v16  ;;  %5193 = vmatprep.subr.bf16.mxu0 %v5539_v0 }
0x1680   :  { %5200 = vmatpush3.bf16.msra.mxu1 %v5436_v15  ;;  %5203 = vmatprep.mubr.msk.bf16.mxu1 %vm5540_vm0, %v5539_v0 }
0x1681   :  { %5201 = vmatprep.subr.bf16.mxu1 %v5539_v0 }
0x1682   :  { %5194 = vmatpush3.bf16.msra.mxu0 %v5437_v17 }
0x1683   :  { %5207 = vmatprep.subr.bf16.mxu0 %v5539_v0 }
0x1684   :  { %5202 = vmatpush3.bf16.msra.mxu1 %v5438_v18 }
0x1685   :  { %5196 = vmatmul.mubr.msk.bf16.vlgmr.msra.gmra.mrb[80].mxu0 %vm104_vm1, %v6096_v8  ;;  %5215 = vmatprep.subr.bf16.mxu1 %v5539_v0 }
0x1686   :  { %5208 = vmatpush3.bf16.msra.mxu0 %v5439_v19  ;;  %5211 = vmatprep.mubr.msk.bf16.mxu0 %vm5540_vm0, %v5539_v0 }
0x1687   :  { %5204 = vmatmul.mubr.msk.bf16.vlgmr.msra.gmra.mrb[84].mxu1 %vm104_vm1, %v6096_v8  ;;  %5209 = vmatprep.subr.bf16.mxu0 %v5539_v0 }
0x1688   :  { %5217 = vmatprep.mubr.msk.bf16.mxu1 %vm5540_vm0, %v5539_v0 }
0x168a   :  { %5210 = vmatpush3.bf16.msra.mxu0 %v5440_v20 }
0x168b   :  { %5221 = vmatprep.subr.bf16.mxu0 %v5539_v0 }
0x168d   :  { %5212 = vmatmul.mubr.msk.bf16.vlgmr.msra.gmra.mrb[84].mxu0 %vm104_vm1, %v6096_v8 }
0x168e   :  { %5223 = vmatprep.mubr.msk.bf16.mxu0 %vm5540_vm0, %v5539_v0 }
0x1750   :  { %v6184_v21 = vpop.f32.mrb[76].mxu0 }
0x1751   :  { %v5183_v22 = vpop.f32.mrb[77].mxu0 }
0x1752   :  { %v2566_v23 = vpop.f32.mrb[78].mxu0  ;;  %v6186_v25 = vpop.f32.mrb[80].mxu1 }
0x1753   :  { %v2615_v26 = vpack.c.bf16 %v6186_v25, %v6184_v21  ;;  %v5184_v27 = vpop.f32.mrb[79].mxu0  ;;  %v5189_v30 = vpop.f32.mrb[81].mxu1 }
0x1754   :  { %v2612_v32 = vpop.f32.mrb[82].mxu1 }
0x1755   :  { %v5190_v33 = vpop.f32.mrb[83].mxu1 }
0x1756   :  { %v4629_v33 = vld [vmem:[%s6495_s9 + $0x14] sm:$0xf] }
0x1758   :  { %v2677_v35 = vpop.f32.mrb[80].mxu0 }
0x1759   :  { %v5197_v36 = vpop.f32.mrb[81].mxu0  ;;  %v2678_v46 = vadd.f32 %v4603_v28, %v2677_v35 }
0x175a   :  { %v2680_v37 = vpop.f32.mrb[82].mxu0  ;;  %v2743_v38 = vpop.f32.mrb[84].mxu1  ;;  %v4597_v36 = vld [vmem:[%s6495_s9 + $0x10] sm:$0xf] }
0x175b   :  { %v2744_v39 = vadd.f32 %v4612_v13, %v2743_v38  ;;  %v5198_v40 = vpop.f32.mrb[83].mxu0  ;;  %v5205_v6 = vpop.f32.mrb[85].mxu1  ;;  %v2681_v51 = vadd.f32 %v4603_v28, %v2680_v37  ;;  %v2816_v54 = vpack.c.bf16 %v2678_v46, %v2678_v46  ;;  %v5444_v46 = vld [vmem:[%s6519_s26 + $0x68] sm:$0xff]  }
0x175c   :  { %v2746_v41 = vpop.f32.mrb[86].mxu1  ;;  %v3086_v6 = vsel %vm405_vm3, %v4597_v36, 0 }
0x175d   :  { %v2818_v42 = vpack.c.bf16 %v2744_v39, %v2744_v39  ;;  %v2747_v24 = vadd.f32 %v4612_v13, %v2746_v41  ;;  %v5206_v9 = vpop.f32.mrb[87].mxu1  ;;  %v2817_v56 = vpack.c.bf16 %v2681_v51, %v2681_v51  ;;  %v3039_v39 = vsel %vm405_vm3, %v4629_v33, 0  ;;  %v5441_v41 = vld [vmem:[%s6523_s29 + $0x60] sm:$0xff]  }
0x175e   :  { %v5443_v9 = vld [vmem:[%s6519_s26 + $0x60] sm:$0xff]  }
0x175f   :  { %v2824_v43 = vsel %vm281_vm2, %v2818_v42, 0  ;;  %v2819_v44 = vpack.c.bf16 %v2747_v24, %v2747_v24  ;;  %v5442_v42 = vld [vmem:[%s6523_s29 + $0x68] sm:$0xff]  }
0x1760   :  { %v2809_v45 = vpop.f32.mrb[84].mxu0  ;;  %5216 = vmatpush3.bf16.xpose.msra.mxu1 %v2824_v43 }
0x1761   :  { %v2870_v47 = vsel %vm281_vm2, %v2819_v44, 0  ;;  %v2810_v48 = vadd.f32 %v4621_v29, %v2809_v45  ;;  %v5213_v49 = vpop.f32.mrb[85].mxu0  ;;  %5227 = vmatprep.subr.bf16.mxu1 %v5539_v0 }
0x1762   :  { %v2812_v50 = vpop.f32.mrb[86].mxu0  ;;  %5222 = vmatpush3.bf16.xpose.msra.mxu0 %v2870_v47 }
0x1763   :  { %v2938_v52 = vpack.c.bf16 %v2810_v48, %v2810_v48  ;;  %v2813_v53 = vadd.f32 %v4621_v29, %v2812_v50  ;;  %v5214_v31 = vpop.f32.mrb[87].mxu0  ;;  %5233 = vmatprep.subr.bf16.mxu0 %v5539_v0  ;;  %v5445_v48 = vld [vmem:[%s6524_s22 + $0x60] sm:$0xff]  }
0x1765   :  { %v2939_v55 = vpack.c.bf16 %v2813_v53, %v2813_v53  ;;  %v2944_v57 = vsel %vm405_vm3, %v2938_v52, 0  ;;  %v5446_v52 = vld [vmem:[%s6524_s22 + $0x68] sm:$0xff]   ;;  %v4646_v53 = vld [vmem:[%s6492_s7 + $0x6] ss:$0 sm:$0xff] }
0x1767   :  { %5218 = vmatmul.mubr.msk.bf16.vlgmr.msra.gmra.mrb[88].mxu1 %vm281_vm2, %v2816_v54  ;;  %v2990_v34 = vsel %vm405_vm3, %v2939_v55, 0 }
0x1768   :  { %5228 = vmatpush3.bf16.msra.mxu1 %v2944_v57  ;;  %5229 = vmatprep.mubr.msk.bf16.mxu1 %vm5540_vm0, %v5539_v0 }
0x1769   :  { %5224 = vmatmul.mubr.msk.bf16.vlgmr.msra.gmra.mrb[88].mxu0 %vm281_vm2, %v2817_v56  ;;  %5239 = vmatprep.subr.bf16.mxu1 %v5539_v0 }
0x176a   :  { %5234 = vmatpush3.bf16.msra.mxu0 %v2990_v34  ;;  %5235 = vmatprep.mubr.msk.bf16.mxu0 %vm5540_vm0, %v5539_v0 }
0x176b   :  { %5245 = vmatprep.subr.bf16.mxu0 %v5539_v0 }
0x183a   :  { %v2860_v58 = vpop.f32.mrb[88].mxu1 }
0x183b   :  { %v2912_v10 = vmul.f32 0.35355338, %v2860_v58  ;;  %v5219_v11 = vpop.f32.mrb[89].mxu1 }
0x183c   :  { %v2863_v59 = vpop.f32.mrb[90].mxu1  ;;  %v2906_v60 = vpop.f32.mrb[88].mxu0 }
0x183d   :  { %v2913_v61 = vmul.f32 0.35355338, %v2906_v60  ;;  %v5220_v62 = vpop.f32.mrb[91].mxu1  ;;  %v5225_v63 = vpop.f32.mrb[89].mxu0  ;;  %v2914_v1 = vsel %vm281_vm2, %v2912_v10, -inf }
0x183e   :  { %v2909_v2 = vpop.f32.mrb[90].mxu0  ;;  %2915 = vmax.xlane.f32.xlu0 %v2914_v1 }
0x183f   :  { %v5226_v3 = vpop.f32.mrb[91].mxu0  ;;  %v2917_v7 = vsel %vm281_vm2, %v2913_v61, -inf }
0x1840   :  { %2918 = vmax.xlane.f32.xlu1 %v2917_v7  ;;  %v4637_v3 = vld [vmem:[%s6493_s6 + $0x6] ss:$0 sm:$0xff] }
0x18cb   :  { %v2916_v12 = vpop.xlane.xlu0 %2915 }
0x18cc   :  { %v2920_v14 = vsub.f32 %v2912_v10, %v2916_v12 }
0x18cd   :  { %v2919_v15 = vpop.xlane.xlu1 %2918 }
0x18ce   :  { %v2922_v16 = vmul.f32 1.442695, %v2920_v14  ;;  %v2921_v17 = vsub.f32 %v2913_v61, %v2919_v15 }
0x18d0   :  { %5507 = vpow2.f32 %v2922_v16  ;;  %v2924_v18 = vmul.f32 1.442695, %v2921_v17 }
0x18d2   :  { %5509 = vpow2.f32 %v2924_v18 }
0x18da   :  { %v5508_v19 = vpop.eup %5507 }
0x18db   :  { %v2926_v20 = vsel %vm281_vm2, %v5508_v19, 0.0 }
0x18dc   :  { %v5510_v22 = vpop.eup %5509  ;;  %2927 = vadd.xlane.f32.xlu0 %v2926_v20  ;;  %v4655_v20 = vld [vmem:[%s6494_s8 + $0x6] ss:$0 sm:$0xff] }
0x18dd   :  { %v2929_v23 = vsel %vm281_vm2, %v5510_v22, 0.0 }
0x18de   :  { %2930 = vadd.xlane.f32.xlu1 %v2929_v23 }
0x1969   :  { %v2928_v27 = vpop.xlane.xlu0 %2927 }
0x196a   :  { %5511 = vrcp.f32 %v2928_v27 }
0x196b   :  { %v2931_v30 = vpop.xlane.xlu1 %2930 }
0x196c   :  { %5513 = vrcp.f32 %v2931_v30 }
0x1974   :  { %v5512_v32 = vpop.eup %5511 }
0x1975   :  { %v2934_v35 = vmul.f32 %v5512_v32, %v5508_v19 }
0x1976   :  { %v5514_v13 = vpop.eup %5513 }
0x1977   :  { %v2935_v37 = vmul.f32 %v5514_v13, %v5510_v22  ;;  %v2936_v38 = vpack.c.bf16 %v2934_v35, %v2934_v35 }
0x1979   :  { %5230 = vmatmul.mubr.msk.bf16.vlgmr.msra.gmra.mrb[92].mxu1 %vm281_vm2, %v2936_v38  ;;  %v2937_v40 = vpack.c.bf16 %v2935_v37, %v2935_v37 }
0x197a   :  { %5240 = vmatpush3.bf16.msra.mxu1 %v3039_v39  ;;  %5241 = vmatprep.mubr.msk.bf16.mxu1 %vm5540_vm0, %v5539_v0 }
0x197b   :  { %5236 = vmatmul.mubr.msk.bf16.vlgmr.msra.gmra.mrb[92].mxu0 %vm281_vm2, %v2937_v40  ;;  %5251 = vmatprep.subr.bf16.mxu1 %v5539_v0 }
0x197c   :  { %5246 = vmatpush3.bf16.msra.mxu0 %v3086_v6  ;;  %5247 = vmatprep.mubr.msk.bf16.mxu0 %vm5540_vm0, %v5539_v0 }
0x197d   :  { %5259 = vmatprep.subr.bf16.mxu0 %v5539_v0 }
0x1983   :  { %5248 = vmatmul.mubr.msk.bf16.vlgmr.msra.gmra.mrb[96].mxu0 %vm281_vm2, %v2615_v26 }
0x1984   :  { %5260 = vmatpush3.bf16.msra.mxu0 %v5441_v41  ;;  %5263 = vmatprep.mubr.msk.bf16.mxu0 %vm5540_vm0, %v5539_v0 }
0x1985   :  { %5261 = vmatprep.subr.bf16.mxu0 %v5539_v0 }
0x1988   :  { %5262 = vmatpush3.bf16.msra.mxu0 %v5442_v42 }
0x1989   :  { %5275 = vmatprep.subr.bf16.mxu0 %v5539_v0 }
0x198b   :  { %5264 = vmatmul.mubr.msk.bf16.vlgmr.msra.gmra.mrb[100].mxu0 %vm104_vm1, %v6096_v8 }
0x198c   :  { %5277 = vmatprep.mubr.msk.bf16.mxu0 %vm5540_vm0, %v5539_v0 }
0x1a4c   :  { %v2980_v21 = vpop.f32.mrb[92].mxu1 }
0x1a4d   :  { %v5231_v25 = vpop.f32.mrb[93].mxu1 }
0x1a4e   :  { %v2983_v26 = vpop.f32.mrb[94].mxu1  ;;  %v3026_v24 = vpop.f32.mrb[92].mxu0 }
0x1a4f   :  { %v3032_v28 = vpack.c.bf16 %v3026_v24, %v2980_v21  ;;  %v5232_v29 = vpop.f32.mrb[95].mxu1  ;;  %v5237_v43 = vpop.f32.mrb[93].mxu0 }
0x1a50   :  { %v3029_v44 = vpop.f32.mrb[94].mxu0 }
0x1a51   :  { %v5238_v45 = vpop.f32.mrb[95].mxu0  ;;  %5242 = vmatmul.mubr.msk.bf16.vlgmr.msra.gmra.mrb[96].mxu1 %vm281_vm2, %v3032_v28 }
0x1a52   :  { %5252 = vmatpush3.bf16.msra.mxu1 %v5443_v9  ;;  %5255 = vmatprep.mubr.msk.bf16.mxu1 %vm5540_vm0, %v5539_v0 }
0x1a53   :  { %5253 = vmatprep.subr.bf16.mxu1 %v5539_v0 }
0x1a56   :  { %5254 = vmatpush3.bf16.msra.mxu1 %v5444_v46  ;;  %v3122_v47 = vpop.f32.mrb[96].mxu0 }
0x1a57   :  { %v5249_v49 = vpop.f32.mrb[97].mxu0  ;;  %5267 = vmatprep.subr.bf16.mxu1 %v5539_v0 }
0x1a58   :  { %v3125_v50 = vpop.f32.mrb[98].mxu0 }
0x1a59   :  { %v5250_v51 = vpop.f32.mrb[99].mxu0  ;;  %5256 = vmatmul.mubr.msk.bf16.vlgmr.msra.gmra.mrb[100].mxu1 %vm104_vm1, %v6096_v8 }
0x1a5a   :  { %5268 = vmatpush3.bf16.msra.mxu1 %v5445_v48  ;;  %5271 = vmatprep.mubr.msk.bf16.mxu1 %vm5540_vm0, %v5539_v0 }
0x1a5b   :  { %5269 = vmatprep.subr.bf16.mxu1 %v5539_v0 }
0x1a5e   :  { %5270 = vmatpush3.bf16.msra.mxu1 %v5446_v52  ;;  %v3254_v31 = vpop.f32.mrb[100].mxu0 }
0x1a5f   :  { %v3255_v54 = vadd.f32 %v4646_v53, %v3254_v31  ;;  %v5265_v55 = vpop.f32.mrb[101].mxu0  ;;  %5281 = vmatprep.subr.bf16.mxu1 %v5539_v0 }
0x1a60   :  { %v3257_v56 = vpop.f32.mrb[102].mxu0 }
0x1a61   :  { %v3329_v57 = vpack.c.bf16 %v3255_v54, %v3255_v54  ;;  %v3258_v34 = vadd.f32 %v4646_v53, %v3257_v56  ;;  %v5266_v58 = vpop.f32.mrb[103].mxu0  ;;  %5272 = vmatmul.mubr.msk.bf16.vlgmr.msra.gmra.mrb[104].mxu1 %vm104_vm1, %v6096_v8  ;;  %v4663_v54 = vld [vmem:[%s6495_s9 + $0x18] sm:$0xf] }
0x1a62   :  { %5283 = vmatprep.mubr.msk.bf16.mxu1 %vm5540_vm0, %v5539_v0  ;;  %v3550_v58 = vsel %vm405_vm3, %v4663_v54, 0 }
0x1a63   :  { %v3335_v10 = vsel %vm281_vm2, %v3329_v57, 0  ;;  %v3330_v11 = vpack.c.bf16 %v3258_v34, %v3258_v34 }
0x1a64   :  { %5276 = vmatpush3.bf16.xpose.msra.mxu0 %v3335_v10  ;;  %v5447_v10 = vld [vmem:[%s6519_s26 + $0x70] sm:$0xff]  }
0x1a65   :  { %v3381_v59 = vsel %vm281_vm2, %v3330_v11, 0  ;;  %5287 = vmatprep.subr.bf16.mxu0 %v5539_v0 }
0x1a67   :  { %5282 = vmatpush3.bf16.xpose.msra.mxu1 %v3381_v59  ;;  %v5448_v59 = vld [vmem:[%s6519_s26 + $0x78] sm:$0xff]  }
0x1a68   :  { %5293 = vmatprep.subr.bf16.mxu1 %v5539_v0 }
0x1b24   :  { %v3075_v60 = vpop.f32.mrb[96].mxu1 }
0x1b25   :  { %v6285_v61 = vadd.f32 %v3122_v47, %v3075_v60  ;;  %v5243_v62 = vpop.f32.mrb[97].mxu1  ;;  %v5449_v60 = vld [vmem:[%s6524_s22 + $0x70] sm:$0xff]  }
0x1b26   :  { %v3078_v63 = vpop.f32.mrb[98].mxu1  ;;  %v5450_v62 = vld [vmem:[%s6524_s22 + $0x78] sm:$0xff]  }
0x1b27   :  { %v6287_v1 = vadd.f32 %v3125_v50, %v3078_v63  ;;  %v5244_v2 = vpop.f32.mrb[99].mxu1 }
0x1b2c   :  { %v3188_v7 = vpop.f32.mrb[100].mxu1 }
0x1b2d   :  { %v3189_v12 = vadd.f32 %v4637_v3, %v3188_v7  ;;  %v5257_v14 = vpop.f32.mrb[101].mxu1 }
0x1b2e   :  { %v3191_v15 = vpop.f32.mrb[102].mxu1 }
0x1b2f   :  { %v3327_v16 = vpack.c.bf16 %v3189_v12, %v3189_v12  ;;  %v3192_v17 = vadd.f32 %v4637_v3, %v3191_v15  ;;  %v5258_v18 = vpop.f32.mrb[103].mxu1  ;;  %v5451_v12 = vld [vmem:[%s6523_s29 + $0x70] sm:$0xff]  }
0x1b31   :  { %v3328_v19 = vpack.c.bf16 %v3192_v17, %v3192_v17  ;;  %5278 = vmatmul.mubr.msk.bf16.vlgmr.msra.gmra.mrb[104].mxu0 %vm281_vm2, %v3327_v16 }
0x1b32   :  { %5289 = vmatprep.mubr.msk.bf16.mxu0 %vm5540_vm0, %v5539_v0 }
0x1b33   :  { %5284 = vmatmul.mubr.msk.bf16.vlgmr.msra.gmra.mrb[108].mxu1 %vm281_vm2, %v3328_v19  ;;  %v5452_v19 = vld [vmem:[%s6523_s29 + $0x78] sm:$0xff]  }
0x1b34   :  { %v3320_v22 = vpop.f32.mrb[104].mxu1  ;;  %5295 = vmatprep.mubr.msk.bf16.mxu1 %vm5540_vm0, %v5539_v0 }
0x1b35   :  { %v3321_v23 = vadd.f32 %v4655_v20, %v3320_v22  ;;  %v5273_v27 = vpop.f32.mrb[105].mxu1 }
0x1b36   :  { %v3323_v30 = vpop.f32.mrb[106].mxu1 }
0x1b37   :  { %v3449_v32 = vpack.c.bf16 %v3321_v23, %v3321_v23  ;;  %v3324_v33 = vadd.f32 %v4655_v20, %v3323_v30  ;;  %v5274_v35 = vpop.f32.mrb[107].mxu1 }
0x1b39   :  { %v3455_v13 = vsel %vm405_vm3, %v3449_v32, 0  ;;  %v3450_v36 = vpack.c.bf16 %v3324_v33, %v3324_v33 }
0x1b3a   :  { %5288 = vmatpush3.bf16.msra.mxu0 %v3455_v13 }
0x1b3b   :  { %v3501_v37 = vsel %vm405_vm3, %v3450_v36, 0  ;;  %5299 = vmatprep.subr.bf16.mxu0 %v5539_v0 }
0x1b3c   :  { %5294 = vmatpush3.bf16.msra.mxu1 %v3501_v37 }
0x1b3d   :  { %5305 = vmatprep.subr.bf16.mxu1 %v5539_v0 }
0x1c04   :  { %v3371_v38 = vpop.f32.mrb[104].mxu0 }
0x1c05   :  { %v3423_v39 = vmul.f32 0.35355338, %v3371_v38  ;;  %v5279_v40 = vpop.f32.mrb[105].mxu0 }
0x1c06   :  { %v3374_v6 = vpop.f32.mrb[106].mxu0  ;;  %v3417_v41 = vpop.f32.mrb[108].mxu1 }
0x1c07   :  { %v3424_v42 = vmul.f32 0.35355338, %v3417_v41  ;;  %v5280_v21 = vpop.f32.mrb[107].mxu0  ;;  %v5285_v25 = vpop.f32.mrb[109].mxu1  ;;  %v3425_v26 = vsel %vm281_vm2, %v3423_v39, -inf }
0x1c08   :  { %3426 = vmax.xlane.f32.xlu0 %v3425_v26  ;;  %v3420_v24 = vpop.f32.mrb[110].mxu1  ;;  %v4688_v21 = vld [vmem:[%s6494_s8 + $0x7] ss:$0 sm:$0xff] }
0x1c09   :  { %v5286_v9 = vpop.f32.mrb[111].mxu1  ;;  %v3428_v28 = vsel %vm281_vm2, %v3424_v42, -inf }
0x1c0a   :  { %3429 = vmax.xlane.f32.xlu1 %v3428_v28 }
0x1c95   :  { %v3427_v29 = vpop.xlane.xlu0 %3426 }
0x1c96   :  { %v3431_v43 = vsub.f32 %v3423_v39, %v3427_v29 }
0x1c97   :  { %v3430_v44 = vpop.xlane.xlu1 %3429 }
0x1c98   :  { %v3433_v45 = vmul.f32 1.442695, %v3431_v43  ;;  %v3432_v46 = vsub.f32 %v3424_v42, %v3430_v44 }
0x1c9a   :  { %5515 = vpow2.f32 %v3433_v45  ;;  %v3435_v47 = vmul.f32 1.442695, %v3432_v46 }
0x1c9c   :  { %5517 = vpow2.f32 %v3435_v47 }
0x1ca4   :  { %v5516_v48 = vpop.eup %5515 }
0x1ca5   :  { %v3437_v49 = vsel %vm281_vm2, %v5516_v48, 0.0 }
0x1ca6   :  { %v5518_v50 = vpop.eup %5517  ;;  %3438 = vadd.xlane.f32.xlu0 %v3437_v49 }
0x1ca7   :  { %v3440_v51 = vsel %vm281_vm2, %v5518_v50, 0.0 }
0x1ca8   :  { %3441 = vadd.xlane.f32.xlu1 %v3440_v51 }
0x1d33   :  { %v3439_v52 = vpop.xlane.xlu0 %3438 }
0x1d34   :  { %5519 = vrcp.f32 %v3439_v52 }
0x1d35   :  { %v3442_v53 = vpop.xlane.xlu1 %3441 }
0x1d36   :  { %5521 = vrcp.f32 %v3442_v53 }
0x1d3e   :  { %v5520_v31 = vpop.eup %5519 }
0x1d3f   :  { %v3445_v55 = vmul.f32 %v5520_v31, %v5516_v48 }
0x1d40   :  { %v5522_v56 = vpop.eup %5521 }
0x1d41   :  { %v3446_v57 = vmul.f32 %v5522_v56, %v5518_v50  ;;  %v3447_v34 = vpack.c.bf16 %v3445_v55, %v3445_v55 }
0x1d43   :  { %5290 = vmatmul.mubr.msk.bf16.vlgmr.msra.gmra.mrb[108].mxu0 %vm281_vm2, %v3447_v34  ;;  %v3448_v11 = vpack.c.bf16 %v3446_v57, %v3446_v57 }
0x1d44   :  { %5300 = vmatpush3.bf16.msra.mxu0 %v3550_v58  ;;  %5301 = vmatprep.mubr.msk.bf16.mxu0 %vm5540_vm0, %v5539_v0 }
0x1d45   :  { %5296 = vmatmul.mubr.msk.bf16.vlgmr.msra.gmra.mrb[112].mxu1 %vm281_vm2, %v3448_v11  ;;  %5313 = vmatprep.subr.bf16.mxu0 %v5539_v0 }
0x1d46   :  { %5306 = vmatpush3.bf16.msra.mxu1 %v5447_v10  ;;  %5309 = vmatprep.mubr.msk.bf16.mxu1 %vm5540_vm0, %v5539_v0 }
0x1d47   :  { %5307 = vmatprep.subr.bf16.mxu1 %v5539_v0 }
0x1d4a   :  { %5308 = vmatpush3.bf16.msra.mxu1 %v5448_v59 }
0x1d4b   :  { %5321 = vmatprep.subr.bf16.mxu1 %v5539_v0 }
0x1d4d   :  { %5310 = vmatmul.mubr.msk.bf16.vlgmr.msra.gmra.mrb[116].mxu1 %vm104_vm1, %v6096_v8 }
0x1d4e   :  { %5322 = vmatpush3.bf16.msra.mxu1 %v5449_v60  ;;  %5325 = vmatprep.mubr.msk.bf16.mxu1 %vm5540_vm0, %v5539_v0 }
0x1d4f   :  { %5323 = vmatprep.subr.bf16.mxu1 %v5539_v0 }
0x1d52   :  { %5324 = vmatpush3.bf16.msra.mxu1 %v5450_v62 }
0x1d53   :  { %5335 = vmatprep.subr.bf16.mxu1 %v5539_v0 }
0x1d55   :  { %5326 = vmatmul.mubr.msk.bf16.vlgmr.msra.gmra.mrb[120].mxu1 %vm104_vm1, %v6096_v8 }
0x1d56   :  { %5337 = vmatprep.mubr.msk.bf16.mxu1 %vm5540_vm0, %v5539_v0 }
0x1e16   :  { %v3491_v63 = vpop.f32.mrb[108].mxu0 }
0x1e17   :  { %v5291_v2 = vpop.f32.mrb[109].mxu0 }
0x1e18   :  { %v3494_v3 = vpop.f32.mrb[110].mxu0  ;;  %v3537_v7 = vpop.f32.mrb[112].mxu1 }
0x1e19   :  { %v3543_v14 = vpack.c.bf16 %v3537_v7, %v3491_v63  ;;  %v5292_v15 = vpop.f32.mrb[111].mxu0  ;;  %v5297_v16 = vpop.f32.mrb[113].mxu1 }
0x1e1a   :  { %v3540_v17 = vpop.f32.mrb[114].mxu1 }
0x1e1b   :  { %v5298_v18 = vpop.f32.mrb[115].mxu1  ;;  %5302 = vmatmul.mubr.msk.bf16.vlgmr.msra.gmra.mrb[112].mxu0 %vm281_vm2, %v3543_v14 }
0x1e1c   :  { %5314 = vmatpush3.bf16.msra.mxu0 %v5451_v12  ;;  %5317 = vmatprep.mubr.msk.bf16.mxu0 %vm5540_vm0, %v5539_v0 }
0x1e1d   :  { %5315 = vmatprep.subr.bf16.mxu0 %v5539_v0 }
0x1e20   :  { %v3654_v20 = vpop.f32.mrb[116].mxu1  ;;  %5316 = vmatpush3.bf16.msra.mxu0 %v5452_v19 }
0x1e21   :  { %v5311_v22 = vpop.f32.mrb[117].mxu1  ;;  %5329 = vmatprep.subr.bf16.mxu0 %v5539_v0 }
0x1e22   :  { %v3657_v23 = vpop.f32.mrb[118].mxu1  ;;  %v4696_v22 = vld [vmem:[%s6495_s9 + $0x1c] sm:$0xf] }
0x1e23   :  { %v5312_v27 = vpop.f32.mrb[119].mxu1  ;;  %5318 = vmatmul.mubr.msk.bf16.vlgmr.msra.gmra.mrb[116].mxu0 %vm104_vm1, %v6096_v8  ;;  %v4679_v8 = vld [vmem:[%s6492_s7 + $0x7] ss:$0 sm:$0xff] }
0x1e24   :  { %5331 = vmatprep.mubr.msk.bf16.mxu0 %vm5540_vm0, %v5539_v0 }
0x1e28   :  { %v3786_v30 = vpop.f32.mrb[120].mxu1 }
0x1e29   :  { %v5327_v32 = vpop.f32.mrb[121].mxu1  ;;  %v3787_v9 = vadd.f32 %v4688_v21, %v3786_v30 }
0x1e2a   :  { %v3789_v33 = vpop.f32.mrb[122].mxu1 }
0x1e2b   :  { %v5328_v35 = vpop.f32.mrb[123].mxu1  ;;  %v3790_v44 = vadd.f32 %v4688_v21, %v3789_v33  ;;  %v3915_v47 = vpack.c.bf16 %v3787_v9, %v3787_v9  ;;  %v4016_v33 = vsel %vm405_vm3, %v4696_v22, 0 }
0x1e2d   :  { %v3916_v49 = vpack.c.bf16 %v3790_v44, %v3790_v44  ;;  %v3921_v51 = vsel %vm405_vm3, %v3915_v47, 0 }
0x1e2f   :  { %v3967_v52 = vsel %vm405_vm3, %v3916_v49, 0 }
0x1eee   :  { %v3586_v13 = vpop.f32.mrb[112].mxu0 }
0x1eef   :  { %v6360_v36 = vadd.f32 %v3586_v13, %v6285_v61  ;;  %v5303_v37 = vpop.f32.mrb[113].mxu0 }
0x1ef0   :  { %v3589_v38 = vpop.f32.mrb[114].mxu0 }
0x1ef1   :  { %v6363_v39 = vadd.f32 %v3589_v38, %v6287_v1  ;;  %v5304_v40 = vpop.f32.mrb[115].mxu0  ;;  %v4670_v1 = vld [vmem:[%s6493_s6 + $0x7] ss:$0 sm:$0xff] }
0x1ef2   :  { %v3655_v43 = vadd.f32 %v4670_v1, %v3654_v20  ;;  %v3658_v46 = vadd.f32 %v4670_v1, %v3657_v23 }
0x1ef4   :  { %v3793_v48 = vpack.c.bf16 %v3655_v43, %v3655_v43  ;;  %v3794_v50 = vpack.c.bf16 %v3658_v46, %v3658_v46 }
0x1ef6   :  { %v3720_v6 = vpop.f32.mrb[116].mxu0 }
0x1ef7   :  { %v3721_v41 = vadd.f32 %v4679_v8, %v3720_v6  ;;  %v5319_v42 = vpop.f32.mrb[117].mxu0 }
0x1ef8   :  { %v3723_v25 = vpop.f32.mrb[118].mxu0 }
0x1ef9   :  { %v3795_v61 = vpack.c.bf16 %v3721_v41, %v3721_v41  ;;  %v3724_v26 = vadd.f32 %v4679_v8, %v3723_v25  ;;  %v5320_v24 = vpop.f32.mrb[119].mxu0 }
0x1efb   :  { %v3801_v28 = vsel %vm281_vm2, %v3795_v61, 0  ;;  %v3796_v29 = vpack.c.bf16 %v3724_v26, %v3724_v26  ;;  %v4699_v61 = vld [vmem:[%s6496_s10 + $0x1] ss:$0 sm:$0xff] }
0x1efc   :  { %5330 = vmatpush3.bf16.xpose.msra.mxu0 %v3801_v28 }
0x1efd   :  { %v3847_v45 = vsel %vm281_vm2, %v3796_v29, 0  ;;  %5341 = vmatprep.subr.bf16.mxu0 %v5539_v0 }
0x1efe   :  { %5336 = vmatpush3.bf16.xpose.msra.mxu1 %v3847_v45 }
0x1eff   :  { %5347 = vmatprep.subr.bf16.mxu1 %v5539_v0 }
0x1f03   :  { %5332 = vmatmul.mubr.msk.bf16.vlgmr.msra.gmra.mrb[120].mxu0 %vm281_vm2, %v3793_v48 }
0x1f04   :  { %5342 = vmatpush3.bf16.msra.mxu0 %v3921_v51  ;;  %5343 = vmatprep.mubr.msk.bf16.mxu0 %vm5540_vm0, %v5539_v0 }
0x1f05   :  { %5338 = vmatmul.mubr.msk.bf16.vlgmr.msra.gmra.mrb[124].mxu1 %vm281_vm2, %v3794_v50  ;;  %5353 = vmatprep.subr.bf16.mxu0 %v5539_v0 }
0x1f06   :  { %5348 = vmatpush3.bf16.msra.mxu1 %v3967_v52  ;;  %5349 = vmatprep.mubr.msk.bf16.mxu1 %vm5540_vm0, %v5539_v0 }
0x1f07   :  { %5359 = vmatprep.subr.bf16.mxu1 %v5539_v0 }
0x1fd6   :  { %v3837_v53 = vpop.f32.mrb[120].mxu0 }
0x1fd7   :  { %v3889_v31 = vmul.f32 0.35355338, %v3837_v53  ;;  %v5333_v54 = vpop.f32.mrb[121].mxu0 }
0x1fd8   :  { %v3840_v55 = vpop.f32.mrb[122].mxu0  ;;  %v3883_v56 = vpop.f32.mrb[124].mxu1  ;;  %v5454_v54 = vld [vmem:[%s6497_s13 + $0x18] sm:$0xff]  }
0x1fd9   :  { %v3890_v57 = vmul.f32 0.35355338, %v3883_v56  ;;  %v5334_v34 = vpop.f32.mrb[123].mxu0  ;;  %v5339_v58 = vpop.f32.mrb[125].mxu1  ;;  %v3891_v10 = vsel %vm281_vm2, %v3889_v31, -inf  ;;  %v5455_v55 = vld [vmem:[%s6498_s15 + $0x20] sm:$0xff]  }
0x1fda   :  { %3892 = vmax.xlane.f32.xlu0 %v3891_v10  ;;  %v3886_v11 = vpop.f32.mrb[126].mxu1  ;;  %v5456_v56 = vld [vmem:[%s6498_s15 + $0x28] sm:$0xff]  }
0x1fdb   :  { %v5340_v59 = vpop.f32.mrb[127].mxu1  ;;  %v3894_v60 = vsel %vm281_vm2, %v3890_v57, -inf }
0x1fdc   :  { %3895 = vmax.xlane.f32.xlu1 %v3894_v60 }
0x2067   :  { %v3893_v62 = vpop.xlane.xlu0 %3892 }
0x2068   :  { %v3897_v63 = vsub.f32 %v3889_v31, %v3893_v62  ;;  %v4701_v62 = vld [vmem:[%s6499_s11 + $0x1] ss:$0 sm:$0xff] }
0x2069   :  { %v3896_v2 = vpop.xlane.xlu1 %3895 }
0x206a   :  { %v3899_v3 = vmul.f32 1.442695, %v3897_v63  ;;  %v3898_v7 = vsub.f32 %v3890_v57, %v3896_v2 }
0x206c   :  { %5523 = vpow2.f32 %v3899_v3  ;;  %v3901_v12 = vmul.f32 1.442695, %v3898_v7 }
0x206e   :  { %5525 = vpow2.f32 %v3901_v12  ;;  %v4703_v12 = vld [vmem:[%s6500_s12 + $0x1] ss:$0 sm:$0xff] }
0x2076   :  { %v5524_v14 = vpop.eup %5523 }
0x2077   :  { %v3903_v15 = vsel %vm281_vm2, %v5524_v14, 0.0 }
0x2078   :  { %v5526_v16 = vpop.eup %5525  ;;  %3904 = vadd.xlane.f32.xlu0 %v3903_v15 }
0x2079   :  { %v3906_v17 = vsel %vm281_vm2, %v5526_v16, 0.0 }
0x207a   :  { %3907 = vadd.xlane.f32.xlu1 %v3906_v17 }
0x2105   :  { %v3905_v18 = vpop.xlane.xlu0 %3904 }
0x2106   :  { %5527 = vrcp.f32 %v3905_v18  ;;  %v5457_v18 = vld [vmem:[%s6498_s15 + $0x30] sm:$0xff]  }
0x2107   :  { %v3908_v19 = vpop.xlane.xlu1 %3907 }
0x2108   :  { %5529 = vrcp.f32 %v3908_v19  ;;  %v5458_v19 = vld [vmem:[%s6498_s15 + $0x38] sm:$0xff]  }
0x2110   :  { %v5528_v20 = vpop.eup %5527 }
0x2111   :  { %v3911_v23 = vmul.f32 %v5528_v20, %v5524_v14  ;;  %v4709_v20 = vld [vmem:[%s6501_s14 + $0x1] ss:$0 sm:$0xff] }
0x2112   :  { %v5530_v27 = vpop.eup %5529 }
0x2113   :  { %v3912_v30 = vmul.f32 %v5530_v27, %v5526_v16  ;;  %v3913_v32 = vpack.c.bf16 %v3911_v23, %v3911_v23 }
0x2115   :  { %5344 = vmatmul.mubr.msk.bf16.vlgmr.msra.gmra.mrb[124].mxu0 %vm281_vm2, %v3913_v32  ;;  %v3914_v35 = vpack.c.bf16 %v3912_v30, %v3912_v30 }
0x2116   :  { %5354 = vmatpush3.bf16.msra.mxu0 %v4016_v33  ;;  %5355 = vmatprep.mubr.msk.bf16.mxu0 %vm5540_vm0, %v5539_v0 }
0x2117   :  { %5350 = vmatmul.mubr.msk.bf16.vlgmr.msra.gmra.mrb[128].mxu1 %vm281_vm2, %v3914_v35  ;;  %5367 = vmatprep.subr.bf16.mxu0 %v5539_v0 }
0x2118   :  { %5363 = vmatprep.mubr.msk.bf16.mxu1 %vm5540_vm0, %v5539_v0 }
0x21e8   :  { %v3957_v13 = vpop.f32.mrb[124].mxu0 }
0x21e9   :  { %v5345_v37 = vpop.f32.mrb[125].mxu0 }
0x21ea   :  { %v3960_v38 = vpop.f32.mrb[126].mxu0  ;;  %v4003_v40 = vpop.f32.mrb[128].mxu1 }
0x21eb   :  { %v4009_v8 = vpack.c.bf16 %v4003_v40, %v3957_v13  ;;  %v5346_v6 = vpop.f32.mrb[127].mxu0  ;;  %v5351_v41 = vpop.f32.mrb[129].mxu1 }
0x21ec   :  { %v4006_v42 = vpop.f32.mrb[130].mxu1 }
0x21ed   :  { %v5352_v21 = vpop.f32.mrb[131].mxu1  ;;  %5356 = vmatmul.mubr.msk.bf16.vlgmr.msra.gmra.mrb[128].mxu0 %vm281_vm2, %v4009_v8 }
0x21ee   :  { %5375 = vmatprep.mubr.msk.bf16.mxu0 %vm5540_vm0, %v5539_v0  ;;  %5368 = vmatpush3.bf16.msra.mxu0 %v5455_v55 }
0x21ef   :  { %5369 = vmatprep.subr.bf16.mxu0 %v5539_v0 }
0x21f2   :  { %5370 = vmatpush3.bf16.msra.mxu0 %v5456_v56 }
0x21f3   :  { %5371 = vmatprep.subr.bf16.mxu0 %v5539_v0 }
0x21f6   :  { %5372 = vmatpush3.bf16.msra.mxu0 %v5457_v18 }
0x21f7   :  { %5373 = vmatprep.subr.bf16.mxu0 %v5539_v0 }
0x21fa   :  { %5374 = vmatpush3.bf16.msra.mxu0 %v5458_v19 }
0x22c0   :  { %v4052_v25 = vpop.f32.mrb[128].mxu0 }
0x22c1   :  { %v4059_v26 = vadd.f32 %v4052_v25, %v6360_v36  ;;  %v5357_v24 = vpop.f32.mrb[129].mxu0 }
0x22c2   :  { %v4055_v1 = vpop.f32.mrb[130].mxu0 }
0x22c3   :  { %v4069_v9 = vadd.f32 %v4699_v61, %v4059_v26  ;;  %v4060_v28 = vadd.f32 %v4055_v1, %v6363_v39  ;;  %v5358_v29 = vpop.f32.mrb[131].mxu0 }
0x22c5   :  { %v4070_v43 = vadd.f32 %v4699_v61, %v4060_v28  ;;  %v4071_v44 = vadd.f32 %v4069_v9, %v6087_v4 }
0x22c7   :  { %v4073_v45 = vsel %vm104_vm1, %v4071_v44, 0.0  ;;  %v4072_v46 = vadd.f32 %v4070_v43, %v6089_v5  ;;  %v5453_v5 = vld [vmem:[%s6497_s13 + $0x10] sm:$0xff]  }
0x22c8   :  { %4074 = vadd.xlane.f32.xlu0 %v4073_v45  ;;  %5360 = vmatpush3.bf16.msra.mxu1 %v5453_v5 }
0x22c9   :  { %v4076_v47 = vsel %vm104_vm1, %v4072_v46, 0.0  ;;  %5361 = vmatprep.subr.bf16.mxu1 %v5539_v0 }
0x22ca   :  { %4077 = vadd.xlane.f32.xlu1 %v4076_v47 }
0x22cc   :  { %5362 = vmatpush3.bf16.msra.mxu1 %v5454_v54 }
0x2355   :  { %v4075_v48 = vpop.xlane.xlu0 %4074 }
0x2356   :  { %v4079_v49 = vmul.f32 0.03125, %v4075_v48  ;;  %v5541_v48 = vmov 0.0|0.0  }
0x2357   :  { %v4078_v36 = vpop.xlane.xlu1 %4077  ;;  %5390 = vmatprep.subr.bf16.mxu1 %v5541_v48 }
0x2358   :  { %v4081_v50 = vsub.f32 %v4071_v44, %v4079_v49  ;;  %v4080_v51 = vmul.f32 0.03125, %v4078_v36  ;;  %v4342_v49 = vld [vmem:[%s6505_s19] sm:$0xff]  ;;  %v4343_v36 = vld [vmem:[%s6505_s19 + $0x8] sm:$0xff] }
0x235a   :  { %v4082_v52 = vsub.f32 %v4072_v46, %v4080_v51  ;;  %v4083_v53 = vmul.f32 %v4081_v50, %v4081_v50  ;;  %v5391_v51 = vpack.c.bf16 %v4343_v36, %v4342_v49 }
0x235c   :  { %v4085_v39 = vsel %vm104_vm1, %v4083_v53, 0.0  ;;  %v4084_v31 = vmul.f32 %v4082_v52, %v4082_v52 }
0x235d   :  { %4086 = vadd.xlane.f32.xlu0 %v4085_v39  ;;  %v26_v39 = vstv %s6506_s20 }
0x235e   :  { %v4088_v4 = vsel %vm104_vm1, %v4084_v31, 0.0  ;;  %27 = vst [vmem:[#allocation2] sm:$0x1] %v26_v39 }
0x235f   :  { %4089 = vadd.xlane.f32.xlu1 %v4088_v4 }
0x23ea   :  { %v4087_v57 = vpop.xlane.xlu0 %4086 }
0x23eb   :  { %v4091_v34 = vmul.f32 0.03125, %v4087_v57 }
0x23ec   :  { %v4090_v58 = vpop.xlane.xlu1 %4089 }
0x23ed   :  { %v4093_v10 = vadd.f32 1e-05, %v4091_v34  ;;  %v4092_v11 = vmul.f32 0.03125, %v4090_v58  ;;  %v4729_v34 = vld [vmem:[%s6503_s17 + $0x1] ss:$0 sm:$0xff] }
0x23ef   :  { %5531 = vrsqrt.f32 %v4093_v10  ;;  %v4094_v59 = vadd.f32 1e-05, %v4092_v11  ;;  %v4731_v11 = vld [vmem:[%s6504_s18 + $0x1] ss:$0 sm:$0xff] }
0x23f1   :  { %5533 = vrsqrt.f32 %v4094_v59 }
0x23f9   :  { %v5532_v60 = vpop.eup %5531 }
0x23fa   :  { %v4097_v63 = vmul.f32 %v5532_v60, %v4081_v50  ;;  %v4344_v50 = vld [vmem:[%s6505_s19 + $0x10] sm:$0xff] }
0x23fb   :  { %v5534_v2 = vpop.eup %5533 }
0x23fc   :  { %v4107_v3 = vmul.f32 %v4701_v62, %v4097_v63  ;;  %v4098_v7 = vmul.f32 %v5534_v2, %v4082_v52  ;;  %v4345_v52 = vld [vmem:[%s6505_s19 + $0x18] sm:$0xff] }
0x23fd   :  { %v5394_v53 = vpack.c.bf16 %v4345_v52, %v4344_v50 }
0x23fe   :  { %v4108_v14 = vmul.f32 %v4701_v62, %v4098_v7  ;;  %v4117_v15 = vadd.f32 %v4703_v12, %v4107_v3 }
0x2400   :  { %v4118_v16 = vadd.f32 %v4703_v12, %v4108_v14 }
0x2402   :  { %v4119_v17 = vpack.c.bf16 %v4118_v16, %v4117_v15 }
0x2404   :  { %5364 = vmatmul.mubr.msk.bf16.vlgmr.msra.gmra.mrb[132].mxu1 %vm104_vm1, %v4119_v17 }
0x2405   :  { %5387 = vmatprep.mubr.msk.f32.mxu1 %vm5540_vm0, %v5539_v0  ;;  %v4722_v0 = vld [vmem:[%s6502_s16 + $0x1] ss:$0 sm:$0xff]  ;;  %5392 = vmatpush3.bf16.msra.mxu1 %v5391_v51 }
0x2406   :  { %5393 = vmatprep.subr.bf16.mxu1 %v5541_v48 }
0x2409   :  { %5395 = vmatpush3.bf16.msra.mxu1 %v5394_v53 }
0x24d7   :  { %v4182_v22 = vpop.f32.mrb[132].mxu1 }
0x24d8   :  { %v4183_v23 = vadd.f32 %v4709_v20, %v4182_v22  ;;  %v5365_v27 = vpop.f32.mrb[133].mxu1 }
0x24d9   :  { %v4185_v30 = vpop.f32.mrb[134].mxu1 }
0x24da   :  { %v4186_v32 = vadd.f32 %v4709_v20, %v4185_v30  ;;  %v5366_v33 = vpop.f32.mrb[135].mxu1  ;;  %v4189_v35 = vmax.f32 %v4183_v23, 0.0 }
0x24dc   :  { %v4190_v13 = vmax.f32 %v4186_v32, 0.0 }
0x24de   :  { %v4191_v37 = vpack.c.bf16 %v4190_v13, %v4189_v35  ;;  %v4732_v13 = vld [vmem:[#allocation2] ss:$0 sm:$0xff] }
0x24e0   :  { %5376 = vmatmul.mubr.msk.bf16.vlgmr.msra.gmra.mrb[132].mxu0 %vm2106_vm4, %v4191_v37 }
0x25b3   :  { %v4270_v38 = vpop.f32.mrb[132].mxu0 }
0x25b4   :  { %v4271_v40 = vadd.f32 %v4722_v0, %v4270_v38  ;;  %v5377_v8 = vpop.f32.mrb[133].mxu0 }
0x25b5   :  { %v4273_v6 = vpop.f32.mrb[134].mxu0 }
0x25b6   :  { %v4274_v41 = vadd.f32 %v4722_v0, %v4273_v6  ;;  %v5378_v42 = vpop.f32.mrb[135].mxu0  ;;  %v4277_v21 = vadd.f32 %v4271_v40, %v4117_v15 }
0x25b8   :  { %v4279_v25 = vsel %vm104_vm1, %v4277_v21, 0.0  ;;  %v4278_v61 = vadd.f32 %v4274_v41, %v4118_v16 }
0x25b9   :  { %4280 = vadd.xlane.f32.xlu0 %v4279_v25 }
0x25ba   :  { %v4282_v26 = vsel %vm104_vm1, %v4278_v61, 0.0 }
0x25bb   :  { %4283 = vadd.xlane.f32.xlu1 %v4282_v26 }
0x2646   :  { %v4281_v24 = vpop.xlane.xlu0 %4280 }
0x2647   :  { %v4285_v1 = vmul.f32 0.03125, %v4281_v24 }
0x2648   :  { %v4284_v9 = vpop.xlane.xlu1 %4283 }
0x2649   :  { %v4287_v28 = vsub.f32 %v4277_v21, %v4285_v1  ;;  %v4286_v29 = vmul.f32 0.03125, %v4284_v9 }
0x264b   :  { %v4288_v43 = vsub.f32 %v4278_v61, %v4286_v29  ;;  %v4289_v44 = vmul.f32 %v4287_v28, %v4287_v28 }
0x264d   :  { %v4291_v45 = vsel %vm104_vm1, %v4289_v44, 0.0  ;;  %v4290_v46 = vmul.f32 %v4288_v43, %v4288_v43 }
0x264e   :  { %4292 = vadd.xlane.f32.xlu0 %v4291_v45 }
0x264f   :  { %v4294_v47 = vsel %vm104_vm1, %v4290_v46, 0.0 }
0x2650   :  { %4295 = vadd.xlane.f32.xlu1 %v4294_v47 }
0x26db   :  { %v4293_v31 = vpop.xlane.xlu0 %4292 }
0x26dc   :  { %v4297_v4 = vmul.f32 0.03125, %v4293_v31 }
0x26dd   :  { %v4296_v5 = vpop.xlane.xlu1 %4295 }
0x26de   :  { %v4299_v54 = vadd.f32 1e-05, %v4297_v4  ;;  %v4298_v55 = vmul.f32 0.03125, %v4296_v5 }
0x26e0   :  { %5535 = vrsqrt.f32 %v4299_v54  ;;  %v4300_v56 = vadd.f32 1e-05, %v4298_v55 }
0x26e2   :  { %5537 = vrsqrt.f32 %v4300_v56 }
0x26ea   :  { %v5536_v57 = vpop.eup %5535 }
0x26eb   :  { %v4303_v58 = vmul.f32 %v5536_v57, %v4287_v28 }
0x26ec   :  { %v5538_v10 = vpop.eup %5537 }
0x26ed   :  { %v4313_v59 = vmul.f32 %v4729_v34, %v4303_v58  ;;  %v4304_v60 = vmul.f32 %v5538_v10, %v4288_v43 }
0x26ef   :  { %v4323_v62 = vadd.f32 %v4731_v11, %v4313_v59  ;;  %v4314_v63 = vmul.f32 %v4729_v34, %v4304_v60 }
0x26f1   :  { %v4324_v2 = vadd.f32 %v4731_v11, %v4314_v63  ;;  %v4325_v3 = vsel %vm104_vm1, %v4323_v62, 0.0 }
0x26f2   :  { %v4326_v7 = vrot.slane %v4325_v3, 4 }
0x26f3   :  { %v4332_v12 = vsel %vm104_vm1, %v4324_v2, 0.0 }
0x26f4   :  { %v4327_v14 = vadd.f32 %v4326_v7, %v4325_v3  ;;  %v4333_v15 = vrot.slane %v4332_v12, 4 }
0x26f6   :  { %v4328_v16 = vrot.slane %v4327_v14, 2  ;;  %v4334_v17 = vadd.f32 %v4333_v15, %v4332_v12 }
0x26f8   :  { %v4329_v18 = vadd.f32 %v4328_v16, %v4327_v14  ;;  %v4335_v19 = vrot.slane %v4334_v17, 2 }
0x26fa   :  { %v4330_v20 = vrot.slane %v4329_v18, 1  ;;  %v4336_v22 = vadd.f32 %v4335_v19, %v4334_v17 }
0x26fc   :  { %v4331_v23 = vadd.f32 %v4330_v20, %v4329_v18  ;;  %v4337_v27 = vrot.slane %v4336_v22, 1 }
0x26fe   :  { %v4338_v30 = vadd.f32 %v4337_v27, %v4336_v22  ;;  %v4340_v32 = vmul.f32 0.125, %v4331_v23 }
0x2700   :  { %v4341_v33 = vmul.f32 0.125, %v4338_v30 }
0x2702   :  { %v4356_v35 = vsel %vm4355_vm5, %v4341_v33, %v4340_v32 }
0x2703   :  { %5388 = vmatmul.mubr.msk.f32.vlgmr.msra.gmra.mrb[136].mxu1 %vm104_vm1, %v4356_v35 }
0x27d6   :  { %v4425_v37 = vpop.f32.mrb[136].mxu1 }
0x27d7   :  { %v4426_v0 = vadd.f32 %v4732_v13, %v4425_v37  ;;  %v5389_v38 = vpop.f32.mrb[137].mxu1 }
0x27d9   :  { %4430 = vst.msk [vmem:[%s6507_s21] sm:$0x3] %vm4429_vm6, %v4426_v0 }

</bundles_post_ra>
